<compile_context>
chip_gen: v5e
topology: v5e:2x2
jax: 0.10.0
libtpu: 0.0.40
codegen_flags: <defaults>
</compile_context>

<pallas_src>
import math
from functools import partial

import jax
import jax.numpy as jnp
from jax import lax
from jax.experimental import pallas as pl
from jax.experimental.pallas import tpu as pltpu

_SCALED_SILU = 1.0 / 0.6          # GemNet ScaledSiLU scale
_INV_SQRT_2 = 1.0 / math.sqrt(2.0)
_LANE = 128
_SUBLANE = 8


def _round_up(x, m):
    return ((x + m - 1) // m) * m


def _pad2d(x, rows, cols):
    out = jnp.zeros((rows, cols), x.dtype)
    return out.at[: x.shape[0], : x.shape[1]].set(x)


# --------------------------------------------------------------------------- #
# Single fused kernel: the whole HadamardBlock forward on a padded problem.
# --------------------------------------------------------------------------- #
def _fused_hadamard_kernel(idx_s_ref, idx_t_ref, h_ref, bf_ref,
                           w_bf_ref, w_pre1_ref, w_pre2_ref, w_mlp1_ref,
                           w_res_ref, o_ref, *, n_hidden, use_act,
                           compute_dtype):
    e_pad = idx_s_ref.shape[0]      # padded edge count
    a_pad = h_ref.shape[0]          # padded atom count

    def mm(a, w):
        # bf16 operands -> MXU, f32 accumulation.  Weights arrive pre-cast.
        return jnp.dot(a.astype(compute_dtype), w,
                       preferred_element_type=jnp.float32)

    def act(y):
        # ScaledSiLU in f32 (EUP/VPU path; v5e has no bf16 VPU/EUP).
        return jax.nn.silu(y) * _SCALED_SILU if use_act else y

    def residual(x, w1, w2):
        y = act(mm(x, w1))
        y = act(mm(y, w2))
        return (x + y) * _INV_SQRT_2

    h = h_ref[...]                                         # f32 (a_pad, emb_p)

    # pre_residual(h)
    h_res = residual(h, w_pre1_ref[...], w_pre2_ref[...])

    # dense_bf(bf): Dense(emb_size_bf, emb_size_atom, bias=False, activation=None)
    mlp_bf = mm(bf_ref[...], w_bf_ref[...])                # f32 (e_pad, emb_p)

    # Single (e_pad, a_pad) iota reused for gather AND scatter one-hots.
    # Padded index slots hold -1 -> match no atom -> contribute nothing.
    atom_iota = lax.broadcasted_iota(jnp.int32, (e_pad, a_pad), 1)

    # Gather h_res[idx_s] as a one-hot matmul on the MXU.
    onehot_s = (idx_s_ref[...] == atom_iota).astype(compute_dtype)
    gathered = jnp.dot(onehot_s, h_res.astype(compute_dtype),
                       preferred_element_type=jnp.float32)

    msg = gathered * mlp_bf                                # Hadamard (edges, emb)

    # scatter_sum over idx_t: same one-hot orientation, contract over the edge
    # (first) axis — transposed-LHS matmul on the MXU, no second iota/one-hot.
    onehot_t = (idx_t_ref[...] == atom_iota).astype(compute_dtype)
    x = lax.dot_general(onehot_t, msg.astype(compute_dtype),
                        dimension_numbers=(((0,), (0,)), ((), ())),
                        preferred_element_type=jnp.float32)

    # ScaleFactor is folded into w_mlp1 (host side).  MLP tail in-register.
    x = act(mm(x, w_mlp1_ref[...]))
    for i in range(n_hidden):
        x = residual(x, w_res_ref[2 * i], w_res_ref[2 * i + 1])

    o_ref[...] = x.astype(o_ref.dtype)


# --------------------------------------------------------------------------- #
# Jitted forward: padding + index builds + pallas_call + slice in one dispatch.
# --------------------------------------------------------------------------- #
@partial(jax.jit, static_argnames=("n_hidden", "use_act", "compute_dtype"))
def hadamard_forward(h, bf, idx_s, idx_t,
                     w_bf_pad, w_pre1_pad, w_pre2_pad, w_mlp1_pad, w_res_stack,
                     *, n_hidden, use_act, compute_dtype):
    n_atoms, emb = h.shape
    n_edges = bf.shape[0]
    emb_p = w_pre1_pad.shape[0]
    bf_p = w_bf_pad.shape[0]
    a_pad = _round_up(max(n_atoms, _SUBLANE), _LANE)
    e_pad = _round_up(max(n_edges, _SUBLANE), _LANE)

    # Activations: h in f32 (pre_residual math is f32), bf pre-cast to bf16
    # (only ever consumed as a matmul operand) -> half the DMA.
    h_pad = _pad2d(h.astype(jnp.float32), a_pad, emb_p)
    bf_pad = _pad2d(bf.astype(compute_dtype), e_pad, bf_p)

    # Padded index slots hold -1 so the in-kernel one-hot compare skips them.
    idx_s_col = jnp.full((e_pad, 1), -1, jnp.int32).at[:n_edges, 0].set(
        idx_s.astype(jnp.int32))
    idx_t_col = jnp.full((e_pad, 1), -1, jnp.int32).at[:n_edges, 0].set(
        idx_t.astype(jnp.int32))

    kernel = partial(_fused_hadamard_kernel, n_hidden=n_hidden,
                     use_act=use_act, compute_dtype=compute_dtype)
    n_inputs = 9
    out_pad = pl.pallas_call(
        kernel,
        out_shape=jax.ShapeDtypeStruct((a_pad, emb_p), jnp.float32),
        in_specs=[pl.BlockSpec(memory_space=pltpu.MemorySpace.VMEM)] * n_inputs,
        out_specs=pl.BlockSpec(memory_space=pltpu.MemorySpace.VMEM),
        # Actual VMEM use is ~1-2 MiB; 32 MiB request is safe on v5e/v6e
        # (128 MiB) and v7x (64 MiB) alike.
        compiler_params=pltpu.CompilerParams(vmem_limit_bytes=32 * 1024 * 1024),
    )(idx_s_col, idx_t_col, h_pad, bf_pad,
      w_bf_pad, w_pre1_pad, w_pre2_pad, w_mlp1_pad, w_res_stack)
    return out_pad[:n_atoms, :emb]


# --------------------------------------------------------------------------- #
# HadamardBlock wrapper: parameter setup + one-time padding/bf16 precast.
# --------------------------------------------------------------------------- #
class HadamardBlockPallas:
    def __init__(self, emb_size_atom, emb_size_bf, n_hidden, key,
                 activation="silu", compute_dtype=jnp.bfloat16):
        self.emb = emb_size_atom
        self.emb_bf = emb_size_bf
        self.n_hidden = n_hidden
        self.use_act = activation is not None
        self.compute_dtype = compute_dtype
        self.scale_sum = 1.0        # ScaleFactor: fitted scalar (synthetic value)

        def init_w(k, fan_in, fan_out):
            return (jax.random.normal(k, (fan_in, fan_out), jnp.float32)
                    / jnp.sqrt(jnp.float32(fan_in)))

        keys = jax.random.split(key, 4 + 2 * n_hidden)
        self.w_bf = init_w(keys[0], emb_size_bf, emb_size_atom)      # dense_bf
        self.w_pre1 = init_w(keys[1], emb_size_atom, emb_size_atom)  # pre_residual
        self.w_pre2 = init_w(keys[2], emb_size_atom, emb_size_atom)
        self.w_mlp1 = init_w(keys[3], emb_size_atom, emb_size_atom)  # mlp dense1
        self.w_res = [(init_w(keys[4 + 2 * i], emb_size_atom, emb_size_atom),
                       init_w(keys[5 + 2 * i], emb_size_atom, emb_size_atom))
                      for i in range(n_hidden)]

        # Zero-pad every weight once to lane-dense (multiple-of-128) shapes and
        # pre-cast to the bf16 compute dtype (weights are only ever consumed as
        # MXU operands, so this is numerically identical to casting in-kernel).
        self._emb_p = _round_up(emb_size_atom, _LANE)
        self._bf_p = _round_up(emb_size_bf, _LANE)
        cd = compute_dtype
        self._w_bf_pad = _pad2d(self.w_bf, self._bf_p, self._emb_p).astype(cd)
        self._w_pre1_pad = _pad2d(self.w_pre1, self._emb_p, self._emb_p).astype(cd)
        self._w_pre2_pad = _pad2d(self.w_pre2, self._emb_p, self._emb_p).astype(cd)
        # ScaleFactor folded into w_mlp1 (mm is linear).
        self._w_mlp1_pad = _pad2d(self.w_mlp1 * self.scale_sum,
                                  self._emb_p, self._emb_p).astype(cd)
        res_flat = [w for pair in self.w_res for w in pair]
        if res_flat:
            self._w_res_stack = jnp.stack(
                [_pad2d(w, self._emb_p, self._emb_p).astype(cd) for w in res_flat])
        else:
            # Dummy slab, never read when n_hidden == 0.
            self._w_res_stack = jnp.zeros((1, self._emb_p, self._emb_p), cd)

    def __call__(self, h, bf, idx_s, idx_t):
        return hadamard_forward(
            h, bf, idx_s, idx_t,
            self._w_bf_pad, self._w_pre1_pad, self._w_pre2_pad,
            self._w_mlp1_pad, self._w_res_stack,
            n_hidden=self.n_hidden, use_act=self.use_act,
            compute_dtype=self.compute_dtype)

    # Pure-JAX reference mirroring the kernel's mixed precision
    # (bf16 matmul operands, f32 accumulation, f32 activations, scale folded
    # into w_mlp1 before the bf16 cast).
    def reference(self, h, bf, idx_s, idx_t):
        cd = self.compute_dtype

        def mm(a, w):
            return jnp.dot(a.astype(cd), w.astype(cd),
                           preferred_element_type=jnp.float32)

        def act(y):
            return jax.nn.silu(y) * _SCALED_SILU if self.use_act else y

        def res(x, w1, w2):
            return (x + act(mm(act(mm(x, w1)), w2))) * _INV_SQRT_2

        n_atoms = h.shape[0]
        h_res = res(h.astype(jnp.float32), self.w_pre1, self.w_pre2)
        mlp_bf = mm(bf, self.w_bf)
        # kernel's one-hot gather selects bf16-rounded rows of h_res
        gathered = h_res.astype(cd).astype(jnp.float32)[idx_s]
        msg = gathered * mlp_bf
        x2 = jax.ops.segment_sum(msg.astype(cd).astype(jnp.float32),
                                 idx_t, num_segments=n_atoms)
        x = act(mm(x2, self.w_mlp1 * self.scale_sum))
        for w1, w2 in self.w_res:
            x = res(x, w1, w2)
        return x


if __name__ == "__main__":
    emb_size_atom = 32
    emb_size_bf = 16
    n_hidden = 2
    n_atoms = 8
    n_edges = 24

    key = jax.random.PRNGKey(0)
    k_h, k_bf, k_s, k_t, k_params = jax.random.split(key, 5)

    h = jax.random.normal(k_h, (n_atoms, emb_size_atom), jnp.float32)
    bf = jax.random.normal(k_bf, (n_edges, emb_size_bf), jnp.float32)
    idx_s = jax.random.randint(k_s, (n_edges,), 0, n_atoms, jnp.int32)
    idx_t = jax.random.randint(k_t, (n_edges,), 0, n_atoms, jnp.int32)

    block = HadamardBlockPallas(emb_size_atom, emb_size_bf, n_hidden, k_params,
                                activation="silu")

    out = jax.block_until_ready(block(h, bf, idx_s, idx_t))
    ref = jax.block_until_ready(block.reference(h, bf, idx_s, idx_t))

    assert out.shape == (n_atoms, emb_size_atom)
    max_diff = float(jnp.max(jnp.abs(out - ref)))
    assert jnp.allclose(out, ref, rtol=5e-3, atol=5e-3), (
        f"mismatch vs reference, max abs diff = {max_diff}")

    print("KERNEL_OK")
</pallas_src>

<mosaic_0001>
module attributes {stable_mosaic.version = 11 : i64} {
  func.func @_fused_hadamard_kernel(%arg0: memref<128x1xi32, #tpu.memory_space<vmem>>, %arg1: memref<128x1xi32, #tpu.memory_space<vmem>>, %arg2: memref<128x128xf32, #tpu.memory_space<vmem>>, %arg3: memref<128x128xbf16, #tpu.memory_space<vmem>>, %arg4: memref<128x128xbf16, #tpu.memory_space<vmem>>, %arg5: memref<128x128xbf16, #tpu.memory_space<vmem>>, %arg6: memref<128x128xbf16, #tpu.memory_space<vmem>>, %arg7: memref<128x128xbf16, #tpu.memory_space<vmem>>, %arg8: memref<4x128x128xbf16, #tpu.memory_space<vmem>>, %arg9: memref<128x128xf32, #tpu.memory_space<vmem>>) attributes {dimension_semantics = [], scalar_prefetch = 0 : i64, scratch_operands = 0 : i64, tpu.core_type = #tpu.core_type<tc>} {
    %c0 = arith.constant 0 : index
    %c0_0 = arith.constant 0 : index
    %0 = vector.load %arg2[%c0, %c0_0] : memref<128x128xf32, #tpu.memory_space<vmem>>, vector<128x128xf32>
    %c0_1 = arith.constant 0 : index
    %c0_2 = arith.constant 0 : index
    %1 = vector.load %arg5[%c0_1, %c0_2] : memref<128x128xbf16, #tpu.memory_space<vmem>>, vector<128x128xbf16>
    %c0_3 = arith.constant 0 : index
    %c0_4 = arith.constant 0 : index
    %2 = vector.load %arg6[%c0_3, %c0_4] : memref<128x128xbf16, #tpu.memory_space<vmem>>, vector<128x128xbf16>
    %3 = arith.truncf %0 : vector<128x128xf32> to vector<128x128xbf16>
    %cst = arith.constant dense<0.000000e+00> : vector<128x128xf32>
    %4 = tpu.matmul %3, %1, %cst {dimension_numbers = #tpu.dot_dimension_numbers<[1], [0], [0], [1], [0, 0, 1, 1], [], []>} : vector<128x128xbf16>, vector<128x128xbf16>, vector<128x128xf32> -> vector<128x128xf32>
    %5 = arith.negf %4 : vector<128x128xf32>
    %6 = math.exp %5 : vector<128x128xf32>
    %cst_5 = arith.constant 1.000000e+00 : f32
    %7 = vector.broadcast %cst_5 : f32 to vector<128x128xf32>
    %8 = arith.addf %7, %6 : vector<128x128xf32>
    %9 = arith.divf %7, %8 : vector<128x128xf32>
    %10 = arith.mulf %4, %9 : vector<128x128xf32>
    %cst_6 = arith.constant 1.66666663 : f32
    %11 = vector.broadcast %cst_6 : f32 to vector<128x128xf32>
    %12 = arith.mulf %10, %11 : vector<128x128xf32>
    %13 = arith.truncf %12 : vector<128x128xf32> to vector<128x128xbf16>
    %cst_7 = arith.constant dense<0.000000e+00> : vector<128x128xf32>
    %14 = tpu.matmul %13, %2, %cst_7 {dimension_numbers = #tpu.dot_dimension_numbers<[1], [0], [0], [1], [0, 0, 1, 1], [], []>} : vector<128x128xbf16>, vector<128x128xbf16>, vector<128x128xf32> -> vector<128x128xf32>
    %15 = arith.negf %14 : vector<128x128xf32>
    %16 = math.exp %15 : vector<128x128xf32>
    %cst_8 = arith.constant 1.000000e+00 : f32
    %17 = vector.broadcast %cst_8 : f32 to vector<128x128xf32>
    %18 = arith.addf %17, %16 : vector<128x128xf32>
    %19 = arith.divf %17, %18 : vector<128x128xf32>
    %20 = arith.mulf %14, %19 : vector<128x128xf32>
    %cst_9 = arith.constant 1.66666663 : f32
    %21 = vector.broadcast %cst_9 : f32 to vector<128x128xf32>
    %22 = arith.mulf %20, %21 : vector<128x128xf32>
    %23 = arith.addf %0, %22 : vector<128x128xf32>
    %cst_10 = arith.constant 0.707106769 : f32
    %24 = vector.broadcast %cst_10 : f32 to vector<128x128xf32>
    %25 = arith.mulf %23, %24 : vector<128x128xf32>
    %c0_11 = arith.constant 0 : index
    %c0_12 = arith.constant 0 : index
    %26 = vector.load %arg3[%c0_11, %c0_12] : memref<128x128xbf16, #tpu.memory_space<vmem>>, vector<128x128xbf16>
    %c0_13 = arith.constant 0 : index
    %c0_14 = arith.constant 0 : index
    %27 = vector.load %arg4[%c0_13, %c0_14] : memref<128x128xbf16, #tpu.memory_space<vmem>>, vector<128x128xbf16>
    %cst_15 = arith.constant dense<0.000000e+00> : vector<128x128xf32>
    %28 = tpu.matmul %26, %27, %cst_15 {dimension_numbers = #tpu.dot_dimension_numbers<[1], [0], [0], [1], [0, 0, 1, 1], [], []>} : vector<128x128xbf16>, vector<128x128xbf16>, vector<128x128xf32> -> vector<128x128xf32>
    %29 = tpu.iota {dimensions = array<i32: 1>} : vector<128x128xi32>
    %c0_16 = arith.constant 0 : index
    %c0_17 = arith.constant 0 : index
    %30 = vector.load %arg0[%c0_16, %c0_17] : memref<128x1xi32, #tpu.memory_space<vmem>>, vector<128x1xi32>
    %31 = vector.broadcast %30 : vector<128x1xi32> to vector<128x128xi32>
    %32 = arith.cmpi eq, %31, %29 : vector<128x128xi32>
    %33 = arith.extui %32 : vector<128x128xi1> to vector<128x128xi32>
    %34 = arith.sitofp %33 : vector<128x128xi32> to vector<128x128xf32>
    %35 = arith.truncf %34 : vector<128x128xf32> to vector<128x128xbf16>
    %36 = arith.truncf %25 : vector<128x128xf32> to vector<128x128xbf16>
    %cst_18 = arith.constant dense<0.000000e+00> : vector<128x128xf32>
    %37 = tpu.matmul %35, %36, %cst_18 {dimension_numbers = #tpu.dot_dimension_numbers<[1], [0], [0], [1], [0, 0, 1, 1], [], []>} : vector<128x128xbf16>, vector<128x128xbf16>, vector<128x128xf32> -> vector<128x128xf32>
    %38 = arith.mulf %37, %28 : vector<128x128xf32>
    %c0_19 = arith.constant 0 : index
    %c0_20 = arith.constant 0 : index
    %39 = vector.load %arg1[%c0_19, %c0_20] : memref<128x1xi32, #tpu.memory_space<vmem>>, vector<128x1xi32>
    %40 = vector.broadcast %39 : vector<128x1xi32> to vector<128x128xi32>
    %41 = arith.cmpi eq, %40, %29 : vector<128x128xi32>
    %42 = arith.extui %41 : vector<128x128xi1> to vector<128x128xi32>
    %43 = arith.sitofp %42 : vector<128x128xi32> to vector<128x128xf32>
    %44 = arith.truncf %43 : vector<128x128xf32> to vector<128x128xbf16>
    %45 = arith.truncf %38 : vector<128x128xf32> to vector<128x128xbf16>
    %cst_21 = arith.constant dense<0.000000e+00> : vector<128x128xf32>
    %46 = tpu.matmul %44, %45, %cst_21 {dimension_numbers = #tpu.dot_dimension_numbers<[0], [0], [1], [1], [0, 1, 1, 1], [], []>} : vector<128x128xbf16>, vector<128x128xbf16>, vector<128x128xf32> -> vector<128x128xf32>
    %c0_22 = arith.constant 0 : index
    %c0_23 = arith.constant 0 : index
    %47 = vector.load %arg7[%c0_22, %c0_23] : memref<128x128xbf16, #tpu.memory_space<vmem>>, vector<128x128xbf16>
    %48 = arith.truncf %46 : vector<128x128xf32> to vector<128x128xbf16>
    %cst_24 = arith.constant dense<0.000000e+00> : vector<128x128xf32>
    %49 = tpu.matmul %48, %47, %cst_24 {dimension_numbers = #tpu.dot_dimension_numbers<[1], [0], [0], [1], [0, 0, 1, 1], [], []>} : vector<128x128xbf16>, vector<128x128xbf16>, vector<128x128xf32> -> vector<128x128xf32>
    %50 = arith.negf %49 : vector<128x128xf32>
    %51 = math.exp %50 : vector<128x128xf32>
    %cst_25 = arith.constant 1.000000e+00 : f32
    %52 = vector.broadcast %cst_25 : f32 to vector<128x128xf32>
    %53 = arith.addf %52, %51 : vector<128x128xf32>
    %54 = arith.divf %52, %53 : vector<128x128xf32>
    %55 = arith.mulf %49, %54 : vector<128x128xf32>
    %cst_26 = arith.constant 1.66666663 : f32
    %56 = vector.broadcast %cst_26 : f32 to vector<128x128xf32>
    %57 = arith.mulf %55, %56 : vector<128x128xf32>
    %c0_27 = arith.constant 0 : index
    %c0_28 = arith.constant 0 : index
    %c0_29 = arith.constant 0 : index
    %58 = vector.load %arg8[%c0_27, %c0_28, %c0_29] : memref<4x128x128xbf16, #tpu.memory_space<vmem>>, vector<1x128x128xbf16>
    %59 = vector.shape_cast %58 : vector<1x128x128xbf16> to vector<128x128xbf16>
    %c1 = arith.constant 1 : index
    %c0_30 = arith.constant 0 : index
    %c0_31 = arith.constant 0 : index
    %60 = vector.load %arg8[%c1, %c0_30, %c0_31] : memref<4x128x128xbf16, #tpu.memory_space<vmem>>, vector<1x128x128xbf16>
    %61 = vector.shape_cast %60 : vector<1x128x128xbf16> to vector<128x128xbf16>
    %62 = arith.truncf %57 : vector<128x128xf32> to vector<128x128xbf16>
    %cst_32 = arith.constant dense<0.000000e+00> : vector<128x128xf32>
    %63 = tpu.matmul %62, %59, %cst_32 {dimension_numbers = #tpu.dot_dimension_numbers<[1], [0], [0], [1], [0, 0, 1, 1], [], []>} : vector<128x128xbf16>, vector<128x128xbf16>, vector<128x128xf32> -> vector<128x128xf32>
    %64 = arith.negf %63 : vector<128x128xf32>
    %65 = math.exp %64 : vector<128x128xf32>
    %cst_33 = arith.constant 1.000000e+00 : f32
    %66 = vector.broadcast %cst_33 : f32 to vector<128x128xf32>
    %67 = arith.addf %66, %65 : vector<128x128xf32>
    %68 = arith.divf %66, %67 : vector<128x128xf32>
    %69 = arith.mulf %63, %68 : vector<128x128xf32>
    %cst_34 = arith.constant 1.66666663 : f32
    %70 = vector.broadcast %cst_34 : f32 to vector<128x128xf32>
    %71 = arith.mulf %69, %70 : vector<128x128xf32>
    %72 = arith.truncf %71 : vector<128x128xf32> to vector<128x128xbf16>
    %cst_35 = arith.constant dense<0.000000e+00> : vector<128x128xf32>
    %73 = tpu.matmul %72, %61, %cst_35 {dimension_numbers = #tpu.dot_dimension_numbers<[1], [0], [0], [1], [0, 0, 1, 1], [], []>} : vector<128x128xbf16>, vector<128x128xbf16>, vector<128x128xf32> -> vector<128x128xf32>
    %74 = arith.negf %73 : vector<128x128xf32>
    %75 = math.exp %74 : vector<128x128xf32>
    %cst_36 = arith.constant 1.000000e+00 : f32
    %76 = vector.broadcast %cst_36 : f32 to vector<128x128xf32>
    %77 = arith.addf %76, %75 : vector<128x128xf32>
    %78 = arith.divf %76, %77 : vector<128x128xf32>
    %79 = arith.mulf %73, %78 : vector<128x128xf32>
    %cst_37 = arith.constant 1.66666663 : f32
    %80 = vector.broadcast %cst_37 : f32 to vector<128x128xf32>
    %81 = arith.mulf %79, %80 : vector<128x128xf32>
    %82 = arith.addf %57, %81 : vector<128x128xf32>
    %cst_38 = arith.constant 0.707106769 : f32
    %83 = vector.broadcast %cst_38 : f32 to vector<128x128xf32>
    %84 = arith.mulf %82, %83 : vector<128x128xf32>
    %c2 = arith.constant 2 : index
    %c0_39 = arith.constant 0 : index
    %c0_40 = arith.constant 0 : index
    %85 = vector.load %arg8[%c2, %c0_39, %c0_40] : memref<4x128x128xbf16, #tpu.memory_space<vmem>>, vector<1x128x128xbf16>
    %86 = vector.shape_cast %85 : vector<1x128x128xbf16> to vector<128x128xbf16>
    %c3 = arith.constant 3 : index
    %c0_41 = arith.constant 0 : index
    %c0_42 = arith.constant 0 : index
    %87 = vector.load %arg8[%c3, %c0_41, %c0_42] : memref<4x128x128xbf16, #tpu.memory_space<vmem>>, vector<1x128x128xbf16>
    %88 = vector.shape_cast %87 : vector<1x128x128xbf16> to vector<128x128xbf16>
    %89 = arith.truncf %84 : vector<128x128xf32> to vector<128x128xbf16>
    %cst_43 = arith.constant dense<0.000000e+00> : vector<128x128xf32>
    %90 = tpu.matmul %89, %86, %cst_43 {dimension_numbers = #tpu.dot_dimension_numbers<[1], [0], [0], [1], [0, 0, 1, 1], [], []>} : vector<128x128xbf16>, vector<128x128xbf16>, vector<128x128xf32> -> vector<128x128xf32>
    %91 = arith.negf %90 : vector<128x128xf32>
    %92 = math.exp %91 : vector<128x128xf32>
    %cst_44 = arith.constant 1.000000e+00 : f32
    %93 = vector.broadcast %cst_44 : f32 to vector<128x128xf32>
    %94 = arith.addf %93, %92 : vector<128x128xf32>
    %95 = arith.divf %93, %94 : vector<128x128xf32>
    %96 = arith.mulf %90, %95 : vector<128x128xf32>
    %cst_45 = arith.constant 1.66666663 : f32
    %97 = vector.broadcast %cst_45 : f32 to vector<128x128xf32>
    %98 = arith.mulf %96, %97 : vector<128x128xf32>
    %99 = arith.truncf %98 : vector<128x128xf32> to vector<128x128xbf16>
    %cst_46 = arith.constant dense<0.000000e+00> : vector<128x128xf32>
    %100 = tpu.matmul %99, %88, %cst_46 {dimension_numbers = #tpu.dot_dimension_numbers<[1], [0], [0], [1], [0, 0, 1, 1], [], []>} : vector<128x128xbf16>, vector<128x128xbf16>, vector<128x128xf32> -> vector<128x128xf32>
    %101 = arith.negf %100 : vector<128x128xf32>
    %102 = math.exp %101 : vector<128x128xf32>
    %cst_47 = arith.constant 1.000000e+00 : f32
    %103 = vector.broadcast %cst_47 : f32 to vector<128x128xf32>
    %104 = arith.addf %103, %102 : vector<128x128xf32>
    %105 = arith.divf %103, %104 : vector<128x128xf32>
    %106 = arith.mulf %100, %105 : vector<128x128xf32>
    %cst_48 = arith.constant 1.66666663 : f32
    %107 = vector.broadcast %cst_48 : f32 to vector<128x128xf32>
    %108 = arith.mulf %106, %107 : vector<128x128xf32>
    %109 = arith.addf %84, %108 : vector<128x128xf32>
    %cst_49 = arith.constant 0.707106769 : f32
    %110 = vector.broadcast %cst_49 : f32 to vector<128x128xf32>
    %111 = arith.mulf %109, %110 : vector<128x128xf32>
    %c0_50 = arith.constant 0 : index
    %c0_51 = arith.constant 0 : index
    %112 = vector.load %arg9[%c0_50, %c0_51] : memref<128x128xf32, #tpu.memory_space<vmem>>, vector<128x128xf32>
    tpu.vector_store %arg9[%c0_50, %c0_51], %111 {strides = array<i32>} : memref<128x128xf32, #tpu.memory_space<vmem>>, vector<128x128xf32>,
    return
  }
}

</mosaic_0001>

<bundles_post_ra>
// kernel: hadamard_forward.1
= control target key start
LH: loop header
LB: loop body
LE: loop exit
PB: predicated region body
PF: predicated region fallthrough
CT: control target
= control target key end

     0   :  { %s7189_s5 = inlined_call_operand.vmem [shape: bf16[128,128], index: 5, kind: input, shape index: {}]   ;;  %s7190_s2 = inlined_call_operand.vmem [shape: f32[128,128], index: 2, kind: input, shape index: {}]   ;;  %s7191_s6 = inlined_call_operand.vmem [shape: bf16[128,128], index: 6, kind: input, shape index: {}]   ;;  %s7192_s0 = inlined_call_operand.vmem [shape: s32[128,1], index: 0, kind: input, shape index: {}]   ;;  %s7193_s1 = inlined_call_operand.vmem [shape: s32[128,1], index: 1, kind: input, shape index: {}]   ;;  %s7194_s4 = inlined_call_operand.vmem [shape: bf16[128,128], index: 4, kind: input, shape index: {}]   ;;  %s7195_s3 = inlined_call_operand.vmem [shape: bf16[128,128], index: 3, kind: input, shape index: {}]   ;;  %s7196_s7 = inlined_call_operand.vmem [shape: bf16[128,128], index: 7, kind: input, shape index: {}]   ;;  %s7197_s8 = inlined_call_operand.vmem [shape: bf16[4,128,128], index: 8, kind: input, shape index: {}]   ;;  %s7198_s9 = inlined_call_operand.vmem [shape: f32[128,128], index: 9, kind: output, shape index: {}]  }
   0x1   :  { %v4434_v0 = vld [vmem:[%s7189_s5 + $0x38] sm:$0xff]  ;;  %v4433_v1 = vld [vmem:[%s7189_s5 + $0x30] sm:$0xff]  ;;  %v4432_v2 = vld [vmem:[%s7189_s5 + $0x28] sm:$0xff] }
   0x2   :  { %136 = vmatpush.bf16.msra.mxu0 %v4434_v0  ;;  %4499 = vmatpush.bf16.msra.mxu2 %v4434_v0  ;;  %v4431_v3 = vld [vmem:[%s7189_s5 + $0x20] sm:$0xff]  ;;  %v4430_v4 = vld [vmem:[%s7189_s5 + $0x18] sm:$0xff]  ;;  %v4429_v5 = vld [vmem:[%s7189_s5 + $0x10] sm:$0xff] }
   0x3   :  { %v4428_v6 = vld [vmem:[%s7189_s5 + $0x8] sm:$0xff]  ;;  %v4427_v7 = vld [vmem:[%s7189_s5] sm:$0xff]  ;;  %v34_v14 = vld [vmem:[%s7190_s2 + $0x10] sm:$0xff] }
   0x4   :  { %v32_v8 = vld [vmem:[%s7190_s2] sm:$0xff]  ;;  %v33_v9 = vld [vmem:[%s7190_s2 + $0x8] sm:$0xff]  ;;  %v35_v15 = vld [vmem:[%s7190_s2 + $0x18] sm:$0xff] }
   0x5   :  { %v40_v10 = vld [vmem:[%s7190_s2 + $0x40] sm:$0xff]  ;;  %v41_v11 = vld [vmem:[%s7190_s2 + $0x48] sm:$0xff]  ;;  %v80_v12 = vpack.c.bf16 %v33_v9, %v32_v8  ;;  %v42_v16 = vld [vmem:[%s7190_s2 + $0x50] sm:$0xff]  ;;  %v81_v18 = vpack.c.bf16 %v35_v15, %v34_v14 }
   0x6   :  { %137 = vmatpush.bf16.msra.mxu0 %v4433_v1  ;;  %4500 = vmatpush.bf16.msra.mxu2 %v4433_v1  ;;  %v84_v13 = vpack.c.bf16 %v41_v11, %v40_v10  ;;  %v43_v17 = vld [vmem:[%s7190_s2 + $0x58] sm:$0xff]  ;;  %v36_v20 = vld [vmem:[%s7190_s2 + $0x20] sm:$0xff]  ;;  %v37_v21 = vld [vmem:[%s7190_s2 + $0x28] sm:$0xff] }
   0x7   :  { %v85_v19 = vpack.c.bf16 %v43_v17, %v42_v16  ;;  %v44_v22 = vld [vmem:[%s7190_s2 + $0x60] sm:$0xff]  ;;  %v45_v23 = vld [vmem:[%s7190_s2 + $0x68] sm:$0xff]  ;;  %v82_v24 = vpack.c.bf16 %v37_v21, %v36_v20  ;;  %v38_v26 = vld [vmem:[%s7190_s2 + $0x30] sm:$0xff] }
   0x8   :  { %v86_v25 = vpack.c.bf16 %v45_v23, %v44_v22  ;;  %v39_v27 = vld [vmem:[%s7190_s2 + $0x38] sm:$0xff]  ;;  %v46_v28 = vld [vmem:[%s7190_s2 + $0x70] sm:$0xff]  ;;  %v4440_v34 = vld [vmem:[%s7191_s6 + $0x28] sm:$0xff] }
   0x9   :  { %v47_v29 = vld [vmem:[%s7190_s2 + $0x78] sm:$0xff]  ;;  %v83_v30 = vpack.c.bf16 %v39_v27, %v38_v26  ;;  %v4441_v33 = vld [vmem:[%s7191_s6 + $0x30] sm:$0xff]  ;;  %v4439_v35 = vld [vmem:[%s7191_s6 + $0x20] sm:$0xff] }
   0xa   :  { %138 = vmatpush.bf16.msra.mxu0 %v4432_v2  ;;  %4501 = vmatpush.bf16.msra.mxu2 %v4432_v2  ;;  %v87_v31 = vpack.c.bf16 %v47_v29, %v46_v28  ;;  %v4442_v32 = vld [vmem:[%s7191_s6 + $0x38] sm:$0xff]  ;;  %v4437_v39 = vld [vmem:[%s7191_s6 + $0x10] sm:$0xff]  ;;  %v4436_v41 = vld [vmem:[%s7191_s6 + $0x8] sm:$0xff] }
   0xb   :  { %577 = vmatpush.bf16.msra.mxu1 %v4442_v32  ;;  %4507 = vmatpush.bf16.msra.mxu3 %v4442_v32  ;;  %v4438_v36 = vld [vmem:[%s7191_s6 + $0x18] sm:$0xff]  ;;  %v4435_v47 = vld [vmem:[%s7191_s6] sm:$0xff] }
   0xe   :  { %139 = vmatpush.bf16.msra.mxu0 %v4431_v3  ;;  %4502 = vmatpush.bf16.msra.mxu2 %v4431_v3 }
   0xf   :  { %578 = vmatpush.bf16.msra.mxu1 %v4441_v33  ;;  %4508 = vmatpush.bf16.msra.mxu3 %v4441_v33 }
  0x12   :  { %140 = vmatpush.bf16.msra.mxu0 %v4430_v4  ;;  %4503 = vmatpush.bf16.msra.mxu2 %v4430_v4 }
  0x13   :  { %579 = vmatpush.bf16.msra.mxu1 %v4440_v34  ;;  %4509 = vmatpush.bf16.msra.mxu3 %v4440_v34 }
  0x16   :  { %141 = vmatpush.bf16.msra.mxu0 %v4429_v5  ;;  %4504 = vmatpush.bf16.msra.mxu2 %v4429_v5 }
  0x17   :  { %580 = vmatpush.bf16.msra.mxu1 %v4439_v35  ;;  %4510 = vmatpush.bf16.msra.mxu3 %v4439_v35 }
  0x1a   :  { %142 = vmatpush.bf16.msra.mxu0 %v4428_v6  ;;  %4505 = vmatpush.bf16.msra.mxu2 %v4428_v6 }
  0x1b   :  { %581 = vmatpush.bf16.msra.mxu1 %v4438_v36  ;;  %4511 = vmatpush.bf16.msra.mxu3 %v4438_v36 }
  0x1e   :  { %143 = vmatpush.bf16.msra.mxu0 %v4427_v7  ;;  %4506 = vmatpush.bf16.msra.mxu2 %v4427_v7 }
  0x1f   :  { %582 = vmatpush.bf16.msra.mxu1 %v4437_v39  ;;  %4512 = vmatpush.bf16.msra.mxu3 %v4437_v39 }
  0x21   :  { %144 = vmatmul.bf16.vlgmr.msra.gmra.mxu0 %v80_v12  ;;  %164 = vmatmul.bf16.vlgmr.msra.gmra.mxu2 %v84_v13 }
  0x23   :  { %583 = vmatpush.bf16.msra.mxu1 %v4436_v41  ;;  %4513 = vmatpush.bf16.msra.mxu3 %v4436_v41 }
  0x27   :  { %584 = vmatpush.bf16.msra.mxu1 %v4435_v47  ;;  %4514 = vmatpush.bf16.msra.mxu3 %v4435_v47 }
  0x31   :  { %149 = vmatmul.bf16.gmra.mxu0 %v81_v18  ;;  %169 = vmatmul.bf16.gmra.mxu2 %v85_v19 }
  0x41   :  { %154 = vmatmul.bf16.gmra.mxu0 %v82_v24  ;;  %174 = vmatmul.bf16.gmra.mxu2 %v86_v25 }
  0x51   :  { %159 = vmatmul.bf16.gmra.mxu0 %v83_v30  ;;  %179 = vmatmul.bf16.gmra.mxu2 %v87_v31 }
  0x9e   :  { %v5168_v37 = vpop.f32.mrf.mxu0 }
  0x9f   :  { %v3963_v38 = vmul.f32 -1.442695, %v5168_v37 }
  0xa1   :  { %4564 = vpow2.f32 %v3963_v38 }
  0xa4   :  { %v5174_v40 = vpop.f32.mrf.mxu2 }
  0xa5   :  { %v3971_v42 = vmul.f32 -1.442695, %v5174_v40 }
  0xa6   :  { %v5180_v43 = vpop.f32.mrf.mxu0 }
  0xa7   :  { %v4565_v44 = vpop.eup %4564  ;;  %4566 = vpow2.f32 %v3971_v42  ;;  %v3964_v45 = vmul.f32 -1.442695, %v5180_v43 }
  0xa8   :  { %v233_v46 = vadd.f32 1.0, %v4565_v44 }
  0xa9   :  { %4568 = vpow2.f32 %v3964_v45 }
  0xaa   :  { %4570 = vrcp.f32 %v233_v46  ;;  %v258_v5 = vand.u32 2147483647, %v233_v46  ;;  %vm254_vm0 = vweird.f32 %v233_v46  ;;  %v260_v9 = vand.u32 2147483648, %v233_v46 }
  0xac   :  { %v5186_v48 = vpop.f32.mrf.mxu2  ;;  %vm5224_vm5 = vcmp.eq.f32.partialorder %v258_v5, 8.507059e+37  ;;  %v261_v22 = vor.u32 1.1754944e-38, %v260_v9 }
  0xad   :  { %v4567_v49 = vpop.eup %4566  ;;  %v3972_v50 = vmul.f32 -1.442695, %v5186_v48 }
  0xae   :  { %v5189_v51 = vadd.f32 1.0, %v4567_v49  ;;  %v5191_v52 = vpop.f32.mrf.mxu0 }
  0xaf   :  { %v4569_v53 = vpop.eup %4568  ;;  %4572 = vpow2.f32 %v3972_v50  ;;  %v3965_v54 = vmul.f32 -1.442695, %v5191_v52 }
  0xb0   :  { %v5194_v55 = vpop.eup %4570  ;;  %4574 = vrcp.f32 %v5189_v51  ;;  %v234_v57 = vadd.f32 1.0, %v4569_v53  ;;  %v380_v23 = vand.u32 2147483648, %v5189_v51  ;;  %vm374_vm8 = vweird.f32 %v5189_v51 }
  0xb1   :  { %v250_v56 = vmul.f32 %v5194_v55, %v233_v46  ;;  %4576 = vpow2.f32 %v3965_v54  ;;  %vm255_vm1 = vweird.f32 %v5194_v55  ;;  %v378_v35 = vand.u32 2147483647, %v5189_v51 }
  0xb2   :  { %4578 = vrcp.f32 %v234_v57  ;;  %vm269_vm2 = vweird.f32 %v234_v57  ;;  %v275_v11 = vand.u32 2147483648, %v234_v57  ;;  %vm5220_vm4 = vmor %vm254_vm0, %vm255_vm1  ;;  %v273_v19 = vand.u32 2147483647, %v234_v57 }
  0xb3   :  { %v251_v58 = vsub.f32 1.0, %v250_v56  ;;  %v381_v45 = vor.u32 1.1754944e-38, %v380_v23  ;;  %vm379_vm11 = vcmp.eq.f32.partialorder %v378_v35, 8.507059e+37 }
  0xb4   :  { %v5198_v59 = vpop.f32.mrf.mxu2  ;;  %v276_v28 = vor.u32 1.1754944e-38, %v275_v11  ;;  %vm274_vm9 = vcmp.eq.f32.partialorder %v273_v19, 8.507059e+37 }
  0xb5   :  { %v4573_v60 = vpop.eup %4572  ;;  %v3973_v61 = vmul.f32 -1.442695, %v5198_v59  ;;  %v252_v3 = vmul.f32 %v5194_v55, %v251_v58 }
  0xb6   :  { %v5201_v62 = vpop.eup %4574  ;;  %v5203_v63 = vadd.f32 1.0, %v4573_v60  ;;  %v5205_v0 = vpop.f32.mrf.mxu0 }
  0xb7   :  { %v4577_v1 = vpop.eup %4576  ;;  %v370_v2 = vmul.f32 %v5201_v62, %v5189_v51  ;;  %4580 = vpow2.f32 %v3973_v61  ;;  %v3966_v8 = vmul.f32 -1.442695, %v5205_v0  ;;  %v253_v12 = vadd.f32 %v5194_v55, %v252_v3 }
  0xb8   :  { %4582 = vrcp.f32 %v5203_v63  ;;  %v4579_v4 = vpop.eup %4578  ;;  %v5211_v7 = vadd.f32 1.0, %v4577_v1  ;;  %vm375_vm6 = vweird.f32 %v5201_v62  ;;  %v393_v46 = vand.u32 2147483647, %v5203_v63 }
  0xb9   :  { %v371_v6 = vsub.f32 1.0, %v370_v2  ;;  %v265_v10 = vmul.f32 %v4579_v4, %v234_v57  ;;  %vm270_vm3 = vweird.f32 %v4579_v4  ;;  %v257_v30 = vsel %vm5220_vm4, %v5194_v55, %v253_v12  ;;  %vm5263_vm10 = vmor %vm374_vm8, %vm375_vm6 }
  0xba   :  { %4584 = vrcp.f32 %v5211_v7  ;;  %vm5239_vm7 = vmor %vm269_vm2, %vm270_vm3  ;;  %v262_v42 = vsel %vm5224_vm5, %v261_v22, %v257_v30  ;;  %v395_v50 = vand.u32 2147483648, %v5203_v63  ;;  %vm389_vm12 = vweird.f32 %v5203_v63 }
  0xbb   :  { %v372_v13 = vmul.f32 %v5201_v62, %v371_v6  ;;  %v266_v14 = vsub.f32 1.0, %v265_v10  ;;  %4586 = vpow2.f32 %v3966_v8  ;;  %v489_v60 = vmul.f32 %v262_v42, %v5168_v37 }
  0xbc   :  { %v5218_v15 = vpop.f32.mrf.mxu2  ;;  %vm5285_vm13 = vcmp.eq.f32.partialorder %v393_v46, 8.507059e+37  ;;  %v288_v2 = vand.u32 2147483647, %v5211_v7  ;;  %v290_v3 = vand.u32 2147483648, %v5211_v7  ;;  %v396_v5 = vor.u32 1.1754944e-38, %v395_v50 }
  0xbd   :  { %v4581_v16 = vpop.eup %4580  ;;  %v3974_v20 = vmul.f32 -1.442695, %v5218_v15  ;;  %v267_v24 = vmul.f32 %v4579_v4, %v266_v14  ;;  %v373_v31 = vadd.f32 %v5201_v62, %v372_v13  ;;  %v505_v10 = vmul.f32 1.6666666, %v489_v60 }
  0xbe   :  { %v5229_v21 = vpop.eup %4582  ;;  %v5232_v25 = vadd.f32 1.0, %v4581_v16  ;;  %v5234_v26 = vpop.f32.mrf.mxu0  ;;  %vm284_vm15 = vweird.f32 %v5211_v7  ;;  %vm5303_vm1 = vcmp.eq.f32.partialorder %v288_v2, 8.507059e+37  ;;  %v291_v13 = vor.u32 1.1754944e-38, %v290_v3 }
  0xbf   :  { %v385_v29 = vmul.f32 %v5229_v21, %v5203_v63  ;;  %4588 = vpow2.f32 %v3974_v20  ;;  %v268_v32 = vadd.f32 %v4579_v4, %v267_v24  ;;  %v3967_v39 = vmul.f32 -1.442695, %v5234_v26 }
  0xc0   :  { %4590 = vrcp.f32 %v5232_v25  ;;  %v5250_v33 = vpop.eup %4584  ;;  %v377_v47 = vsel %vm5263_vm10, %v5201_v62, %v373_v31  ;;  %vm390_vm14 = vweird.f32 %v5229_v21  ;;  %v408_v18 = vand.u32 2147483647, %v5232_v25 }
  0xc1   :  { %v386_v34 = vsub.f32 1.0, %v385_v29  ;;  %v272_v36 = vsel %vm5239_vm7, %v4579_v4, %v268_v32  ;;  %v280_v38 = vmul.f32 %v5250_v33, %v5211_v7  ;;  %v4587_v41 = vpop.eup %4586  ;;  %4592 = vpow2.f32 %v3967_v39  ;;  %vm5310_vm2 = vmor %vm389_vm12, %vm390_vm14 }
  0xc2   :  { %v277_v49 = vsel %vm274_vm9, %v276_v28, %v272_v36  ;;  %v5272_v51 = vadd.f32 1.0, %v4587_v41  ;;  %v382_v62 = vsel %vm379_vm11, %v381_v45, %v377_v47  ;;  %vm285_vm0 = vweird.f32 %v5250_v33 }
  0xc3   :  { %v387_v55 = vmul.f32 %v5229_v21, %v386_v34  ;;  %v281_v56 = vsub.f32 1.0, %v280_v38  ;;  %v490_v4 = vmul.f32 %v277_v49, %v5180_v43  ;;  %v497_v11 = vmul.f32 %v382_v62, %v5174_v40  ;;  %vm5329_vm3 = vmor %vm284_vm15, %vm285_vm0 }
  0xc4   :  { %v5274_v53 = vpop.f32.mrf.mxu2  ;;  %4594 = vrcp.f32 %v5272_v51  ;;  %v410_v24 = vand.u32 2147483648, %v5232_v25  ;;  %vm404_vm4 = vweird.f32 %v5232_v25  ;;  %v305_v29 = vand.u32 2147483648, %v5272_v51 }
  0xc5   :  { %v4589_v54 = vpop.eup %4588  ;;  %v3975_v57 = vmul.f32 -1.442695, %v5274_v53  ;;  %v388_v8 = vadd.f32 %v5229_v21, %v387_v55  ;;  %v282_v9 = vmul.f32 %v5250_v33, %v281_v56  ;;  %v506_v20 = vmul.f32 1.6666666, %v490_v4 }
  0xc6   :  { %v5278_v58 = vpop.eup %4590  ;;  %v5283_v61 = vpop.f32.mrf.mxu0  ;;  %v5294_v6 = vadd.f32 1.0, %v4589_v54  ;;  %v5323_v27 = vmul.f32 1.6666666, %v497_v11  ;;  %vm299_vm5 = vweird.f32 %v5272_v51  ;;  %v411_v42 = vor.u32 1.1754944e-38, %v410_v24 }
  0xc7   :  { %v400_v37 = vmul.f32 %v5278_v58, %v5232_v25  ;;  %4596 = vpow2.f32 %v3975_v57  ;;  %v4593_v43 = vpop.eup %4592  ;;  %v3968_v14 = vmul.f32 -1.442695, %v5283_v61  ;;  %v392_v22 = vsel %vm5310_vm2, %v5229_v21, %v388_v8 }
  0xc8   :  { %4598 = vrcp.f32 %v5294_v6  ;;  %v5315_v19 = vadd.f32 1.0, %v4593_v43  ;;  %v283_v23 = vadd.f32 %v5250_v33, %v282_v9  ;;  %v303_v21 = vand.u32 2147483647, %v5272_v51 }
  0xc9   :  { %v401_v40 = vsub.f32 1.0, %v400_v37  ;;  %v397_v35 = vsel %vm5285_vm13, %v396_v5, %v392_v22  ;;  %v521_v39 = vpack.c.bf16 %v506_v20, %v505_v10  ;;  %vm405_vm7 = vweird.f32 %v5278_v58 }
  0xca   :  { %v4595_v16 = vpop.eup %4594  ;;  %4600 = vrcp.f32 %v5315_v19  ;;  %v287_v41 = vsel %vm5329_vm3, %v5250_v33, %v283_v23  ;;  %vm5359_vm9 = vcmp.eq.f32.partialorder %v303_v21, 8.507059e+37  ;;  %v306_v49 = vor.u32 1.1754944e-38, %v305_v29  ;;  %vm5393_vm12 = vmor %vm404_vm4, %vm405_vm7 }
  0xcb   :  { %v295_v63 = vmul.f32 %v4595_v16, %v5272_v51  ;;  %vm300_vm6 = vweird.f32 %v4595_v16  ;;  %4602 = vpow2.f32 %v3968_v14  ;;  %v402_v36 = vmul.f32 %v5278_v58, %v401_v40  ;;  %585 = vmatmul.bf16.vlgmr.msra.gmra.mxu1 %v521_v39 }
  0xcc   :  { %v5337_v30 = vpop.f32.mrf.mxu2  ;;  %vm5355_vm8 = vmor %vm299_vm5, %vm300_vm6  ;;  %v498_v33 = vmul.f32 %v397_v35, %v5186_v48  ;;  %vm5365_vm10 = vcmp.eq.f32.partialorder %v408_v18, 8.507059e+37  ;;  %vm419_vm11 = vweird.f32 %v5294_v6  ;;  %v292_v56 = vsel %vm5303_vm1, %v291_v13, %v287_v41 }
  0xcd   :  { %v4597_v31 = vpop.eup %4596  ;;  %v296_v32 = vsub.f32 1.0, %v295_v63  ;;  %v403_v57 = vadd.f32 %v5278_v58, %v402_v36  ;;  %v3976_v60 = vmul.f32 -1.442695, %v5337_v30  ;;  %v423_v3 = vand.u32 2147483647, %v5294_v6 }
  0xce   :  { %v5340_v7 = vpop.f32.mrf.mxu0  ;;  %v5342_v34 = vpop.eup %4598  ;;  %v5347_v38 = vadd.f32 1.0, %v4597_v31  ;;  %v425_v37 = vand.u32 2147483648, %v5294_v6  ;;  %v491_v9 = vmul.f32 %v292_v56, %v5191_v52  ;;  %vm314_vm13 = vweird.f32 %v5315_v19 }
  0xcf   :  { %v297_v44 = vmul.f32 %v4595_v16, %v296_v32  ;;  %v415_v45 = vmul.f32 %v5342_v34, %v5294_v6  ;;  %v3969_v62 = vmul.f32 -1.442695, %v5340_v7  ;;  %v407_v12 = vsel %vm5393_vm12, %v5278_v58, %v403_v57 }
  0xd0   :  { %4604 = vrcp.f32 %v5347_v38  ;;  %v5370_v55 = vpop.eup %4600  ;;  %vm420_vm14 = vweird.f32 %v5342_v34  ;;  %vm5414_vm0 = vcmp.eq.f32.partialorder %v423_v3, 8.507059e+37  ;;  %v514_v18 = vmul.f32 1.6666666, %v498_v33 }
  0xd1   :  { %v298_v51 = vadd.f32 %v4595_v16, %v297_v44  ;;  %v416_v54 = vsub.f32 1.0, %v415_v45  ;;  %v4603_v48 = vpop.eup %4602  ;;  %v310_v4 = vmul.f32 %v5370_v55, %v5315_v19  ;;  %4606 = vpow2.f32 %v3976_v60  ;;  %vm5422_vm1 = vmor %vm419_vm11, %vm420_vm14 }
  0xd2   :  { %v5386_v8 = vadd.f32 1.0, %v4603_v48  ;;  %4608 = vpow2.f32 %v3969_v62  ;;  %vm315_vm15 = vweird.f32 %v5370_v55  ;;  %v507_v20 = vmul.f32 1.6666666, %v491_v9 }
  0xd3   :  { %v302_v1 = vsel %vm5355_vm8, %v4595_v16, %v298_v51  ;;  %v417_v2 = vmul.f32 %v5342_v34, %v416_v54  ;;  %v311_v11 = vsub.f32 1.0, %v310_v4  ;;  %v320_v16 = vand.u32 2147483648, %v5315_v19  ;;  %vm5433_vm2 = vmor %vm314_vm13, %vm315_vm15 }
  0xd4   :  { %v307_v5 = vsel %vm5359_vm9, %v306_v49, %v302_v1  ;;  %4610 = vrcp.f32 %v5386_v8  ;;  %v5406_v25 = vpop.f32.mrf.mxu2  ;;  %v318_v24 = vand.u32 2147483647, %v5315_v19  ;;  %v412_v21 = vsel %vm5365_vm10, %v411_v42, %v407_v12 }
  0xd5   :  { %v492_v52 = vmul.f32 %v307_v5, %v5205_v0  ;;  %v418_v13 = vadd.f32 %v5342_v34, %v417_v2  ;;  %v312_v14 = vmul.f32 %v5370_v55, %v311_v11  ;;  %v426_v0 = vor.u32 1.1754944e-38, %v425_v37 }
  0xd6   :  { %v5398_v43 = vpop.eup %4604  ;;  %v5412_v17 = vpop.f32.mrf.mxu0  ;;  %v3977_v63 = vmul.f32 -1.442695, %v5406_v25  ;;  %v525_v6 = vpack.c.bf16 %v514_v18, %v5323_v27  ;;  %v321_v39 = vor.u32 1.1754944e-38, %v320_v16  ;;  %v499_v27 = vmul.f32 %v412_v21, %v5198_v59 }
  0xd7   :  { %v430_v40 = vmul.f32 %v5398_v43, %v5347_v38  ;;  %v313_v23 = vadd.f32 %v5370_v55, %v312_v14  ;;  %v4607_v28 = vpop.eup %4606  ;;  %v3970_v31 = vmul.f32 -1.442695, %v5412_v17  ;;  %v508_v32 = vmul.f32 1.6666666, %v492_v52 }
  0xd8   :  { %v4609_v35 = vpop.eup %4608  ;;  %v422_v36 = vsel %vm5422_vm1, %v5342_v34, %v418_v13  ;;  %v5442_v41 = vadd.f32 1.0, %v4607_v28  ;;  %4612 = vpow2.f32 %v3977_v63  ;;  %605 = vmatmul.bf16.vlgmr.msra.gmra.mxu3 %v525_v6  ;;  %vm319_vm3 = vcmp.eq.f32.partialorder %v318_v24, 8.507059e+37 }
  0xd9   :  { %v431_v19 = vsub.f32 1.0, %v430_v40  ;;  %v5444_v44 = vadd.f32 1.0, %v4609_v35  ;;  %4614 = vpow2.f32 %v3970_v31  ;;  %v522_v45 = vpack.c.bf16 %v508_v32, %v507_v20 }
  0xda   :  { %v4611_v42 = vpop.eup %4610  ;;  %v317_v46 = vsel %vm5433_vm2, %v5370_v55, %v313_v23  ;;  %v427_v47 = vsel %vm5414_vm0, %v426_v0, %v422_v36  ;;  %vm329_vm4 = vweird.f32 %v5386_v8  ;;  %v335_v49 = vand.u32 2147483648, %v5386_v8 }
  0xdb   :  { %v325_v34 = vmul.f32 %v4611_v42, %v5386_v8  ;;  %4616 = vrcp.f32 %v5442_v41  ;;  %vm330_vm5 = vweird.f32 %v4611_v42  ;;  %v333_v59 = vand.u32 2147483647, %v5386_v8  ;;  %590 = vmatmul.bf16.gmra.mxu1 %v522_v45 }
  0xdc   :  { %4618 = vrcp.f32 %v5444_v44  ;;  %v322_v50 = vsel %vm319_vm3, %v321_v39, %v317_v46  ;;  %v432_v51 = vmul.f32 %v5398_v43, %v431_v19  ;;  %v500_v55 = vmul.f32 %v427_v47, %v5218_v15  ;;  %v5462_v60 = vpop.f32.mrf.mxu2  ;;  %vm5468_vm7 = vmor %vm329_vm4, %vm330_vm5  ;;  %v1173_v19 = vld [vmem:[%s7192_s0] sm:$0xff]  ;;  %v1183_v39 = vld [vmem:[%s7192_s0 + $0x50] sm:$0xff] }
  0xdd   :  { %v326_v33 = vsub.f32 1.0, %v325_v34  ;;  %vm434_vm6 = vweird.f32 %v5347_v38  ;;  %v438_v56 = vand.u32 2147483647, %v5347_v38  ;;  %v515_v48 = vmul.f32 1.6666666, %v499_v27 }
  0xde   :  { %v4613_v54 = vpop.eup %4612  ;;  %v440_v1 = vand.u32 2147483648, %v5347_v38  ;;  %v336_v3 = vor.u32 1.1754944e-38, %v335_v49  ;;  %v493_v4 = vmul.f32 %v322_v50, %v5234_v26  ;;  %vm435_vm8 = vweird.f32 %v5398_v43 }
  0xdf   :  { %v327_v57 = vmul.f32 %v4611_v42, %v326_v33  ;;  %v4615_v62 = vpop.eup %4614  ;;  %v5472_v15 = vadd.f32 1.0, %v4613_v54  ;;  %vm334_vm9 = vcmp.eq.f32.partialorder %v333_v59, 8.507059e+37  ;;  %v433_v9 = vadd.f32 %v5398_v43, %v432_v51  ;;  %vm5500_vm14 = vmor %vm434_vm6, %vm435_vm8 }
  0xe0   :  { %vm449_vm10 = vweird.f32 %v5442_v41  ;;  %v3978_v8 = vmul.f32 -1.442695, %v5462_v60  ;;  %v5485_v12 = vadd.f32 1.0, %v4615_v62  ;;  %v516_v52 = vmul.f32 1.6666666, %v500_v55 }
  0xe1   :  { %v328_v5 = vadd.f32 %v4611_v42, %v327_v57  ;;  %v4617_v37 = vpop.eup %4616  ;;  %4620 = vrcp.f32 %v5472_v15  ;;  %v453_v14 = vand.u32 2147483647, %v5442_v41  ;;  %v455_v16 = vand.u32 2147483648, %v5442_v41 }
  0xe2   :  { %v5480_v10 = vpop.eup %4618  ;;  %v445_v26 = vmul.f32 %v4617_v37, %v5442_v41  ;;  %vm344_vm11 = vweird.f32 %v5444_v44  ;;  %4622 = vrcp.f32 %v5485_v12  ;;  %vm450_vm12 = vweird.f32 %v4617_v37 }
  0xe3   :  { %v332_v11 = vsel %vm5468_vm7, %v4611_v42, %v328_v5  ;;  %v340_v58 = vmul.f32 %v5480_v10, %v5444_v44  ;;  %vm345_vm13 = vweird.f32 %v5480_v10  ;;  %v348_v20 = vand.u32 2147483647, %v5444_v44  ;;  %vm5514_vm0 = vmor %vm449_vm10, %vm450_vm12  ;;  %v1175_v42 = vld [vmem:[%s7192_s0 + $0x10] sm:$0xff]  ;;  %v1174_v5 = vld [vmem:[%s7192_s0 + $0x8] sm:$0xff] }
  0xe4   :  { %v337_v13 = vsel %vm334_vm9, %v336_v3, %v332_v11  ;;  %v446_v40 = vsub.f32 1.0, %v445_v26  ;;  %4624 = vpow2.f32 %v3978_v8  ;;  %v526_v23 = vpack.c.bf16 %v516_v52, %v515_v48  ;;  %vm5525_vm1 = vmor %vm344_vm11, %vm345_vm13  ;;  %v1178_v8 = vld [vmem:[%s7192_s0 + $0x28] sm:$0xff] }
  0xe5   :  { %v494_v0 = vmul.f32 %v337_v13, %v5283_v61  ;;  %v341_v18 = vsub.f32 1.0, %v340_v58  ;;  %v509_v28 = vmul.f32 1.6666666, %v493_v4  ;;  %v437_v21 = vsel %vm5500_vm14, %v5398_v43, %v433_v9 }
  0xe6   :  { %v447_v61 = vmul.f32 %v4617_v37, %v446_v40  ;;  %v350_v6 = vand.u32 2147483648, %v5444_v44  ;;  %vm439_vm15 = vcmp.eq.f32.partialorder %v438_v56, 8.507059e+37  ;;  %v441_v38 = vor.u32 1.1754944e-38, %v440_v1  ;;  %v1177_v56 = vld [vmem:[%s7192_s0 + $0x20] sm:$0xff]  ;;  %v1380_v44 = vld [vmem:[%s7193_s1 + $0x70] sm:$0xff] }
  0xe7   :  { %v510_v24 = vmul.f32 1.6666666, %v494_v0  ;;  %v5504_v63 = vpop.eup %4620  ;;  %v342_v29 = vmul.f32 %v5480_v10, %v341_v18  ;;  %v456_v36 = vor.u32 1.1754944e-38, %v455_v16  ;;  %vm454_vm2 = vcmp.eq.f32.partialorder %v453_v14, 8.507059e+37 }
  0xe8   :  { %v448_v31 = vadd.f32 %v4617_v37, %v447_v61  ;;  %v460_v35 = vmul.f32 %v5504_v63, %v5472_v15  ;;  %610 = vmatmul.bf16.gmra.mxu3 %v526_v23  ;;  %v4623_v45 = vpop.eup %4622  ;;  %v442_v27 = vsel %vm439_vm15, %v441_v38, %v437_v21  ;;  %vm5537_vm3 = vcmp.eq.f32.partialorder %v348_v20, 8.507059e+37  ;;  %v1179_v61 = vld [vmem:[%s7192_s0 + $0x30] sm:$0xff] }
  0xe9   :  { %v343_v43 = vadd.f32 %v5480_v10, %v342_v29  ;;  %v523_v41 = vpack.c.bf16 %v510_v24, %v509_v28  ;;  %v5028_v34 = vmov 0   ;;  %v351_v49 = vor.u32 1.1754944e-38, %v350_v6  ;;  %v1181_v6 = vld [vmem:[%s7192_s0 + $0x40] sm:$0xff] }
  0xea   :  { %v452_v46 = vsel %vm5514_vm0, %v4617_v37, %v448_v31  ;;  %4562 = vset.pattern.permute.xlu1 %v5028_v34  ;;  %4561 = vset.pattern.permute.xlu0 %v5028_v34  ;;  %v355_v33 = vmul.f32 %v4623_v45, %v5485_v12  ;;  %vm359_vm4 = vweird.f32 %v5485_v12  ;;  %v4625_v59 = vpop.eup %4624  ;;  %v461_v51 = vsub.f32 1.0, %v460_v35 }
  0xeb   :  { %v457_v47 = vsel %vm454_vm2, %v456_v36, %v452_v46  ;;  %1196 = vperm.xlu1 %4562, %v1175_v42   ;;  %1190 = vperm.xlu0 %4561, %v1173_v19   ;;  %v347_v50 = vsel %vm5525_vm1, %v5480_v10, %v343_v43  ;;  %v363_v54 = vand.u32 2147483647, %v5485_v12  ;;  %v365_v55 = vand.u32 2147483648, %v5485_v12  ;;  %v1184_v19 = vld [vmem:[%s7192_s0 + $0x58] sm:$0xff]  ;;  %v1187_v46 = vld [vmem:[%s7192_s0 + $0x70] sm:$0xff] }
  0xec   :  { %4563 = vset.pattern.permute.xlu2 %v5028_v34  ;;  %v502_v57 = vmul.f32 %v457_v47, %v5337_v30  ;;  %v356_v62 = vsub.f32 1.0, %v355_v33  ;;  %vm360_vm5 = vweird.f32 %v4623_v45  ;;  %v248_v48 = vadd.f32 1.0, %v4625_v59  ;;  %595 = vmatmul.bf16.gmra.mxu1 %v523_v41  ;;  %v1176_v30 = vld [vmem:[%s7192_s0 + $0x18] sm:$0xff]  ;;  %v1182_v41 = vld [vmem:[%s7192_s0 + $0x48] sm:$0xff]  ;;  %v1374_v33 = vld [vmem:[%s7193_s1 + $0x40] sm:$0xff] }
  0xed   :  { %1202 = vperm.xlu2 %4563, %v1177_v56   ;;  %v501_v1 = vmul.f32 %v442_v27, %v5274_v53  ;;  %v352_v3 = vsel %vm5537_vm3, %v351_v49, %v347_v50  ;;  %vm361_vm6 = vmor %vm359_vm4, %vm360_vm5  ;;  %v366_v4 = vor.u32 1.1754944e-38, %v365_v55  ;;  %v462_v37 = vmul.f32 %v5504_v63, %v461_v51  ;;  %v1185_v27 = vld [vmem:[%s7192_s0 + $0x60] sm:$0xff]  ;;  %v1188_v34 = vld [vmem:[%s7192_s0 + $0x78] sm:$0xff] }
  0xee   :  { %v357_v2 = vmul.f32 %v4623_v45, %v356_v62  ;;  %4626 = vrcp.f32 %v248_v48  ;;  %vm364_vm7 = vcmp.eq.f32.partialorder %v363_v54, 8.507059e+37  ;;  %v518_v9 = vmul.f32 1.6666666, %v502_v57  ;;  %v1379_v47 = vld [vmem:[%s7193_s1 + $0x68] sm:$0xff]  ;;  %v1378_v49 = vld [vmem:[%s7193_s1 + $0x60] sm:$0xff]  ;;  %v1377_v59 = vld [vmem:[%s7193_s1 + $0x58] sm:$0xff] }
  0xef   :  { %v517_v10 = vmul.f32 1.6666666, %v501_v1  ;;  %v495_v11 = vmul.f32 %v352_v3, %v5340_v7  ;;  %v463_v13 = vadd.f32 %v5504_v63, %v462_v37  ;;  %vm465_vm8 = vweird.f32 %v5504_v63  ;;  %v1373_v50 = vld [vmem:[%s7193_s1 + $0x38] sm:$0xff]  ;;  %v1372_v51 = vld [vmem:[%s7193_s1 + $0x30] sm:$0xff]  ;;  %v1371_v56 = vld [vmem:[%s7193_s1 + $0x28] sm:$0xff] }
  0xf0   :  { %v358_v53 = vadd.f32 %v4623_v45, %v357_v2  ;;  %v470_v58 = vand.u32 2147483648, %v5472_v15  ;;  %vm464_vm9 = vweird.f32 %v5472_v15  ;;  %v468_v7 = vand.u32 2147483647, %v5472_v15  ;;  %v1381_v54 = vld [vmem:[%s7193_s1 + $0x78] sm:$0xff]  ;;  %v1368_v55 = vld [vmem:[%s7193_s1 + $0x10] sm:$0xff]  ;;  %v1367_v62 = vld [vmem:[%s7193_s1 + $0x8] sm:$0xff] }
  0xf1   :  { %v527_v16 = vpack.c.bf16 %v518_v9, %v517_v10  ;;  %v511_v40 = vmul.f32 1.6666666, %v495_v11  ;;  %vm5574_vm10 = vmor %vm464_vm9, %vm465_vm8  ;;  %v485_v24 = vand.u32 2147483648, %v248_v48  ;;  %v483_v29 = vand.u32 2147483647, %v248_v48  ;;  %v1376_v57 = vld [vmem:[%s7193_s1 + $0x50] sm:$0xff] }
  0xf2   :  { %v362_v26 = vsel %vm361_vm6, %v4623_v45, %v358_v53  ;;  %v467_v23 = vsel %vm5574_vm10, %v5504_v63, %v463_v13  ;;  %v471_v28 = vor.u32 1.1754944e-38, %v470_v58  ;;  %vm469_vm12 = vcmp.eq.f32.partialorder %v468_v7, 8.507059e+37  ;;  %v1375_v1 = vld [vmem:[%s7193_s1 + $0x48] sm:$0xff]  ;;  %v1370_v3 = vld [vmem:[%s7193_s1 + $0x20] sm:$0xff] }
  0xf3   :  { %1199 = vperm.xlu1 %4562, %v1176_v30   ;;  %1193 = vperm.xlu0 %4561, %v1174_v5   ;;  %v367_v12 = vsel %vm364_vm7, %v366_v4, %v362_v26  ;;  %vm479_vm13 = vweird.f32 %v248_v48  ;;  %v486_v32 = vor.u32 1.1754944e-38, %v485_v24  ;;  %vm484_vm15 = vcmp.eq.f32.partialorder %v483_v29, 8.507059e+37  ;;  %v1369_v30 = vld [vmem:[%s7193_s1 + $0x18] sm:$0xff] }
  0xf4   :  { %v4627_v52 = vpop.eup %4626  ;;  %v496_v14 = vmul.f32 %v367_v12, %v5412_v17  ;;  %v1180_v17 = vld [vmem:[%s7192_s0 + $0x38] sm:$0xff]  ;;  %v472_v38 = vsel %vm469_vm12, %v471_v28, %v467_v23 }
  0xf5   :  { %1205 = vperm.xlu2 %4563, %v1178_v8   ;;  %v475_v0 = vmul.f32 %v4627_v52, %v248_v48  ;;  %vm480_vm11 = vweird.f32 %v4627_v52  ;;  %v503_v35 = vmul.f32 %v472_v38, %v5406_v25  ;;  %v1366_v48 = vld [vmem:[%s7193_s1] sm:$0xff] }
  0xf6   :  { %v512_v18 = vmul.f32 1.6666666, %v496_v14  ;;  %vm481_vm14 = vmor %vm479_vm13, %vm480_vm11 }
  0xf7   :  { %v476_v22 = vsub.f32 1.0, %v475_v0  ;;  %v519_v45 = vmul.f32 1.6666666, %v503_v35 }
  0xf8   :  { %615 = vmatmul.bf16.gmra.mxu3 %v527_v16  ;;  %v524_v15 = vpack.c.bf16 %v512_v18, %v511_v40 }
  0xf9   :  { %v477_v21 = vmul.f32 %v4627_v52, %v476_v22 }
  0xfb   :  { %1211 = vperm.xlu1 %4562, %v1180_v17   ;;  %1208 = vperm.xlu0 %4561, %v1179_v61   ;;  %v478_v31 = vadd.f32 %v4627_v52, %v477_v21 }
  0xfc   :  { %600 = vmatmul.bf16.gmra.mxu1 %v524_v15 }
  0xfd   :  { %1214 = vperm.xlu2 %4563, %v1181_v6   ;;  %v482_v63 = vsel %vm481_vm14, %v4627_v52, %v478_v31 }
  0xfe   :  { %v487_v36 = vsel %vm484_vm15, %v486_v32, %v482_v63 }
  0xff   :  { %v504_v43 = vmul.f32 %v487_v36, %v5462_v60  ;;  %v1186_v60 = vld [vmem:[%s7192_s0 + $0x68] sm:$0xff] }
 0x101   :  { %v520_v42 = vmul.f32 1.6666666, %v504_v43 }
 0x103   :  { %1220 = vperm.xlu1 %4562, %v1183_v39   ;;  %1217 = vperm.xlu0 %4561, %v1182_v41   ;;  %v528_v25 = vpack.c.bf16 %v520_v42, %v519_v45 }
 0x105   :  { %1223 = vperm.xlu2 %4563, %v1184_v19  }
 0x108   :  { %620 = vmatmul.bf16.gmra.mxu3 %v528_v25 }
 0x10b   :  { %1229 = vperm.xlu1 %4562, %v1186_v60   ;;  %1226 = vperm.xlu0 %4561, %v1185_v27  }
 0x10d   :  { %1232 = vperm.xlu2 %4563, %v1187_v46   ;;  %v1171_v46 = vlaneseq }
 0x113   :  { %1425 = vperm.xlu1 %4562, %v1380_v44   ;;  %1235 = vperm.xlu0 %4561, %v1188_v34  }
 0x115   :  { %1428 = vperm.xlu2 %4563, %v1381_v54  }
 0x11b   :  { %1422 = vperm.xlu1 %4562, %v1379_v47   ;;  %1419 = vperm.xlu0 %4561, %v1378_v49  }
 0x11d   :  { %1413 = vperm.xlu2 %4563, %v1376_v57  }
 0x123   :  { %1407 = vperm.xlu1 %4562, %v1374_v33   ;;  %1416 = vperm.xlu0 %4561, %v1377_v59  }
 0x125   :  { %1410 = vperm.xlu2 %4563, %v1375_v1  }
 0x12b   :  { %1404 = vperm.xlu1 %4562, %v1373_v50   ;;  %1401 = vperm.xlu0 %4561, %v1372_v51   ;;  %v5745_v50 = vand.u32 127, %v1171_v46 }
 0x12d   :  { %1395 = vperm.xlu2 %4563, %v1370_v3  }
 0x133   :  { %1389 = vperm.xlu1 %4562, %v1368_v55   ;;  %1398 = vperm.xlu0 %4561, %v1371_v56  }
 0x135   :  { %1392 = vperm.xlu2 %4563, %v1369_v30  }
 0x13b   :  { %1386 = vperm.xlu1 %4562, %v1367_v62   ;;  %1383 = vperm.xlu0 %4561, %v1366_v48  }
 0x147   :  { %v5683_v14 = vpop.permute.xlu2 %1202 }
 0x148   :  { %v5655_v2 = vpop.f32.mrf.mxu1  ;;  %vm1241_vm3 = vcmp.eq.s32.totalorder %v5683_v14, %v5745_v50 }
 0x149   :  { %7265 = vst [vmem:[#allocation2_spill] sm:$0xff] %v5655_v2  ;;  %v4011_v10 = vmul.f32 -1.442695, %v5655_v2 }
 0x14f   :  { %v5701_v28 = vpop.permute.xlu2 %1205 }
 0x150   :  { %v5660_v4 = vpop.f32.mrf.mxu1  ;;  %vm1242_vm14 = vcmp.eq.s32.totalorder %v5701_v28, %v5745_v50 }
 0x151   :  { %7266 = vst [vmem:[#allocation3_spill] sm:$0xff] %v5660_v4  ;;  %v4012_v53 = vmul.f32 -1.442695, %v5660_v4  ;;  %vm5869_vm15 = vmpackc.low %vm1242_vm14, %vm1241_vm3 }
 0x153   :  { %4628 = vpow2.f32 %v4012_v53 }
 0x154   :  { %4630 = vpow2.f32 %v4011_v10 }
 0x157   :  { %v5725_v42 = vpop.permute.xlu2 %1214 }
 0x158   :  { %v5667_v37 = vpop.f32.mrf.mxu1  ;;  %vm1245_vm14 = vcmp.eq.s32.totalorder %v5725_v42, %v5745_v50 }
 0x159   :  { %7267 = vst [vmem:[#allocation4_spill] sm:$0xff] %v5667_v37  ;;  %v4013_v12 = vmul.f32 -1.442695, %v5667_v37  ;;  %v4629_v16 = vpop.eup %4628 }
 0x15a   :  { %v5685_v58 = vadd.f32 1.0, %v4629_v16  ;;  %v4631_v7 = vpop.eup %4630 }
 0x15b   :  { %v5665_v5 = vpop.f32.mrf.mxu3  ;;  %4632 = vpow2.f32 %v4013_v12  ;;  %v5695_v17 = vadd.f32 1.0, %v4631_v7 }
 0x15c   :  { %v4019_v52 = vmul.f32 -1.442695, %v5665_v5  ;;  %7269 = vst [vmem:[#allocation6_spill] sm:$0xff] %v5685_v58  ;;  %vm710_vm1 = vweird.f32 %v5685_v58 }
 0x15d   :  { %v5675_v11 = vpop.permute.xlu1 %1196  ;;  %v5677_v26 = vpop.permute.xlu0 %1190 }
 0x15e   :  { %4634 = vpow2.f32 %v4019_v52  ;;  %vm1239_vm0 = vcmp.eq.s32.totalorder %v5675_v11, %v5745_v50  ;;  %vm1237_vm8 = vcmp.eq.s32.totalorder %v5677_v26, %v5745_v50  ;;  %v7288_v26 = vmov 0 }
 0x15f   :  { %4636 = vrcp.f32 %v5685_v58  ;;  %v5762_v3 = vpop.permute.xlu2 %1223  ;;  %v7289_v26 = vsel %vm5869_vm15, 4294967295, %v7288_v26 }
 0x160   :  { %v5672_v8 = vpop.f32.mrf.mxu1  ;;  %7290 = vst [vmem:[#allocation17_spill] sm:$0xff] %v7289_v26 }
 0x161   :  { %7268 = vst [vmem:[#allocation5_spill] sm:$0xff] %v5672_v8  ;;  %v4633_v23 = vpop.eup %4632  ;;  %v4014_v15 = vmul.f32 -1.442695, %v5672_v8 }
 0x162   :  { %v5704_v21 = vadd.f32 1.0, %v4633_v23 }
 0x163   :  { %v5670_v9 = vpop.f32.mrf.mxu3 }
 0x164   :  { %v4020_v18 = vmul.f32 -1.442695, %v5670_v9  ;;  %v4635_v24 = vpop.eup %4634 }
 0x165   :  { %v5689_v40 = vpop.permute.xlu1 %1199  ;;  %v5692_v20 = vpop.permute.xlu0 %1193  ;;  %v5706_v29 = vadd.f32 1.0, %v4635_v24 }
 0x166   :  { %4638 = vpow2.f32 %v4020_v18  ;;  %v5708_v6 = vpop.eup %4636  ;;  %vm1240_vm4 = vcmp.eq.s32.totalorder %v5689_v40, %v5745_v50  ;;  %v7279_v40 = vmov 0  ;;  %vm1238_vm11 = vcmp.eq.s32.totalorder %v5692_v20, %v5745_v50 }
 0x167   :  { %7271 = vst [vmem:[#allocation8_spill] sm:$0xff] %v5708_v6  ;;  %v706_v19 = vmul.f32 %v5708_v6, %v5685_v58  ;;  %vm711_vm2 = vweird.f32 %v5708_v6  ;;  %v821_v24 = vand.u32 2147483648, %v5706_v29  ;;  %vm815_vm5 = vweird.f32 %v5706_v29  ;;  %vm5808_vm6 = vmpackc.low %vm1240_vm4, %vm1239_vm0 }
 0x168   :  { %vm5818_vm7 = vmor %vm710_vm1, %vm711_vm2 }
 0x169   :  { %v5687_v0 = vpop.f32.mrf.mxu1  ;;  %v707_v34 = vsub.f32 1.0, %v706_v19  ;;  %v7280_v40 = vsel %vm5818_vm7, 4294967295, %v7279_v40  ;;  %vm5854_vm13 = vmpackc.low %vm1238_vm11, %vm1237_vm8 }
 0x16a   :  { %7270 = vst [vmem:[#allocation7_spill] sm:$0xff] %v5687_v0  ;;  %v4015_v38 = vmul.f32 -1.442695, %v5687_v0 }
 0x16b   :  { %v5681_v13 = vpop.f32.mrf.mxu3  ;;  %v708_v62 = vmul.f32 %v5708_v6, %v707_v34  ;;  %7281 = vst [vmem:[#allocation14_spill] sm:$0xff] %v7280_v40 }
 0x16c   :  { %v4021_v22 = vmul.f32 -1.442695, %v5681_v13  ;;  %v4639_v63 = vpop.eup %4638 }
 0x16d   :  { %v5713_v32 = vpop.permute.xlu1 %1211  ;;  %v5715_v35 = vpop.permute.xlu0 %1208  ;;  %v5723_v41 = vadd.f32 1.0, %v4639_v63 }
 0x16e   :  { %4640 = vpow2.f32 %v4021_v22  ;;  %vm1244_vm0 = vcmp.eq.s32.totalorder %v5713_v32, %v5745_v50  ;;  %vm1243_vm1 = vcmp.eq.s32.totalorder %v5715_v35, %v5745_v50  ;;  %v7291_v32 = vmov 0 }
 0x16f   :  { %4642 = vrcp.f32 %v5695_v17  ;;  %vm830_vm10 = vweird.f32 %v5723_v41  ;;  %v836_v14 = vand.u32 2147483648, %v5723_v41  ;;  %vm5888_vm2 = vmpackc.low %vm1244_vm0, %vm1243_vm1 }
 0x170   :  { %4644 = vpow2.f32 %v4014_v15  ;;  %v5779_v15 = vadd.f32 %v5708_v6, %v708_v62  ;;  %v7276_v62 = vmov 0  ;;  %v7292_v32 = vsel %vm5888_vm2, 4294967295, %v7291_v32 }
 0x171   :  { %v5711_v31 = vpop.f32.mrf.mxu1  ;;  %4646 = vrcp.f32 %v5704_v21  ;;  %v7277_v62 = vsel %vm5808_vm6, 4294967295, %v7276_v62  ;;  %7293 = vst [vmem:[#allocation18_spill] sm:$0xff] %v7292_v32 }
 0x172   :  { %7272 = vst [vmem:[#allocation9_spill] sm:$0xff] %v5711_v31  ;;  %4648 = vrcp.f32 %v5706_v29 }
 0x173   :  { %v5698_v61 = vpop.f32.mrf.mxu3  ;;  %4650 = vpow2.f32 %v4015_v38  ;;  %7273 = vst [vmem:[#allocation10_spill] sm:$0xff] %v5779_v15 }
 0x174   :  { %v4641_v36 = vpop.eup %4640  ;;  %4652 = vrcp.f32 %v5723_v41  ;;  %v4022_v12 = vmul.f32 -1.442695, %v5698_v61  ;;  %7278 = vst [vmem:[#allocation13_spill] sm:$0xff] %v7277_v62 }
 0x175   :  { %v5721_v39 = vpop.eup %4642  ;;  %v5729_v45 = vadd.f32 1.0, %v4641_v36  ;;  %v5741_v49 = vpop.permute.xlu1 %1220 }
 0x176   :  { %v4645_v25 = vpop.eup %4644  ;;  %v691_v60 = vmul.f32 %v5721_v39, %v5695_v17  ;;  %v5743_v33 = vpop.permute.xlu0 %1217 }
 0x177   :  { %v5733_v27 = vpop.eup %4646  ;;  %v5738_v47 = vadd.f32 1.0, %v4645_v25  ;;  %4654 = vrcp.f32 %v5729_v45  ;;  %vm845_vm11 = vweird.f32 %v5729_v45 }
 0x178   :  { %v5736_v44 = vpop.eup %4648  ;;  %v692_v54 = vsub.f32 1.0, %v691_v60  ;;  %v721_v55 = vmul.f32 %v5733_v27, %v5704_v21  ;;  %v4016_v60 = vmul.f32 -1.442695, %v5711_v31 }
 0x179   :  { %v4651_v59 = vpop.eup %4650  ;;  %v5747_v51 = vpop.f32.mrf.mxu1  ;;  %v811_v48 = vmul.f32 %v5736_v44, %v5706_v29  ;;  %4656 = vrcp.f32 %v5738_v47  ;;  %vm816_vm9 = vweird.f32 %v5736_v44  ;;  %vm740_vm4 = vweird.f32 %v5738_v47 }
 0x17a   :  { %v5760_v1 = vadd.f32 1.0, %v4651_v59  ;;  %v5764_v30 = vpop.eup %4652  ;;  %v693_v16 = vmul.f32 %v5721_v39, %v692_v54  ;;  %v722_v18 = vsub.f32 1.0, %v721_v55  ;;  %v819_v54 = vand.u32 2147483647, %v5706_v29  ;;  %vm5896_vm3 = vmor %vm815_vm5, %vm816_vm9 }
 0x17b   :  { %v5718_v43 = vpop.f32.mrf.mxu3  ;;  %v812_v38 = vsub.f32 1.0, %v811_v48  ;;  %v826_v63 = vmul.f32 %v5764_v30, %v5723_v41  ;;  %v4017_v26 = vmul.f32 -1.442695, %v5747_v51  ;;  %vm831_vm8 = vweird.f32 %v5764_v30 }
 0x17c   :  { %v4023_v57 = vmul.f32 -1.442695, %v5718_v43  ;;  %v5796_v34 = vadd.f32 %v5721_v39, %v693_v16  ;;  %v723_v59 = vmul.f32 %v5733_v27, %v722_v18  ;;  %v5823_v16 = vor.u32 1.1754944e-38, %v821_v24  ;;  %vm5921_vm9 = vmor %vm830_vm10, %vm831_vm8 }
 0x17d   :  { %v5770_v52 = vpop.eup %4654  ;;  %v5784_v36 = vpop.permute.xlu1 %1229  ;;  %v827_v18 = vsub.f32 1.0, %v826_v63  ;;  %vm5846_vm12 = vcmp.eq.f32.partialorder %v819_v54, 8.507059e+37  ;;  %vm1246_vm8 = vcmp.eq.s32.totalorder %v5743_v33, %v5745_v50  ;;  %v7304_v33 = vmov 0 }
 0x17e   :  { %4658 = vpow2.f32 %v4023_v57  ;;  %v5786_v19 = vpop.permute.xlu0 %1226  ;;  %v841_v25 = vmul.f32 %v5770_v52, %v5729_v45  ;;  %7275 = vst [vmem:[#allocation12_spill] sm:$0xff] %v5796_v34  ;;  %v5841_v63 = vadd.f32 %v5733_v27, %v723_v59  ;;  %vm846_vm5 = vweird.f32 %v5770_v52 }
 0x17f   :  { %4660 = vrcp.f32 %v5760_v1  ;;  %v5793_v46 = vpop.eup %4656  ;;  %v828_v7 = vmul.f32 %v5764_v30, %v827_v18  ;;  %vm5941_vm10 = vmor %vm845_vm11, %vm846_vm5  ;;  %vm1248_vm5 = vcmp.eq.s32.totalorder %v5762_v3, %v5745_v50  ;;  %vm1250_vm11 = vcmp.eq.s32.totalorder %v5784_v36, %v5745_v50 }
 0x180   :  { %4662 = vpow2.f32 %v4022_v12  ;;  %7274 = vst [vmem:[#allocation11_spill] sm:$0xff] %v5793_v46  ;;  %v813_v12 = vmul.f32 %v5736_v44, %v812_v38  ;;  %v736_v57 = vmul.f32 %v5793_v46, %v5738_v47  ;;  %v842_v38 = vsub.f32 1.0, %v841_v25 }
 0x181   :  { %v5812_v48 = vpop.f32.mrf.mxu1  ;;  %7282 = vst [vmem:[#allocation15_spill] sm:$0xff] %v5841_v63  ;;  %v834_v25 = vand.u32 2147483647, %v5723_v41  ;;  %v829_v32 = vadd.f32 %v5764_v30, %v828_v7 }
 0x182   :  { %v4018_v59 = vmul.f32 -1.442695, %v5812_v48  ;;  %v814_v23 = vadd.f32 %v5736_v44, %v813_v12  ;;  %v737_v2 = vsub.f32 1.0, %v736_v57  ;;  %v843_v12 = vmul.f32 %v5770_v52, %v842_v38 }
 0x183   :  { %v5751_v56 = vpop.f32.mrf.mxu3  ;;  %vm835_vm0 = vcmp.eq.f32.partialorder %v834_v25, 8.507059e+37  ;;  %v7301_v25 = vmov 0 }
 0x184   :  { %v4024_v22 = vmul.f32 -1.442695, %v5751_v56  ;;  %v4659_v10 = vpop.eup %4658  ;;  %v738_v4 = vmul.f32 %v5793_v46, %v737_v2  ;;  %v844_v37 = vadd.f32 %v5770_v52, %v843_v12  ;;  %v849_v2 = vand.u32 2147483647, %v5729_v45 }
 0x185   :  { %v5837_v24 = vpop.eup %4660  ;;  %v5864_v62 = vadd.f32 1.0, %v4659_v10  ;;  %v5875_v28 = vpop.permute.xlu1 %1425 }
 0x186   :  { %4664 = vpow2.f32 %v4024_v22  ;;  %v5829_v22 = vpop.permute.xlu2 %1232  ;;  %v4663_v55 = vpop.eup %4662  ;;  %v751_v10 = vmul.f32 %v5837_v24, %v5760_v1  ;;  %v5950_v53 = vadd.f32 %v5793_v46, %v738_v4  ;;  %v4458_v4 = vld [vmem:[%s7194_s4 + $0x38] sm:$0xff]  ;;  %vm850_vm1 = vcmp.eq.f32.partialorder %v849_v2, 8.507059e+37 }
 0x187   :  { %4666 = vpow2.f32 %v4016_v60  ;;  %v7285_v60 = vmov 0  ;;  %1122 = vmatpush.bf16.msrb.mxu2 %v4458_v4 }
 0x188   :  { %v7286_v60 = vsel %vm5854_vm13, 4294967295, %v7285_v60  ;;  %7300 = vst [vmem:[#allocation19_spill] sm:$0xff] %v5950_v53 }
 0x189   :  { %7287 = vst [vmem:[#allocation16_spill] sm:$0xff] %v7286_v60  ;;  %v5877_v60 = vpop.permute.xlu0 %1235 }
 0x18b   :  { %v5827_v11 = vpop.f32.mrf.mxu3 }
 0x18c   :  { %v4025_v20 = vmul.f32 -1.442695, %v5827_v11  ;;  %v4665_v54 = vpop.eup %4664 }
 0x18d   :  { %v5880_v18 = vadd.f32 1.0, %v4665_v54  ;;  %v4667_v57 = vpop.eup %4666  ;;  %v5902_v54 = vadd.f32 1.0, %v4663_v55  ;;  %v851_v55 = vand.u32 2147483648, %v5729_v45  ;;  %v5945_v38 = vpop.permute.xlu1 %1422 }
 0x18e   :  { %4668 = vpow2.f32 %v4025_v20  ;;  %v818_v20 = vsel %vm5896_vm3, %v5736_v44, %v814_v23  ;;  %v5910_v29 = vpop.permute.xlu2 %1428  ;;  %v5917_v44 = vadd.f32 1.0, %v4667_v57 }
 0x18f   :  { %4670 = vpow2.f32 %v4018_v59  ;;  %v752_v59 = vsub.f32 1.0, %v751_v10  ;;  %v823_v41 = vsel %vm5846_vm12, %v5823_v16, %v818_v20  ;;  %v837_v10 = vor.u32 1.1754944e-38, %v836_v14 }
 0x190   :  { %4672 = vrcp.f32 %v5864_v62  ;;  %vm741_vm12 = vweird.f32 %v5793_v46  ;;  %v5968_v57 = vmul.f32 %v823_v41, %v5665_v5  ;;  %v4457_v41 = vld [vmem:[%s7194_s4 + $0x30] sm:$0xff] }
 0x191   :  { %4674 = vrcp.f32 %v5880_v18  ;;  %v5947_v35 = vpop.permute.xlu0 %1419  ;;  %v753_v20 = vmul.f32 %v5837_v24, %v752_v59  ;;  %vm5975_vm3 = vmor %vm740_vm4, %vm741_vm12  ;;  %vm1247_vm4 = vcmp.eq.s32.totalorder %v5741_v49, %v5745_v50  ;;  %1123 = vmatpush.bf16.msrb.mxu2 %v4457_v41  ;;  %vm1251_vm12 = vcmp.eq.s32.totalorder %v5829_v22, %v5745_v50 }
 0x192   :  { %4676 = vpow2.f32 %v4017_v26  ;;  %v833_v26 = vsel %vm5921_vm9, %v5764_v30, %v829_v32  ;;  %v848_v30 = vsel %vm5941_vm10, %v5770_v52, %v844_v37  ;;  %v852_v32 = vor.u32 1.1754944e-38, %v851_v55  ;;  %vm6034_vm9 = vmpackc.low %vm1246_vm8, %vm1245_vm14 }
 0x193   :  { %4678 = vrcp.f32 %v5902_v54  ;;  %v5930_v23 = vpop.f32.mrf.mxu3  ;;  %v838_v37 = vsel %vm835_vm0, %v837_v10, %v833_v26  ;;  %v7302_v25 = vsel %vm5975_vm3, 4294967295, %v7301_v25  ;;  %v6002_v4 = vadd.f32 %v5837_v24, %v753_v20  ;;  %vm6060_vm14 = vmpackc.low %vm1248_vm5, %vm1247_vm4 }
 0x194   :  { %v4669_v12 = vpop.eup %4668  ;;  %4680 = vrcp.f32 %v5917_v44  ;;  %v4026_v52 = vmul.f32 -1.442695, %v5930_v23  ;;  %7303 = vst [vmem:[#allocation20_spill] sm:$0xff] %v7302_v25  ;;  %v853_v55 = vsel %vm850_vm1, %v852_v32, %v848_v30  ;;  %v866_v30 = vand.u32 2147483648, %v5902_v54 }
 0x195   :  { %v4671_v8 = vpop.eup %4670  ;;  %v5956_v16 = vadd.f32 1.0, %v4669_v12  ;;  %v5999_v32 = vmul.f32 %v838_v37, %v5670_v9  ;;  %v940_v10 = vmul.f32 %v853_v55, %v5681_v13  ;;  %v6021_v13 = vpop.permute.xlu1 %1407  ;;  %v4456_v37 = vld [vmem:[%s7194_s4 + $0x28] sm:$0xff]  ;;  %v7305_v33 = vsel %vm6034_vm9, 4294967295, %v7304_v33 }
 0x196   :  { %v5958_v14 = vpop.eup %4672  ;;  %v5981_v5 = vadd.f32 1.0, %v4671_v8  ;;  %v5983_v2 = vpop.permute.xlu2 %1413  ;;  %7306 = vst [vmem:[#allocation21_spill] sm:$0xff] %v7305_v33  ;;  %vm1249_vm10 = vcmp.eq.s32.totalorder %v5786_v19, %v5745_v50  ;;  %v7307_v19 = vmov 0  ;;  %vm1252_vm0 = vcmp.eq.s32.totalorder %v5877_v60, %v5745_v50  ;;  %1124 = vmatpush.bf16.msrb.mxu2 %v4456_v37 }
 0x197   :  { %v5965_v7 = vpop.eup %4674  ;;  %v871_v8 = vmul.f32 %v5958_v14, %v5864_v62  ;;  %4682 = vrcp.f32 %v5956_v16  ;;  %v7308_v19 = vsel %vm6060_vm14, 4294967295, %v7307_v19  ;;  %vm6073_vm8 = vmpackc.low %vm1250_vm11, %vm1249_vm10  ;;  %v7310_v49 = vmov 0 }
 0x198   :  { %v4677_v12 = vpop.eup %4676  ;;  %v886_v45 = vmul.f32 %v5965_v7, %v5880_v18  ;;  %4684 = vpow2.f32 %v4026_v52  ;;  %v6028_v52 = vor.u32 1.1754944e-38, %v866_v30  ;;  %7309 = vst [vmem:[#allocation22_spill] sm:$0xff] %v7308_v19  ;;  %v7311_v49 = vsel %vm6073_vm8, 4294967295, %v7310_v49  ;;  %vm6100_vm10 = vmpackc.low %vm1252_vm0, %vm1251_vm12 }
 0x199   :  { %v5988_v26 = vpop.eup %4678  ;;  %v6008_v15 = vadd.f32 1.0, %v4677_v12  ;;  %4686 = vrcp.f32 %v5981_v5  ;;  %v6023_v20 = vpop.permute.xlu0 %1416  ;;  %v872_v55 = vsub.f32 1.0, %v871_v8  ;;  %v6047_v8 = vmul.f32 1.6666666, %v940_v10  ;;  %7312 = vst [vmem:[#allocation23_spill] sm:$0xff] %v7311_v49 }
 0x19a   :  { %v6012_v6 = vpop.eup %4680  ;;  %v856_v9 = vmul.f32 %v5988_v26, %v5902_v54  ;;  %v887_v59 = vsub.f32 1.0, %v886_v45  ;;  %v879_v10 = vand.u32 2147483647, %v5864_v62  ;;  %v881_v33 = vand.u32 2147483648, %v5864_v62 }
 0x19b   :  { %v6051_v42 = vmul.f32 %v6012_v6, %v5917_v44  ;;  %4688 = vrcp.f32 %v6008_v15  ;;  %v873_v19 = vmul.f32 %v5958_v14, %v872_v55  ;;  %v7313_v55 = vmov 0 }
 0x19c   :  { %v857_v45 = vsub.f32 1.0, %v856_v9  ;;  %v4455_v9 = vld [vmem:[%s7194_s4 + $0x20] sm:$0xff]  ;;  %v888_v37 = vmul.f32 %v5965_v7, %v887_v59  ;;  %v7314_v55 = vsel %vm6100_vm10, 4294967295, %v7313_v55  ;;  %vm1443_vm11 = vcmp.eq.s32.totalorder %v5945_v38, %v5745_v50 }
 0x19d   :  { %v6045_v30 = vpop.eup %4682  ;;  %7315 = vst [vmem:[#allocation24_spill] sm:$0xff] %v7314_v55  ;;  %v767_v34 = vsub.f32 1.0, %v6051_v42  ;;  %vm1442_vm5 = vcmp.eq.s32.totalorder %v5947_v35, %v5745_v50  ;;  %vm6112_vm8 = vcmp.eq.f32.partialorder %v879_v10, 8.507059e+37  ;;  %vm7318_vm12 = vcmp.eq.s32.totalorder %v5875_v28, %v5745_v50  ;;  %1125 = vmatpush.bf16.msrb.mxu2 %v4455_v9  ;;  %v4454_v42 = vld [vmem:[%s7194_s4 + $0x18] sm:$0xff] }
 0x19e   :  { %v901_v41 = vmul.f32 %v6045_v30, %v5956_v16  ;;  %v6077_v3 = vpop.permute.xlu2 %1410  ;;  %v4685_v12 = vpop.eup %4684  ;;  %v858_v59 = vmul.f32 %v5988_v26, %v857_v45  ;;  %vm7319_vm0 = vcmp.eq.s32.totalorder %v5910_v29, %v5745_v50  ;;  %v874_v10 = vadd.f32 %v5958_v14, %v873_v19  ;;  %vm6149_vm4 = vmpackc.low %vm1443_vm11, %vm1442_vm5 }
 0x19f   :  { %v6088_v36 = vpop.eup %4686  ;;  %v6092_v40 = vadd.f32 1.0, %v4685_v12  ;;  %vm4543_vm1 = vmpackc.low %vm7319_vm0, %vm7318_vm12  ;;  %v6124_v12 = vpop.permute.xlu1 %1404  ;;  %v7215_v29 = vmov 1.0|1.0   ;;  %v889_v9 = vadd.f32 %v5965_v7, %v888_v37  ;;  %v911_v0 = vand.u32 2147483648, %v5956_v16 }
 0x1a0   :  { %v902_v49 = vsub.f32 1.0, %v901_v41  ;;  %v796_v28 = vmul.f32 %v6088_v36, %v5981_v5  ;;  %4544 = vmatpush.lsf.msk.bf16.msk.msrb.mxu0 %vm4543_vm1, %v7215_v29  ;;  %v7322_v29 = vand.u32 2147483647, %v5902_v54  ;;  %vm7325_vm0 = vweird.f32 %v5958_v14 }
 0x1a1   :  { %4690 = vrcp.f32 %v6092_v40  ;;  %v6126_v41 = vpop.permute.xlu0 %1401  ;;  %v6131_v45 = vpop.eup %4688  ;;  %vm7326_vm12 = vweird.f32 %v5864_v62  ;;  %vm905_vm14 = vweird.f32 %v5956_v16  ;;  %v909_v35 = vand.u32 2147483647, %v5956_v16  ;;  %1126 = vmatpush.bf16.msrb.mxu2 %v4454_v42  ;;  %v4453_v16 = vld [vmem:[%s7194_s4 + $0x10] sm:$0xff] }
 0x1a2   :  { %v903_v60 = vmul.f32 %v6045_v30, %v902_v49  ;;  %v896_v49 = vand.u32 2147483648, %v5880_v18  ;;  %vm6155_vm1 = vcmp.eq.f32.partialorder %v7322_v29, 8.507059e+37  ;;  %vm6163_vm10 = vmor %vm7326_vm12, %vm7325_vm0  ;;  %v859_v38 = vadd.f32 %v5988_v26, %v858_v59 }
 0x1a3   :  { %v781_v29 = vmul.f32 %v6131_v45, %v6008_v15  ;;  %vm890_vm12 = vweird.f32 %v5880_v18  ;;  %v894_v62 = vand.u32 2147483647, %v5880_v18  ;;  %vm7329_vm0 = vweird.f32 %v6045_v30 }
 0x1a4   :  { %v904_v55 = vadd.f32 %v6045_v30, %v903_v60  ;;  %vm6180_vm9 = vmor %vm905_vm14, %vm7329_vm0  ;;  %v768_v59 = vmul.f32 %v6012_v6, %v767_v34  ;;  %v882_v31 = vor.u32 1.1754944e-38, %v881_v33  ;;  %vm7332_vm11 = vweird.f32 %v5965_v7 }
 0x1a5   :  { %vm6190_vm5 = vmor %vm890_vm12, %vm7332_vm11  ;;  %v797_v18 = vsub.f32 1.0, %v796_v28  ;;  %v7335_v25 = vmov 1.0|1.0   ;;  %v878_v34 = vsel %vm6163_vm10, %v5958_v14, %v874_v10  ;;  %v897_v63 = vor.u32 1.1754944e-38, %v896_v49  ;;  %1127 = vmatpush.bf16.msrb.mxu2 %v4453_v16 }
 0x1a6   :  { %v908_v46 = vsel %vm6180_vm9, %v6045_v30, %v904_v55  ;;  %4546 = vmatpush.lsf.msk.bf16.msk.msrb.mxu0 %vm6149_vm4, %v7335_v25  ;;  %v893_v33 = vsel %vm6190_vm5, %v5965_v7, %v889_v9  ;;  %v912_v28 = vor.u32 1.1754944e-38, %v911_v0  ;;  %vm7336_vm14 = vcmp.eq.s32.totalorder %v5983_v2, %v5745_v50  ;;  %v6218_v30 = vpop.permute.xlu2 %1395  ;;  %v4452_v2 = vld [vmem:[%s7194_s4 + $0x8] sm:$0xff] }
 0x1a7   :  { %v6200_v42 = vpop.eup %4690  ;;  %vm7337_vm9 = vcmp.eq.s32.totalorder %v6023_v20, %v5745_v50  ;;  %vm7340_vm4 = vweird.f32 %v5988_v26  ;;  %vm7341_vm10 = vweird.f32 %v5902_v54  ;;  %vm910_vm5 = vcmp.eq.f32.partialorder %v909_v35, 8.507059e+37 }
 0x1a8   :  { %vm6214_vm11 = vmpackc.low %vm7337_vm9, %vm7336_vm14  ;;  %v916_v0 = vmul.f32 %v6200_v42, %v6092_v40  ;;  %vm1438_vm0 = vcmp.eq.s32.totalorder %v6021_v13, %v5745_v50  ;;  %vm1439_vm14 = vcmp.eq.s32.totalorder %v6077_v3, %v5745_v50  ;;  %v782_v7 = vsub.f32 1.0, %v781_v29 }
 0x1a9   :  { %vm6224_vm12 = vmor %vm7341_vm10, %vm7340_vm4  ;;  %vm895_vm9 = vcmp.eq.f32.partialorder %v894_v62, 8.507059e+37  ;;  %v913_v54 = vsel %vm910_vm5, %v912_v28, %v908_v46  ;;  %v883_v20 = vsel %vm6112_vm8, %v882_v31, %v878_v34  ;;  %v798_v10 = vmul.f32 %v6088_v36, %v797_v18  ;;  %v1399_v22 = vpop.permute.xlu0 %1398  ;;  %1128 = vmatpush.bf16.msrb.mxu2 %v4452_v2  ;;  %v4443_v62 = vld [vmem:[%s7195_s3] sm:$0xff] }
 0x1aa   :  { %v863_v14 = vsel %vm6224_vm12, %v5988_v26, %v859_v38  ;;  %v898_v55 = vsel %vm895_vm9, %v897_v63, %v893_v33  ;;  %v917_v49 = vsub.f32 1.0, %v916_v0  ;;  %4548 = vmatpush.lsf.msk.bf16.msk.msrb.mxu0 %vm6214_vm11, %v7335_v25  ;;  %v924_v46 = vand.u32 2147483647, %v6092_v40  ;;  %vm6255_vm8 = vmpackc.low %vm1439_vm14, %vm1438_vm0  ;;  %v6263_v63 = vpop.permute.xlu1 %1389 }
 0x1ab   :  { %v926_v26 = vand.u32 2147483648, %v6092_v40  ;;  %vm1437_vm10 = vcmp.eq.s32.totalorder %v6124_v12, %v5745_v50  ;;  %vm1436_vm11 = vcmp.eq.s32.totalorder %v6126_v41, %v5745_v50  ;;  %v944_v13 = vmul.f32 %v913_v54, %v5827_v11  ;;  %v4451_v11 = vld [vmem:[%s7194_s4] sm:$0xff] }
 0x1ac   :  { %v918_v3 = vmul.f32 %v6200_v42, %v917_v49  ;;  %vm921_vm0 = vweird.f32 %v6200_v42  ;;  %v868_v9 = vsel %vm6155_vm1, %v6028_v52, %v863_v14  ;;  %v6275_v19 = vadd.f32 %v6012_v6, %v768_v59  ;;  %vm6292_vm14 = vmpackc.low %vm1437_vm10, %vm1436_vm11 }
 0x1ad   :  { %v783_v60 = vmul.f32 %v6131_v45, %v782_v7  ;;  %v942_v35 = vmul.f32 %v883_v20, %v5718_v43  ;;  %v943_v38 = vmul.f32 %v898_v55, %v5751_v56  ;;  %vm920_vm1 = vweird.f32 %v6092_v40  ;;  %1129 = vmatpush.bf16.msrb.mxu2 %v4451_v11 }
 0x1ae   :  { %v919_v29 = vadd.f32 %v6200_v42, %v918_v3  ;;  %4550 = vmatpush.lsf.msk.bf16.msk.msrb.mxu0 %vm6255_vm8, %v7335_v25  ;;  %vm755_vm5 = vweird.f32 %v5760_v1  ;;  %v799_v43 = vadd.f32 %v6088_v36, %v798_v10  ;;  %vm801_vm9 = vweird.f32 %v6088_v36  ;;  %vm922_vm4 = vmor %vm920_vm1, %vm921_vm0  ;;  %v1393_v34 = vpop.permute.xlu2 %1392 }
 0x1af   :  { %vm925_vm12 = vcmp.eq.f32.partialorder %v924_v46, 8.507059e+37  ;;  %v927_v56 = vor.u32 1.1754944e-38, %v926_v26  ;;  %v7348_v40 = vand.u32 2147483647, %v5917_v44  ;;  %v960_v41 = vmul.f32 1.6666666, %v944_v13 }
 0x1b0   :  { %v923_v37 = vsel %vm922_vm4, %v6200_v42, %v919_v29  ;;  %vm1434_vm8 = vcmp.eq.s32.totalorder %v6218_v30, %v5745_v50  ;;  %vm1435_vm11 = vcmp.eq.s32.totalorder %v1399_v22, %v5745_v50  ;;  %v941_v16 = vmul.f32 %v868_v9, %v5698_v61  ;;  %1130 = vmatmul.bf16.vlgmr.msrb.gmra.mxu2 %v4443_v62  ;;  %v5015_v9 = vld [vmem:[%s7190_s2 + $0x60] sm:$0xff] }
 0x1b1   :  { %vm6306_vm10 = vcmp.eq.f32.partialorder %v7348_v40, 8.507059e+37  ;;  %vm800_vm1 = vweird.f32 %v5981_v5  ;;  %v806_v59 = vand.u32 2147483648, %v5981_v5  ;;  %v928_v18 = vsel %vm925_vm12, %v927_v56, %v923_v37  ;;  %v1384_v31 = vpop.permute.xlu0 %1383 }
 0x1b2   :  { %v784_v42 = vadd.f32 %v6131_v45, %v783_v60  ;;  %v959_v33 = vmul.f32 1.6666666, %v943_v38  ;;  %vm6324_vm4 = vmor %vm800_vm1, %vm801_vm9  ;;  %v804_v58 = vand.u32 2147483647, %v5981_v5  ;;  %v945_v61 = vmul.f32 %v928_v18, %v5930_v23  ;;  %4552 = vmatpush.lsf.msk.bf16.msk.msrb.mxu0 %vm6292_vm14, %v7335_v25  ;;  %v1387_v26 = vpop.permute.xlu1 %1386 }
 0x1b3   :  { %v958_v53 = vmul.f32 1.6666666, %v942_v35  ;;  %v789_v0 = vand.u32 2147483647, %v6008_v15  ;;  %v791_v14 = vand.u32 2147483648, %v6008_v15  ;;  %v803_v7 = vsel %vm6324_vm4, %v6088_v36, %v799_v43  ;;  %vm6344_vm9 = vmpackc.low %vm1435_vm11, %vm1434_vm8  ;;  %v5012_v36 = vld [vmem:[%s7190_s2 + $0x70] sm:$0xff] }
 0x1b4   :  { %vm7355_vm14 = vweird.f32 %v6012_v6  ;;  %vm7356_vm1 = vweird.f32 %v5917_v44  ;;  %v961_v54 = vmul.f32 1.6666666, %v945_v61  ;;  %v976_v30 = vadd.f32 %v5012_v36, %v960_v41  ;;  %v5016_v41 = vld [vmem:[%s7190_s2 + $0x58] sm:$0xff] }
 0x1b5   :  { %vm6352_vm12 = vmor %vm7356_vm1, %vm7355_vm14  ;;  %vm1432_vm8 = vcmp.eq.s32.totalorder %v6263_v63, %v5745_v50  ;;  %vm1433_vm11 = vcmp.eq.s32.totalorder %v1393_v34, %v5745_v50  ;;  %v957_v2 = vmul.f32 1.6666666, %v941_v16  ;;  %v7359_v55 = vand.u32 2147483648, %v5917_v44  ;;  %v7402_v16 = vld [vmem:[#allocation3_spill] sm:$0xff] }
 0x1b6   :  { %v773_v20 = vsel %vm6352_vm12, %v6012_v6, %v6275_v19  ;;  %vm7360_vm14 = vweird.f32 %v6131_v45  ;;  %vm7361_vm1 = vweird.f32 %v6008_v15  ;;  %v807_v46 = vor.u32 1.1754944e-38, %v806_v59  ;;  %v5013_v6 = vld [vmem:[%s7190_s2 + $0x78] sm:$0xff]  ;;  %v5014_v15 = vld [vmem:[%s7190_s2 + $0x68] sm:$0xff]  ;;  %4554 = vmatpush.lsf.msk.bf16.msk.msrb.mxu0 %vm6344_vm9, %v7335_v25 }
 0x1b7   :  { %v777_v10 = vor.u32 1.1754944e-38, %v7359_v55  ;;  %vm6373_vm0 = vmor %vm7361_vm1, %vm7360_vm14  ;;  %vm805_vm4 = vcmp.eq.f32.partialorder %v804_v58, 8.507059e+37  ;;  %v977_v44 = vadd.f32 %v5013_v6, %v961_v54  ;;  %v975_v13 = vadd.f32 %v5014_v15, %v959_v33  ;;  %v7379_v58 = vld [vmem:[#allocation11_spill] sm:$0xff]  ;;  %v5019_v6 = vld [vmem:[%s7190_s2 + $0x40] sm:$0xff] }
 0x1b8   :  { %v788_v22 = vsel %vm6373_vm0, %v6131_v45, %v784_v42  ;;  %vm790_vm14 = vcmp.eq.f32.partialorder %v789_v0, 8.507059e+37  ;;  %v792_v3 = vor.u32 1.1754944e-38, %v791_v14  ;;  %v808_v45 = vsel %vm805_vm4, %v807_v46, %v803_v7  ;;  %vm4555_vm0 = vmpackc.low %vm1433_vm11, %vm1432_vm8  ;;  %v7377_v42 = vld [vmem:[#allocation15_spill] sm:$0xff]  ;;  %v7382_v0 = vld [vmem:[#allocation9_spill] sm:$0xff] }
 0x1b9   :  { %v974_v19 = vadd.f32 %v5015_v9, %v958_v53  ;;  %vm7364_vm1 = vweird.f32 %v5837_v24  ;;  %v992_v11 = vmul.f32 0.70710677, %v976_v30  ;;  %v993_v35 = vmul.f32 0.70710677, %v977_v44  ;;  %v7392_v46 = vld [vmem:[#allocation7_spill] sm:$0xff]  ;;  %v7393_v15 = vld [vmem:[#allocation12_spill] sm:$0xff] }
 0x1ba   :  { %vm6402_vm9 = vmor %vm755_vm5, %vm7364_vm1  ;;  %vm1431_vm4 = vcmp.eq.s32.totalorder %v1387_v26, %v5745_v50  ;;  %vm1430_vm12 = vcmp.eq.s32.totalorder %v1384_v31, %v5745_v50  ;;  %v955_v38 = vmul.f32 1.6666666, %v5999_v32  ;;  %v778_v29 = vsel %vm6306_vm10, %v777_v10, %v773_v20  ;;  %4556 = vmatpush.lsf.msk.bf16.msk.msrb.mxu0 %vm4555_vm0, %v7335_v25  ;;  %v5017_v50 = vld [vmem:[%s7190_s2 + $0x50] sm:$0xff]  ;;  %v7396_v9 = vld [vmem:[#allocation10_spill] sm:$0xff] }
 0x1bb   :  { %v758_v63 = vsel %vm6402_vm9, %v5837_v24, %v6002_v4  ;;  %v793_v52 = vsel %vm790_vm14, %v792_v3, %v788_v22  ;;  %v937_v43 = vmul.f32 %v808_v45, %v5812_v48  ;;  %v1300_v56 = vpack.c.bf16 %v993_v35, %v992_v11  ;;  %vm6431_vm10 = vmpackc.low %vm1431_vm4, %vm1430_vm12  ;;  %v7395_v45 = vld [vmem:[#allocation8_spill] sm:$0xff]  ;;  %v7398_v35 = vld [vmem:[#allocation5_spill] sm:$0xff] }
 0x1bc   :  { %v991_v40 = vmul.f32 0.70710677, %v975_v13  ;;  %v973_v37 = vadd.f32 %v5016_v41, %v957_v2  ;;  %v954_v32 = vmul.f32 1.6666666, %v5968_v57  ;;  %v7367_v62 = vand.u32 2147483647, %v5738_v47 }
 0x1bd   :  { %v7368_v24 = vand.u32 2147483648, %v5738_v47  ;;  %v7369_v12 = vand.u32 2147483648, %v5760_v1  ;;  %vm7372_vm8 = vweird.f32 %v5733_v27  ;;  %vm7373_vm11 = vweird.f32 %v5704_v21  ;;  %1301 = vmatpush.bf16.msrb.mxu3 %v1300_v56  ;;  %v4465_v3 = vld [vmem:[%s7196_s7 + $0x30] sm:$0xff] }
 0x1be   :  { %vm745_vm5 = vcmp.eq.f32.partialorder %v7367_v62, 8.507059e+37  ;;  %vm6439_vm14 = vmor %vm7373_vm11, %vm7372_vm8  ;;  %v7376_v47 = vand.u32 2147483647, %v5760_v1  ;;  %v936_v59 = vmul.f32 %v793_v52, %v5747_v51  ;;  %v990_v18 = vmul.f32 0.70710677, %v974_v19  ;;  %v7380_v1 = vld [vmem:[#allocation19_spill] sm:$0xff]  ;;  %4558 = vmatpush.lsf.msk.bf16.msk.msrb.mxu0 %vm6431_vm10, %v7335_v25 }
 0x1bf   :  { %v747_v4 = vor.u32 1.1754944e-38, %v7368_v24  ;;  %v762_v48 = vor.u32 1.1754944e-38, %v7369_v12  ;;  %v972_v34 = vadd.f32 %v5017_v50, %v6047_v8  ;;  %v728_v33 = vsel %vm6439_vm14, %v5733_v27, %v7377_v42  ;;  %v5018_v8 = vld [vmem:[%s7190_s2 + $0x48] sm:$0xff]  ;;  %v7383_v27 = vld [vmem:[#allocation6_spill] sm:$0xff] }
 0x1c0   :  { %vm760_vm0 = vcmp.eq.f32.partialorder %v7376_v47, 8.507059e+37  ;;  %v7381_v61 = vsel %vm5975_vm3, %v7379_v58, %v7380_v1  ;;  %v935_v14 = vmul.f32 %v778_v29, %v7382_v0  ;;  %v953_v7 = vmul.f32 1.6666666, %v937_v43  ;;  %4526 = vllmr.16.mxu0  ;;  %v5020_v43 = vld [vmem:[%s7190_s2 + $0x38] sm:$0xff]  ;;  %v5023_v58 = vld [vmem:[%s7190_s2 + $0x20] sm:$0xff] }
 0x1c1   :  { %v748_v53 = vsel %vm745_vm5, %v747_v4, %v7381_v61  ;;  %v763_v51 = vsel %vm760_vm0, %v762_v48, %v758_v63  ;;  %v1299_v23 = vpack.c.bf16 %v991_v40, %v990_v18  ;;  %v989_v5 = vmul.f32 0.70710677, %v973_v37  ;;  %v7401_v37 = vld [vmem:[#allocation4_spill] sm:$0xff]  ;;  %v5024_v0 = vld [vmem:[%s7190_s2 + $0x18] sm:$0xff] }
 0x1c2   :  { %v971_v54 = vadd.f32 %v5018_v8, %v955_v38  ;;  %v7384_v36 = vand.u32 2147483647, %v7383_v27  ;;  %v7385_v30 = vand.u32 2147483648, %v7383_v27  ;;  %v7386_v20 = vand.u32 2147483647, %v5704_v21  ;;  %v5021_v4 = vld [vmem:[%s7190_s2 + $0x30] sm:$0xff] }
 0x1c3   :  { %v7387_v55 = vand.u32 2147483648, %v5704_v21  ;;  %vm7388_vm1 = vweird.f32 %v5721_v39  ;;  %vm7389_vm9 = vweird.f32 %v5695_v17  ;;  %v934_v26 = vmul.f32 %v763_v51, %v7392_v46  ;;  %1302 = vmatpush.bf16.msrb.mxu3 %v1299_v23  ;;  %v4444_v21 = vld [vmem:[%s7195_s3 + $0x8] sm:$0xff] }
 0x1c4   :  { %vm715_vm12 = vcmp.eq.f32.partialorder %v7384_v36, 8.507059e+37  ;;  %v717_v2 = vor.u32 1.1754944e-38, %v7385_v30  ;;  %vm730_vm3 = vcmp.eq.f32.partialorder %v7386_v20, 8.507059e+37  ;;  %vm6478_vm4 = vmor %vm7389_vm9, %vm7388_vm1  ;;  %v952_v31 = vmul.f32 1.6666666, %v936_v59  ;;  %1135 = vmatmul.bf16.gmra.mxu2 %v4444_v21  ;;  %v5026_v36 = vld [vmem:[%s7190_s2 + $0x8] sm:$0xff] }
 0x1c5   :  { %v732_v10 = vor.u32 1.1754944e-38, %v7387_v55  ;;  %v988_v22 = vmul.f32 0.70710677, %v972_v34  ;;  %v970_v44 = vadd.f32 %v5019_v6, %v954_v32  ;;  %v698_v13 = vsel %vm6478_vm4, %v5721_v39, %v7393_v15  ;;  %v7403_v34 = vld [vmem:[#allocation2_spill] sm:$0xff]  ;;  %v4446_v6 = vld [vmem:[%s7195_s3 + $0x18] sm:$0xff] }
 0x1c6   :  { %v7397_v19 = vsel %vm5818_vm7, %v7395_v45, %v7396_v9  ;;  %v933_v38 = vmul.f32 %v748_v53, %v7398_v35  ;;  %v951_v63 = vmul.f32 1.6666666, %v935_v14  ;;  %v987_v52 = vmul.f32 0.70710677, %v971_v54  ;;  %v5027_v20 = vld [vmem:[%s7190_s2] sm:$0xff]  ;;  %v4449_v45 = vld [vmem:[%s7195_s3 + $0x30] sm:$0xff] }
 0x1c7   :  { %v718_v60 = vsel %vm715_vm12, %v717_v2, %v7397_v19  ;;  %v733_v11 = vsel %vm730_vm3, %v732_v10, %v728_v33  ;;  %v1298_v29 = vpack.c.bf16 %v989_v5, %v988_v22  ;;  %v969_v56 = vadd.f32 %v5020_v43, %v953_v7  ;;  %v5025_v5 = vld [vmem:[%s7190_s2 + $0x10] sm:$0xff]  ;;  %v4447_v21 = vld [vmem:[%s7195_s3 + $0x20] sm:$0xff]  ;;  %v7408_v9 = vld [vmem:[#allocation21_spill] sm:$0xff] }
 0x1c8   :  { %v7399_v40 = vand.u32 2147483647, %v5695_v17  ;;  %v7400_v39 = vand.u32 2147483648, %v5695_v17  ;;  %v932_v32 = vmul.f32 %v733_v11, %v7401_v37  ;;  %v950_v62 = vmul.f32 1.6666666, %v934_v26  ;;  %v5022_v17 = vld [vmem:[%s7190_s2 + $0x28] sm:$0xff] }
 0x1c9   :  { %1303 = vmatpush.bf16.msrb.mxu3 %v1298_v29  ;;  %v986_v24 = vmul.f32 0.70710677, %v970_v44  ;;  %v968_v12 = vadd.f32 %v5021_v4, %v952_v31  ;;  %v931_v57 = vmul.f32 %v718_v60, %v7402_v16  ;;  %v949_v47 = vmul.f32 1.6666666, %v933_v38  ;;  %v4445_v10 = vld [vmem:[%s7195_s3 + $0x10] sm:$0xff]  ;;  %v4450_v19 = vld [vmem:[%s7195_s3 + $0x38] sm:$0xff] }
 0x1ca   :  { %vm700_vm5 = vcmp.eq.f32.partialorder %v7399_v40, 8.507059e+37  ;;  %v702_v41 = vor.u32 1.1754944e-38, %v7400_v39  ;;  %v985_v18 = vmul.f32 0.70710677, %v969_v56  ;;  %v967_v50 = vadd.f32 %v5022_v17, %v951_v63  ;;  %v7410_v60 = vld [vmem:[#allocation22_spill] sm:$0xff]  ;;  %v7412_v11 = vld [vmem:[#allocation23_spill] sm:$0xff] }
 0x1cb   :  { %v1297_v59 = vpack.c.bf16 %v987_v52, %v986_v24  ;;  %v948_v33 = vmul.f32 1.6666666, %v932_v32  ;;  %v984_v28 = vmul.f32 0.70710677, %v968_v12  ;;  %v966_v1 = vadd.f32 %v5023_v58, %v950_v62  ;;  %v7414_v63 = vld [vmem:[#allocation24_spill] sm:$0xff] }
 0x1cc   :  { %v703_v48 = vsel %vm700_vm5, %v702_v41, %v698_v13  ;;  %v947_v61 = vmul.f32 1.6666666, %v931_v57  ;;  %v983_v51 = vmul.f32 0.70710677, %v967_v50  ;;  %v965_v14 = vadd.f32 %v5024_v0, %v949_v47  ;;  %v4448_v13 = vld [vmem:[%s7195_s3 + $0x28] sm:$0xff] }
 0x1cd   :  { %v930_v42 = vmul.f32 %v703_v48, %v7403_v34  ;;  %1304 = vmatpush.bf16.msrb.mxu3 %v1297_v59  ;;  %v1296_v53 = vpack.c.bf16 %v985_v18, %v984_v28  ;;  %v982_v23 = vmul.f32 0.70710677, %v966_v1  ;;  %v964_v8 = vadd.f32 %v5025_v5, %v948_v33 }
 0x1ce   :  { %v981_v27 = vmul.f32 0.70710677, %v965_v14  ;;  %v963_v30 = vadd.f32 %v5026_v36, %v947_v61  ;;  %vm7411_vm7 = vnez %v7410_v60  ;;  %v4461_v60 = vld [vmem:[%s7196_s7 + $0x10] sm:$0xff] }
 0x1cf   :  { %v946_v7 = vmul.f32 1.6666666, %v930_v42  ;;  %v1295_v54 = vpack.c.bf16 %v983_v51, %v982_v23  ;;  %v980_v2 = vmul.f32 0.70710677, %v964_v8 }
 0x1d0   :  { %v979_v46 = vmul.f32 0.70710677, %v963_v30 }
 0x1d1   :  { %1305 = vmatpush.bf16.msrb.mxu3 %v1296_v53  ;;  %v962_v55 = vadd.f32 %v5027_v20, %v946_v7  ;;  %v1294_v49 = vpack.c.bf16 %v981_v27, %v980_v2 }
 0x1d3   :  { %v978_v26 = vmul.f32 0.70710677, %v962_v55 }
 0x1d4   :  { %1140 = vmatmul.bf16.gmra.mxu2 %v4445_v10 }
 0x1d5   :  { %1306 = vmatpush.bf16.msrb.mxu3 %v1295_v54  ;;  %v1293_v31 = vpack.c.bf16 %v979_v46, %v978_v26 }
 0x1d9   :  { %1307 = vmatpush.bf16.msrb.mxu3 %v1294_v49 }
 0x1dd   :  { %1308 = vmatpush.bf16.msrb.mxu3 %v1293_v31 }
 0x1e0   :  { %4108 = vmatmul.msk.bf16.vlgmr.msrb.gmra.mxu3 %vm5854_vm13, %v7335_v25  ;;  %vm7413_vm13 = vnez %v7412_v11  ;;  %v4460_v11 = vld [vmem:[%s7196_s7 + $0x8] sm:$0xff] }
 0x1e4   :  { %1145 = vmatmul.bf16.gmra.mxu2 %v4446_v6 }
 0x1f0   :  { %4110 = vmatmul.msk.bf16.gmra.mxu3 %vm5808_vm6, %v7335_v25  ;;  %vm7409_vm6 = vnez %v7408_v9  ;;  %v4463_v9 = vld [vmem:[%s7196_s7 + $0x20] sm:$0xff] }
 0x1f4   :  { %1150 = vmatmul.bf16.gmra.mxu2 %v4447_v21 }
 0x200   :  { %4112 = vmatmul.msk.bf16.gmra.mxu3 %vm5869_vm15, %v7335_v25  ;;  %vm7415_vm15 = vnez %v7414_v63 }
 0x204   :  { %1155 = vmatmul.bf16.gmra.mxu2 %v4448_v13  ;;  %v4466_v13 = vld [vmem:[%s7196_s7 + $0x38] sm:$0xff] }
 0x205   :  { %1631 = vmatpush.bf16.msrb.mxu1 %v4466_v13 }
 0x209   :  { %1632 = vmatpush.bf16.msrb.mxu1 %v4465_v3 }
 0x210   :  { %4114 = vmatmul.msk.bf16.gmra.mxu3 %vm5888_vm2, %v7335_v25 }
 0x214   :  { %1160 = vmatmul.bf16.gmra.mxu2 %v4449_v45  ;;  %v4464_v45 = vld [vmem:[%s7196_s7 + $0x28] sm:$0xff] }
 0x215   :  { %1633 = vmatpush.bf16.msrb.mxu1 %v4464_v45 }
 0x219   :  { %1634 = vmatpush.bf16.msrb.mxu1 %v4463_v9  ;;  %v4468_v9 = vld [vmem:[%s7197_s8 + $0x8] sm:$0xff] }
 0x220   :  { %4116 = vmatmul.msk.bf16.gmra.mxu3 %vm7409_vm6, %v7335_v25 }
 0x224   :  { %1165 = vmatmul.bf16.gmra.mxu2 %v4450_v19  ;;  %v4462_v19 = vld [vmem:[%s7196_s7 + $0x18] sm:$0xff] }
 0x225   :  { %1635 = vmatpush.bf16.msrb.mxu1 %v4462_v19 }
 0x229   :  { %1636 = vmatpush.bf16.msrb.mxu1 %v4461_v60 }
 0x22d   :  { %1637 = vmatpush.bf16.msrb.mxu1 %v4460_v11 }
 0x230   :  { %4118 = vmatmul.msk.bf16.gmra.mxu3 %vm7411_vm7, %v7335_v25 }
 0x233   :  { %v1131_v35 = vpop.f32.mrf.mxu2 }
 0x23b   :  { %v1133_v38 = vpop.f32.mrf.mxu2 }
 0x240   :  { %4120 = vmatmul.msk.bf16.gmra.mxu3 %vm7413_vm13, %v7335_v25 }
 0x247   :  { %v1136_v29 = vpop.f32.mrf.mxu2 }
 0x24f   :  { %v1138_v43 = vpop.f32.mrf.mxu2 }
 0x250   :  { %4122 = vmatmul.msk.bf16.gmra.mxu3 %vm7415_vm15, %v7335_v25 }
 0x257   :  { %v1141_v39 = vpop.f32.mrf.mxu2 }
 0x25f   :  { %v1143_v32 = vpop.f32.mrf.mxu2 }
 0x263   :  { %v1310_v52 = vpop.f32.mrf.mxu3 }
 0x264   :  { %v1350_v56 = vmul.f32 %v1310_v52, %v1131_v35  ;;  %v4459_v35 = vld [vmem:[%s7196_s7] sm:$0xff] }
 0x265   :  { %1638 = vmatpush.bf16.msrb.mxu1 %v4459_v35 }
 0x267   :  { %v1146_v24 = vpop.f32.mrf.mxu2 }
 0x26b   :  { %v1312_v40 = vpop.f32.mrf.mxu3 }
 0x26c   :  { %v1351_v44 = vmul.f32 %v1312_v40, %v1133_v38 }
 0x26e   :  { %v1486_v15 = vpack.c.bf16 %v1351_v44, %v1350_v56 }
 0x26f   :  { %v1148_v16 = vpop.f32.mrf.mxu2 }
 0x273   :  { %v1315_v41 = vpop.f32.mrf.mxu3 }
 0x274   :  { %v1352_v37 = vmul.f32 %v1315_v41, %v1136_v29 }
 0x277   :  { %v1151_v59 = vpop.f32.mrf.mxu2 }
 0x27b   :  { %v1317_v62 = vpop.f32.mrf.mxu3 }
 0x27c   :  { %v1353_v22 = vmul.f32 %v1317_v62, %v1138_v43 }
 0x27e   :  { %v1487_v21 = vpack.c.bf16 %v1353_v22, %v1352_v37 }
 0x27f   :  { %v1153_v25 = vpop.f32.mrf.mxu2 }
 0x283   :  { %v1320_v4 = vpop.f32.mrf.mxu3 }
 0x284   :  { %v1354_v12 = vmul.f32 %v1320_v4, %v1141_v39 }
 0x287   :  { %v1156_v34 = vpop.f32.mrf.mxu2 }
 0x28b   :  { %v1322_v48 = vpop.f32.mrf.mxu3 }
 0x28c   :  { %v1355_v26 = vmul.f32 %v1322_v48, %v1143_v32  ;;  %v4474_v32 = vld [vmem:[%s7197_s8 + $0x38] sm:$0xff] }
 0x28d   :  { %2105 = vmatpush.bf16.msra.mxu2 %v4474_v32 }
 0x28e   :  { %v1488_v6 = vpack.c.bf16 %v1355_v26, %v1354_v12  ;;  %v4473_v12 = vld [vmem:[%s7197_s8 + $0x30] sm:$0xff] }
 0x28f   :  { %v1158_v33 = vpop.f32.mrf.mxu2 }
 0x291   :  { %2106 = vmatpush.bf16.msra.mxu2 %v4473_v12 }
 0x293   :  { %v1325_v57 = vpop.f32.mrf.mxu3 }
 0x294   :  { %v1356_v47 = vmul.f32 %v1325_v57, %v1146_v24 }
 0x297   :  { %v1161_v1 = vpop.f32.mrf.mxu2 }
 0x29b   :  { %v1327_v18 = vpop.f32.mrf.mxu3 }
 0x29c   :  { %v1357_v49 = vmul.f32 %v1327_v18, %v1148_v16 }
 0x29e   :  { %v1489_v31 = vpack.c.bf16 %v1357_v49, %v1356_v47  ;;  %v4472_v47 = vld [vmem:[%s7197_s8 + $0x28] sm:$0xff] }
 0x29f   :  { %v1163_v53 = vpop.f32.mrf.mxu2  ;;  %2107 = vmatpush.bf16.msra.mxu2 %v4472_v47 }
 0x2a3   :  { %v1330_v17 = vpop.f32.mrf.mxu3 }
 0x2a4   :  { %v1358_v50 = vmul.f32 %v1330_v17, %v1151_v59 }
 0x2a7   :  { %v1166_v0 = vpop.f32.mrf.mxu2 }
 0x2ab   :  { %v1332_v42 = vpop.f32.mrf.mxu3 }
 0x2ac   :  { %v1359_v55 = vmul.f32 %v1332_v42, %v1153_v25  ;;  %v4471_v25 = vld [vmem:[%s7197_s8 + $0x20] sm:$0xff] }
 0x2ad   :  { %2108 = vmatpush.bf16.msra.mxu2 %v4471_v25 }
 0x2ae   :  { %v1490_v46 = vpack.c.bf16 %v1359_v55, %v1358_v50 }
 0x2af   :  { %v1168_v7 = vpop.f32.mrf.mxu2 }
 0x2b3   :  { %v1335_v28 = vpop.f32.mrf.mxu3 }
 0x2b4   :  { %v1360_v20 = vmul.f32 %v1335_v28, %v1156_v34 }
 0x2bb   :  { %v1337_v58 = vpop.f32.mrf.mxu3 }
 0x2bc   :  { %v1361_v30 = vmul.f32 %v1337_v58, %v1158_v33 }
 0x2be   :  { %v1491_v10 = vpack.c.bf16 %v1361_v30, %v1360_v20 }
 0x2c3   :  { %v1340_v61 = vpop.f32.mrf.mxu3 }
 0x2c4   :  { %v1362_v36 = vmul.f32 %v1340_v61, %v1161_v1 }
 0x2cb   :  { %v1342_v51 = vpop.f32.mrf.mxu3 }
 0x2cc   :  { %v1363_v54 = vmul.f32 %v1342_v51, %v1163_v53 }
 0x2ce   :  { %v1492_v2 = vpack.c.bf16 %v1363_v54, %v1362_v36 }
 0x2d3   :  { %v1345_v14 = vpop.f32.mrf.mxu3 }
 0x2d4   :  { %v1364_v5 = vmul.f32 %v1345_v14, %v1166_v0  ;;  %v4470_v0 = vld [vmem:[%s7197_s8 + $0x18] sm:$0xff] }
 0x2d5   :  { %2109 = vmatpush.bf16.msra.mxu2 %v4470_v0 }
 0x2db   :  { %v1347_v23 = vpop.f32.mrf.mxu3 }
 0x2dc   :  { %v1365_v8 = vmul.f32 %v1347_v23, %v1168_v7 }
 0x2de   :  { %v1493_v27 = vpack.c.bf16 %v1365_v8, %v1364_v5 }
 0x2e0   :  { %1510 = vmatpush.bf16.msra.mxu0 %v1493_v27 }
 0x2e4   :  { %1511 = vmatpush.bf16.msra.mxu0 %v1492_v2  ;;  %v4469_v2 = vld [vmem:[%s7197_s8 + $0x10] sm:$0xff] }
 0x2e5   :  { %2110 = vmatpush.bf16.msra.mxu2 %v4469_v2 }
 0x2e8   :  { %1512 = vmatpush.bf16.msra.mxu0 %v1491_v10 }
 0x2e9   :  { %2111 = vmatpush.bf16.msra.mxu2 %v4468_v9 }
 0x2ec   :  { %1513 = vmatpush.bf16.msra.mxu0 %v1490_v46 }
 0x2f0   :  { %1514 = vmatpush.bf16.msra.mxu0 %v1489_v31 }
 0x2f4   :  { %1515 = vmatpush.bf16.msra.mxu0 %v1488_v6 }
 0x2f8   :  { %1516 = vmatpush.bf16.msra.mxu0 %v1487_v21 }
 0x2fc   :  { %1517 = vmatpush.bf16.msra.mxu0 %v1486_v15 }
 0x2ff   :  { %4527 = vmatmul.lmr.bf16.vlgmr.msra.gmra.16.mxu0 }
 0x307   :  { %4528 = vmatmul.lmr.bf16.gmra.16.mxu0 }
 0x30f   :  { %4529 = vmatmul.lmr.bf16.gmra.16.mxu0 }
 0x317   :  { %4530 = vmatmul.lmr.bf16.gmra.16.mxu0 }
 0x31f   :  { %4531 = vmatmul.lmr.bf16.gmra.16.mxu0 }
 0x327   :  { %4532 = vmatmul.lmr.bf16.gmra.16.mxu0 }
 0x32f   :  { %4533 = vmatmul.lmr.bf16.gmra.16.mxu0 }
 0x337   :  { %4534 = vmatmul.lmr.bf16.gmra.16.mxu0 }
 0x33f   :  { %4535 = vmatmul.lmr.bf16.gmra.16.mxu0 }
 0x347   :  { %4536 = vmatmul.lmr.bf16.gmra.16.mxu0 }
 0x34f   :  { %4537 = vmatmul.lmr.bf16.gmra.16.mxu0 }
 0x357   :  { %4538 = vmatmul.lmr.bf16.gmra.16.mxu0 }
 0x35f   :  { %4539 = vmatmul.lmr.bf16.gmra.16.mxu0 }
 0x367   :  { %4540 = vmatmul.lmr.bf16.gmra.16.mxu0 }
 0x36f   :  { %4541 = vmatmul.lmr.bf16.gmra.16.mxu0 }
 0x377   :  { %4542 = vmatmul.lmr.bf16.gmra.16.mxu0 }
 0x37c   :  { %v1519_v38 = vpop.f32.mrf.mxu0 }
 0x384   :  { %v1521_v63 = vpop.f32.mrf.mxu0 }
 0x385   :  { %v1575_v29 = vpack.c.bf16 %v1521_v63, %v1519_v38 }
 0x387   :  { %1639 = vmatmul.bf16.vlgmr.msrb.gmra.mxu1 %v1575_v29 }
 0x38c   :  { %v1524_v52 = vpop.f32.mrf.mxu0 }
 0x394   :  { %v1526_v43 = vpop.f32.mrf.mxu0 }
 0x395   :  { %v1576_v56 = vpack.c.bf16 %v1526_v43, %v1524_v52 }
 0x397   :  { %1644 = vmatmul.bf16.gmra.mxu1 %v1576_v56 }
 0x39c   :  { %v1529_v40 = vpop.f32.mrf.mxu0 }
 0x3a4   :  { %v1531_v39 = vpop.f32.mrf.mxu0 }
 0x3a5   :  { %v1577_v41 = vpack.c.bf16 %v1531_v39, %v1529_v40 }
 0x3a7   :  { %1649 = vmatmul.bf16.gmra.mxu1 %v1577_v41 }
 0x3ac   :  { %v1534_v37 = vpop.f32.mrf.mxu0 }
 0x3b4   :  { %v1536_v62 = vpop.f32.mrf.mxu0 }
 0x3b5   :  { %v1578_v24 = vpack.c.bf16 %v1536_v62, %v1534_v37 }
 0x3b7   :  { %1654 = vmatmul.bf16.gmra.mxu1 %v1578_v24 }
 0x3bc   :  { %v1539_v4 = vpop.f32.mrf.mxu0 }
 0x3c4   :  { %v1541_v48 = vpop.f32.mrf.mxu0 }
 0x3c5   :  { %v1579_v16 = vpack.c.bf16 %v1541_v48, %v1539_v4  ;;  %v4467_v4 = vld [vmem:[%s7197_s8] sm:$0xff] }
 0x3c6   :  { %2112 = vmatpush.bf16.msra.mxu2 %v4467_v4 }
 0x3c7   :  { %1659 = vmatmul.bf16.gmra.mxu1 %v1579_v16 }
 0x3cc   :  { %v1544_v57 = vpop.f32.mrf.mxu0 }
 0x3d4   :  { %v1546_v59 = vpop.f32.mrf.mxu0 }
 0x3d5   :  { %v1580_v18 = vpack.c.bf16 %v1546_v59, %v1544_v57 }
 0x3d7   :  { %1664 = vmatmul.bf16.gmra.mxu1 %v1580_v18 }
 0x3dc   :  { %v1549_v17 = vpop.f32.mrf.mxu0 }
 0x3e4   :  { %v1551_v50 = vpop.f32.mrf.mxu0 }
 0x3e5   :  { %v1581_v34 = vpack.c.bf16 %v1551_v50, %v1549_v17 }
 0x3e7   :  { %1669 = vmatmul.bf16.gmra.mxu1 %v1581_v34 }
 0x3ec   :  { %v1554_v42 = vpop.f32.mrf.mxu0 }
 0x3f4   :  { %v1556_v33 = vpop.f32.mrf.mxu0 }
 0x3f5   :  { %v1582_v28 = vpack.c.bf16 %v1556_v33, %v1554_v42 }
 0x3f7   :  { %1674 = vmatmul.bf16.gmra.mxu1 %v1582_v28 }
 0x404   :  { %v1640_v58 = vpop.f32.mrf.mxu1 }
 0x405   :  { %v4171_v1 = vmul.f32 -1.442695, %v1640_v58 }
 0x407   :  { %4692 = vpow2.f32 %v4171_v1 }
 0x40c   :  { %v1642_v61 = vpop.f32.mrf.mxu1 }
 0x40d   :  { %v4693_v53 = vpop.eup %4692  ;;  %v4172_v51 = vmul.f32 -1.442695, %v1642_v61 }
 0x40e   :  { %v1728_v14 = vadd.f32 1.0, %v4693_v53 }
 0x40f   :  { %4694 = vpow2.f32 %v4172_v51 }
 0x410   :  { %4696 = vrcp.f32 %v1728_v14  ;;  %v1755_v26 = vand.u32 2147483648, %v1728_v14  ;;  %vm1749_vm10 = vweird.f32 %v1728_v14  ;;  %v1753_v22 = vand.u32 2147483647, %v1728_v14 }
 0x412   :  { %v1756_v15 = vor.u32 1.1754944e-38, %v1755_v26  ;;  %vm1754_vm11 = vcmp.eq.f32.partialorder %v1753_v22, 8.507059e+37 }
 0x414   :  { %v6611_v7 = vpop.f32.mrf.mxu1 }
 0x415   :  { %v4695_v23 = vpop.eup %4694  ;;  %v4173_v5 = vmul.f32 -1.442695, %v6611_v7 }
 0x416   :  { %v4697_v8 = vpop.eup %4696  ;;  %v1729_v54 = vadd.f32 1.0, %v4695_v23 }
 0x417   :  { %v1745_v27 = vmul.f32 %v4697_v8, %v1728_v14  ;;  %4698 = vpow2.f32 %v4173_v5  ;;  %vm1750_vm2 = vweird.f32 %v4697_v8 }
 0x418   :  { %4700 = vrcp.f32 %v1729_v54  ;;  %vm1751_vm8 = vmor %vm1749_vm10, %vm1750_vm2  ;;  %v1768_v13 = vand.u32 2147483647, %v1729_v54  ;;  %v1770_v3 = vand.u32 2147483648, %v1729_v54  ;;  %vm1764_vm0 = vweird.f32 %v1729_v54 }
 0x419   :  { %v1746_v36 = vsub.f32 1.0, %v1745_v27 }
 0x41a   :  { %vm1769_vm3 = vcmp.eq.f32.partialorder %v1768_v13, 8.507059e+37  ;;  %v1771_v29 = vor.u32 1.1754944e-38, %v1770_v3 }
 0x41b   :  { %v1747_v30 = vmul.f32 %v4697_v8, %v1746_v36 }
 0x41c   :  { %v6617_v20 = vpop.f32.mrf.mxu1 }
 0x41d   :  { %v4699_v55 = vpop.eup %4698  ;;  %v1748_v10 = vadd.f32 %v4697_v8, %v1747_v30  ;;  %v4174_v49 = vmul.f32 -1.442695, %v6617_v20 }
 0x41e   :  { %v4701_v46 = vpop.eup %4700  ;;  %v1730_v31 = vadd.f32 1.0, %v4699_v55 }
 0x41f   :  { %v1760_v6 = vmul.f32 %v4701_v46, %v1729_v54  ;;  %4702 = vpow2.f32 %v4174_v49  ;;  %v1752_v44 = vsel %vm1751_vm8, %v4697_v8, %v1748_v10  ;;  %vm1765_vm14 = vweird.f32 %v4701_v46 }
 0x420   :  { %4704 = vrcp.f32 %v1730_v31  ;;  %v1757_v19 = vsel %vm1754_vm11, %v1756_v15, %v1752_v44  ;;  %vm1766_vm12 = vmor %vm1764_vm0, %vm1765_vm14  ;;  %v1785_v18 = vand.u32 2147483648, %v1730_v31  ;;  %vm1779_vm9 = vweird.f32 %v1730_v31 }
 0x421   :  { %v1761_v21 = vsub.f32 1.0, %v1760_v6  ;;  %v1984_v43 = vmul.f32 %v1757_v19, %v1640_v58  ;;  %v1783_v17 = vand.u32 2147483647, %v1730_v31 }
 0x422   :  { %v1786_v33 = vor.u32 1.1754944e-38, %v1785_v18 }
 0x423   :  { %v1762_v45 = vmul.f32 %v4701_v46, %v1761_v21  ;;  %v6626_v32 = vmul.f32 1.6666666, %v1984_v43  ;;  %vm1784_vm5 = vcmp.eq.f32.partialorder %v1783_v17, 8.507059e+37 }
 0x424   :  { %v6623_v60 = vpop.f32.mrf.mxu1 }
 0x425   :  { %v4703_v11 = vpop.eup %4702  ;;  %v1763_v35 = vadd.f32 %v4701_v46, %v1762_v45  ;;  %v4175_v38 = vmul.f32 -1.442695, %v6623_v60 }
 0x426   :  { %v4705_v63 = vpop.eup %4704  ;;  %v1731_v52 = vadd.f32 1.0, %v4703_v11 }
 0x427   :  { %v1767_v56 = vsel %vm1766_vm12, %v4701_v46, %v1763_v35  ;;  %v1775_v40 = vmul.f32 %v4705_v63, %v1730_v31  ;;  %4706 = vpow2.f32 %v4175_v38  ;;  %vm1780_vm1 = vweird.f32 %v4705_v63 }
 0x428   :  { %v1772_v39 = vsel %vm1769_vm3, %v1771_v29, %v1767_v56  ;;  %4708 = vrcp.f32 %v1731_v52  ;;  %vm1781_vm4 = vmor %vm1779_vm9, %vm1780_vm1  ;;  %v1798_v28 = vand.u32 2147483647, %v1731_v52  ;;  %v1800_v58 = vand.u32 2147483648, %v1731_v52 }
 0x429   :  { %v1985_v41 = vmul.f32 %v1772_v39, %v1642_v61  ;;  %v1776_v37 = vsub.f32 1.0, %v1775_v40  ;;  %vm1794_vm7 = vweird.f32 %v1731_v52 }
 0x42a   :  { %vm1799_vm15 = vcmp.eq.f32.partialorder %v1798_v28, 8.507059e+37  ;;  %v1801_v5 = vor.u32 1.1754944e-38, %v1800_v58 }
 0x42b   :  { %v6628_v62 = vmul.f32 1.6666666, %v1985_v41  ;;  %v1777_v24 = vmul.f32 %v4705_v63, %v1776_v37 }
 0x42c   :  { %v6633_v12 = vpop.f32.mrf.mxu1 }
 0x42d   :  { %v4707_v48 = vpop.eup %4706  ;;  %v2049_v16 = vpack.c.bf16 %v6628_v62, %v6626_v32  ;;  %v1778_v57 = vadd.f32 %v4705_v63, %v1777_v24  ;;  %v4176_v47 = vmul.f32 -1.442695, %v6633_v12 }
 0x42e   :  { %v4709_v59 = vpop.eup %4708  ;;  %v1732_v25 = vadd.f32 1.0, %v4707_v48 }
 0x42f   :  { %v1790_v50 = vmul.f32 %v4709_v59, %v1731_v52  ;;  %4710 = vpow2.f32 %v4176_v47  ;;  %2113 = vmatmul.bf16.vlgmr.msra.gmra.mxu2 %v2049_v16  ;;  %v1782_v34 = vsel %vm1781_vm4, %v4705_v63, %v1778_v57  ;;  %vm1795_vm6 = vweird.f32 %v4709_v59 }
 0x430   :  { %4712 = vrcp.f32 %v1732_v25  ;;  %v1787_v61 = vsel %vm1784_vm5, %v1786_v33, %v1782_v34  ;;  %vm1796_vm13 = vmor %vm1794_vm7, %vm1795_vm6  ;;  %v1815_v21 = vand.u32 2147483648, %v1732_v25  ;;  %vm1809_vm10 = vweird.f32 %v1732_v25 }
 0x431   :  { %v1791_v42 = vsub.f32 1.0, %v1790_v50  ;;  %v1986_v54 = vmul.f32 %v1787_v61, %v6611_v7 }
 0x432   :  { %v1816_v9 = vor.u32 1.1754944e-38, %v1815_v21 }
 0x433   :  { %v1792_v1 = vmul.f32 %v4709_v59, %v1791_v42  ;;  %v6643_v10 = vmul.f32 1.6666666, %v1986_v54 }
 0x434   :  { %v6638_v53 = vpop.f32.mrf.mxu1 }
 0x435   :  { %v4711_v51 = vpop.eup %4710  ;;  %v1793_v0 = vadd.f32 %v4709_v59, %v1792_v1  ;;  %v4177_v14 = vmul.f32 -1.442695, %v6638_v53 }
 0x436   :  { %v4713_v23 = vpop.eup %4712  ;;  %v1733_v8 = vadd.f32 1.0, %v4711_v51 }
 0x437   :  { %v1797_v27 = vsel %vm1796_vm13, %v4709_v59, %v1793_v0  ;;  %v1805_v36 = vmul.f32 %v4713_v23, %v1732_v25  ;;  %4714 = vpow2.f32 %v4177_v14  ;;  %vm1810_vm2 = vweird.f32 %v4713_v23 }
 0x438   :  { %v1802_v30 = vsel %vm1799_vm15, %v1801_v5, %v1797_v27  ;;  %4716 = vrcp.f32 %v1733_v8  ;;  %vm1811_vm8 = vmor %vm1809_vm10, %vm1810_vm2  ;;  %v1828_v19 = vand.u32 2147483647, %v1733_v8  ;;  %v1830_v11 = vand.u32 2147483648, %v1733_v8 }
 0x439   :  { %v1987_v2 = vmul.f32 %v1802_v30, %v6617_v20  ;;  %v1806_v55 = vsub.f32 1.0, %v1805_v36  ;;  %v1813_v20 = vand.u32 2147483647, %v1732_v25  ;;  %vm1824_vm0 = vweird.f32 %v1733_v8 }
 0x43a   :  { %vm1829_vm3 = vcmp.eq.f32.partialorder %v1828_v19, 8.507059e+37  ;;  %v1831_v40 = vor.u32 1.1754944e-38, %v1830_v11 }
 0x43b   :  { %v6645_v49 = vmul.f32 1.6666666, %v1987_v2  ;;  %v1807_v46 = vmul.f32 %v4713_v23, %v1806_v55  ;;  %vm1814_vm11 = vcmp.eq.f32.partialorder %v1813_v20, 8.507059e+37 }
 0x43c   :  { %v6647_v26 = vpop.f32.mrf.mxu1 }
 0x43d   :  { %v4715_v31 = vpop.eup %4714  ;;  %v1808_v22 = vadd.f32 %v4713_v23, %v1807_v46  ;;  %v4178_v7 = vmul.f32 -1.442695, %v6647_v26  ;;  %v2050_v6 = vpack.c.bf16 %v6645_v49, %v6643_v10 }
 0x43e   :  { %v4717_v44 = vpop.eup %4716  ;;  %v1734_v15 = vadd.f32 1.0, %v4715_v31 }
 0x43f   :  { %v1820_v13 = vmul.f32 %v4717_v44, %v1733_v8  ;;  %4718 = vpow2.f32 %v4178_v7  ;;  %2118 = vmatmul.bf16.gmra.mxu2 %v2050_v6  ;;  %v1812_v3 = vsel %vm1811_vm8, %v4713_v23, %v1808_v22  ;;  %vm1825_vm14 = vweird.f32 %v4717_v44 }
 0x440   :  { %4720 = vrcp.f32 %v1734_v15  ;;  %v1817_v38 = vsel %vm1814_vm11, %v1816_v9, %v1812_v3  ;;  %vm1826_vm12 = vmor %vm1824_vm0, %vm1825_vm14  ;;  %v1845_v42 = vand.u32 2147483648, %v1734_v15  ;;  %vm1839_vm9 = vweird.f32 %v1734_v15 }
 0x441   :  { %v1821_v45 = vsub.f32 1.0, %v1820_v13  ;;  %v1988_v41 = vmul.f32 %v1817_v38, %v6623_v60 }
 0x442   :  { %v1846_v61 = vor.u32 1.1754944e-38, %v1845_v42 }
 0x443   :  { %v1822_v35 = vmul.f32 %v4717_v44, %v1821_v45  ;;  %v6657_v57 = vmul.f32 1.6666666, %v1988_v41 }
 0x444   :  { %v6652_v63 = vpop.f32.mrf.mxu1 }
 0x445   :  { %v4719_v29 = vpop.eup %4718  ;;  %v1823_v52 = vadd.f32 %v4717_v44, %v1822_v35  ;;  %v4179_v43 = vmul.f32 -1.442695, %v6652_v63 }
 0x446   :  { %v4721_v56 = vpop.eup %4720  ;;  %v1735_v39 = vadd.f32 1.0, %v4719_v29 }
 0x447   :  { %v1827_v37 = vsel %vm1826_vm12, %v4717_v44, %v1823_v52  ;;  %v1835_v24 = vmul.f32 %v4721_v56, %v1734_v15  ;;  %4722 = vpow2.f32 %v4179_v43  ;;  %vm1840_vm1 = vweird.f32 %v4721_v56 }
 0x448   :  { %v1832_v4 = vsel %vm1829_vm3, %v1831_v40, %v1827_v37  ;;  %4724 = vrcp.f32 %v1735_v39  ;;  %vm1841_vm4 = vmor %vm1839_vm9, %vm1840_vm1  ;;  %v1858_v51 = vand.u32 2147483647, %v1735_v39  ;;  %v1860_v0 = vand.u32 2147483648, %v1735_v39 }
 0x449   :  { %v1989_v48 = vmul.f32 %v1832_v4, %v6633_v12  ;;  %v1836_v16 = vsub.f32 1.0, %v1835_v24  ;;  %v1843_v12 = vand.u32 2147483647, %v1734_v15  ;;  %vm1854_vm7 = vweird.f32 %v1735_v39 }
 0x44a   :  { %vm1859_vm15 = vcmp.eq.f32.partialorder %v1858_v51, 8.507059e+37  ;;  %v1861_v30 = vor.u32 1.1754944e-38, %v1860_v0 }
 0x44b   :  { %v6659_v47 = vmul.f32 1.6666666, %v1989_v48  ;;  %v1837_v59 = vmul.f32 %v4721_v56, %v1836_v16  ;;  %vm1844_vm5 = vcmp.eq.f32.partialorder %v1843_v12, 8.507059e+37 }
 0x44c   :  { %v6661_v18 = vpop.f32.mrf.mxu1 }
 0x44d   :  { %v4723_v25 = vpop.eup %4722  ;;  %v1838_v17 = vadd.f32 %v4721_v56, %v1837_v59  ;;  %v4180_v60 = vmul.f32 -1.442695, %v6661_v18  ;;  %v2051_v50 = vpack.c.bf16 %v6659_v47, %v6657_v57 }
 0x44e   :  { %v4725_v34 = vpop.eup %4724  ;;  %v1736_v33 = vadd.f32 1.0, %v4723_v25 }
 0x44f   :  { %v1850_v28 = vmul.f32 %v4725_v34, %v1735_v39  ;;  %4726 = vpow2.f32 %v4180_v60  ;;  %2123 = vmatmul.bf16.gmra.mxu2 %v2051_v50  ;;  %v1842_v58 = vsel %vm1841_vm4, %v4721_v56, %v1838_v17  ;;  %vm1855_vm6 = vweird.f32 %v4725_v34 }
 0x450   :  { %4728 = vrcp.f32 %v1736_v33  ;;  %v1847_v23 = vsel %vm1844_vm5, %v1846_v61, %v1842_v58  ;;  %vm1856_vm13 = vmor %vm1854_vm7, %vm1855_vm6  ;;  %v1875_v19 = vand.u32 2147483648, %v1736_v33  ;;  %vm1869_vm10 = vweird.f32 %v1736_v33 }
 0x451   :  { %v1851_v1 = vsub.f32 1.0, %v1850_v28  ;;  %v1990_v55 = vmul.f32 %v1847_v23, %v6638_v53 }
 0x452   :  { %v1876_v52 = vor.u32 1.1754944e-38, %v1875_v19 }
 0x453   :  { %v1852_v14 = vmul.f32 %v4725_v34, %v1851_v1  ;;  %v6671_v44 = vmul.f32 1.6666666, %v1990_v55 }
 0x454   :  { %v6666_v5 = vpop.f32.mrf.mxu1 }
 0x455   :  { %v4727_v8 = vpop.eup %4726  ;;  %v1853_v54 = vadd.f32 %v4725_v34, %v1852_v14  ;;  %v4181_v27 = vmul.f32 -1.442695, %v6666_v5 }
 0x456   :  { %v4729_v36 = vpop.eup %4728  ;;  %v1737_v2 = vadd.f32 1.0, %v4727_v8 }
 0x457   :  { %v1857_v46 = vsel %vm1856_vm13, %v4725_v34, %v1853_v54  ;;  %v1865_v31 = vmul.f32 %v4729_v36, %v1736_v33  ;;  %4730 = vpow2.f32 %v4181_v27  ;;  %vm1870_vm2 = vweird.f32 %v4729_v36 }
 0x458   :  { %v1862_v22 = vsel %vm1859_vm15, %v1861_v30, %v1857_v46  ;;  %4732 = vrcp.f32 %v1737_v2  ;;  %vm1871_vm8 = vmor %vm1869_vm10, %vm1870_vm2  ;;  %v1888_v43 = vand.u32 2147483647, %v1737_v2  ;;  %v1890_v56 = vand.u32 2147483648, %v1737_v2 }
 0x459   :  { %v1991_v7 = vmul.f32 %v1862_v22, %v6647_v26  ;;  %v1866_v6 = vsub.f32 1.0, %v1865_v31  ;;  %v1873_v26 = vand.u32 2147483647, %v1736_v33  ;;  %vm1884_vm0 = vweird.f32 %v1737_v2 }
 0x45a   :  { %vm1889_vm3 = vcmp.eq.f32.partialorder %v1888_v43, 8.507059e+37  ;;  %v1891_v16 = vor.u32 1.1754944e-38, %v1890_v56 }
 0x45b   :  { %v6673_v21 = vmul.f32 1.6666666, %v1991_v7  ;;  %v1867_v15 = vmul.f32 %v4729_v36, %v1866_v6  ;;  %vm1874_vm11 = vcmp.eq.f32.partialorder %v1873_v26, 8.507059e+37 }
 0x45c   :  { %v6675_v20 = vpop.f32.mrf.mxu1 }
 0x45d   :  { %v4731_v13 = vpop.eup %4730  ;;  %v1868_v3 = vadd.f32 %v4729_v36, %v1867_v15  ;;  %v4182_v53 = vmul.f32 -1.442695, %v6675_v20  ;;  %v2052_v45 = vpack.c.bf16 %v6673_v21, %v6671_v44 }
 0x45e   :  { %v4733_v9 = vpop.eup %4732  ;;  %v1738_v11 = vadd.f32 1.0, %v4731_v13 }
 0x45f   :  { %v1880_v35 = vmul.f32 %v4733_v9, %v1737_v2  ;;  %4734 = vpow2.f32 %v4182_v53  ;;  %2128 = vmatmul.bf16.gmra.mxu2 %v2052_v45  ;;  %v1872_v38 = vsel %vm1871_vm8, %v4729_v36, %v1868_v3  ;;  %vm1885_vm14 = vweird.f32 %v4733_v9 }
 0x460   :  { %4736 = vrcp.f32 %v1738_v11  ;;  %v1877_v39 = vsel %vm1874_vm11, %v1876_v52, %v1872_v38  ;;  %vm1886_vm12 = vmor %vm1884_vm0, %vm1885_vm14  ;;  %v1905_v14 = vand.u32 2147483648, %v1738_v11  ;;  %vm1899_vm9 = vweird.f32 %v1738_v11  ;;  %v4482_v52 = vld [vmem:[%s7197_s8 + $0x78] sm:$0xff] }
 0x461   :  { %v1881_v29 = vsub.f32 1.0, %v1880_v35  ;;  %v1992_v25 = vmul.f32 %v1877_v39, %v6652_v63  ;;  %2546 = vmatpush.bf16.msra.mxu3 %v4482_v52  ;;  %v4481_v39 = vld [vmem:[%s7197_s8 + $0x70] sm:$0xff] }
 0x462   :  { %v1906_v36 = vor.u32 1.1754944e-38, %v1905_v14 }
 0x463   :  { %v1882_v40 = vmul.f32 %v4733_v9, %v1881_v29  ;;  %v6685_v33 = vmul.f32 1.6666666, %v1992_v25 }
 0x464   :  { %v6680_v41 = vpop.f32.mrf.mxu1 }
 0x465   :  { %v4735_v37 = vpop.eup %4734  ;;  %v1883_v24 = vadd.f32 %v4733_v9, %v1882_v40  ;;  %v4183_v4 = vmul.f32 -1.442695, %v6680_v41  ;;  %2547 = vmatpush.bf16.msra.mxu3 %v4481_v39 }
 0x466   :  { %v4737_v48 = vpop.eup %4736  ;;  %v1739_v59 = vadd.f32 1.0, %v4735_v37 }
 0x467   :  { %v1887_v17 = vsel %vm1886_vm12, %v4733_v9, %v1883_v24  ;;  %v1895_v60 = vmul.f32 %v4737_v48, %v1738_v11  ;;  %4738 = vpow2.f32 %v4183_v4  ;;  %vm1900_vm1 = vweird.f32 %v4737_v48 }
 0x468   :  { %v1892_v50 = vsel %vm1889_vm3, %v1891_v16, %v1887_v17  ;;  %4740 = vrcp.f32 %v1739_v59  ;;  %vm1901_vm4 = vmor %vm1899_vm9, %vm1900_vm1  ;;  %v1918_v30 = vand.u32 2147483647, %v1739_v59  ;;  %v1920_v2 = vand.u32 2147483648, %v1739_v59  ;;  %v4480_v17 = vld [vmem:[%s7197_s8 + $0x68] sm:$0xff] }
 0x469   :  { %v1993_v34 = vmul.f32 %v1892_v50, %v6661_v18  ;;  %v1896_v42 = vsub.f32 1.0, %v1895_v60  ;;  %v1903_v18 = vand.u32 2147483647, %v1738_v11  ;;  %vm1914_vm7 = vweird.f32 %v1739_v59  ;;  %2548 = vmatpush.bf16.msra.mxu3 %v4480_v17 }
 0x46a   :  { %vm1919_vm15 = vcmp.eq.f32.partialorder %v1918_v30, 8.507059e+37  ;;  %v1921_v13 = vor.u32 1.1754944e-38, %v1920_v2 }
 0x46b   :  { %v6687_v12 = vmul.f32 1.6666666, %v1993_v34  ;;  %v1897_v28 = vmul.f32 %v4737_v48, %v1896_v42  ;;  %vm1904_vm5 = vcmp.eq.f32.partialorder %v1903_v18, 8.507059e+37 }
 0x46c   :  { %v6689_v58 = vpop.f32.mrf.mxu1 }
 0x46d   :  { %v4739_v1 = vpop.eup %4738  ;;  %v1898_v61 = vadd.f32 %v4737_v48, %v1897_v28  ;;  %v4184_v63 = vmul.f32 -1.442695, %v6689_v58  ;;  %v2053_v51 = vpack.c.bf16 %v6687_v12, %v6685_v33 }
 0x46e   :  { %v4741_v0 = vpop.eup %4740  ;;  %v6694_v23 = vadd.f32 1.0, %v4739_v1 }
 0x46f   :  { %v1910_v8 = vmul.f32 %v4741_v0, %v1739_v59  ;;  %4742 = vpow2.f32 %v4184_v63  ;;  %2133 = vmatmul.bf16.gmra.mxu2 %v2053_v51  ;;  %v1902_v54 = vsel %vm1901_vm4, %v4737_v48, %v1898_v61  ;;  %vm1915_vm6 = vweird.f32 %v4741_v0  ;;  %v4479_v63 = vld [vmem:[%s7197_s8 + $0x60] sm:$0xff] }
 0x470   :  { %4744 = vrcp.f32 %v6694_v23  ;;  %v1907_v46 = vsel %vm1904_vm5, %v1906_v36, %v1902_v54  ;;  %vm1916_vm13 = vmor %vm1914_vm7, %vm1915_vm6  ;;  %v1935_v24 = vand.u32 2147483648, %v6694_v23  ;;  %vm1929_vm10 = vweird.f32 %v6694_v23  ;;  %2549 = vmatpush.bf16.msra.mxu3 %v4479_v63 }
 0x471   :  { %v1911_v27 = vsub.f32 1.0, %v1910_v8  ;;  %v1994_v53 = vmul.f32 %v1907_v46, %v6666_v5  ;;  %v1933_v48 = vand.u32 2147483647, %v6694_v23 }
 0x472   :  { %v1936_v60 = vor.u32 1.1754944e-38, %v1935_v24 }
 0x473   :  { %v1912_v55 = vmul.f32 %v4741_v0, %v1911_v27  ;;  %v6703_v35 = vmul.f32 1.6666666, %v1994_v53  ;;  %vm1934_vm11 = vcmp.eq.f32.partialorder %v1933_v48, 8.507059e+37 }
 0x474   :  { %v6697_v31 = vpop.f32.mrf.mxu1 }
 0x475   :  { %v4743_v22 = vpop.eup %4742  ;;  %v1913_v7 = vadd.f32 %v4741_v0, %v1912_v55  ;;  %v4185_v6 = vmul.f32 -1.442695, %v6697_v31 }
 0x476   :  { %v4745_v15 = vpop.eup %4744  ;;  %v1741_v3 = vadd.f32 1.0, %v4743_v22 }
 0x477   :  { %v1917_v45 = vsel %vm1916_vm13, %v4741_v0, %v1913_v7  ;;  %v1925_v9 = vmul.f32 %v4745_v15, %v6694_v23  ;;  %4746 = vpow2.f32 %v4185_v6  ;;  %vm1930_vm2 = vweird.f32 %v4745_v15 }
 0x478   :  { %v1922_v19 = vsel %vm1919_vm15, %v1921_v13, %v1917_v45  ;;  %4748 = vrcp.f32 %v1741_v3  ;;  %vm1931_vm8 = vmor %vm1929_vm10, %vm1930_vm2  ;;  %v1950_v50 = vand.u32 2147483648, %v1741_v3  ;;  %v1948_v42 = vand.u32 2147483647, %v1741_v3 }
 0x479   :  { %v1995_v11 = vmul.f32 %v1922_v19, %v6675_v20  ;;  %v1926_v26 = vsub.f32 1.0, %v1925_v9  ;;  %vm1944_vm0 = vweird.f32 %v1741_v3 }
 0x47a   :  { %v1951_v0 = vor.u32 1.1754944e-38, %v1950_v50  ;;  %vm1949_vm3 = vcmp.eq.f32.partialorder %v1948_v42, 8.507059e+37 }
 0x47b   :  { %v6705_v38 = vmul.f32 1.6666666, %v1995_v11  ;;  %v1927_v29 = vmul.f32 %v4745_v15, %v1926_v26 }
 0x47c   :  { %v6710_v43 = vpop.f32.mrf.mxu1 }
 0x47d   :  { %v4747_v5 = vpop.eup %4746  ;;  %v1928_v56 = vadd.f32 %v4745_v15, %v1927_v29  ;;  %v4186_v40 = vmul.f32 -1.442695, %v6710_v43  ;;  %v2054_v20 = vpack.c.bf16 %v6705_v38, %v6703_v35 }
 0x47e   :  { %v4749_v37 = vpop.eup %4748  ;;  %v1742_v4 = vadd.f32 1.0, %v4747_v5 }
 0x47f   :  { %v1940_v16 = vmul.f32 %v4749_v37, %v1741_v3  ;;  %4750 = vpow2.f32 %v4186_v40  ;;  %2138 = vmatmul.bf16.gmra.mxu2 %v2054_v20  ;;  %v1932_v59 = vsel %vm1931_vm8, %v4745_v15, %v1928_v56  ;;  %vm1945_vm14 = vweird.f32 %v4749_v37 }
 0x480   :  { %4752 = vrcp.f32 %v1742_v4  ;;  %v1937_v28 = vsel %vm1934_vm11, %v1936_v60, %v1932_v59  ;;  %vm1946_vm12 = vmor %vm1944_vm0, %vm1945_vm14  ;;  %v1965_v7 = vand.u32 2147483648, %v1742_v4  ;;  %vm1959_vm9 = vweird.f32 %v1742_v4 }
 0x481   :  { %v1941_v25 = vsub.f32 1.0, %v1940_v16  ;;  %v1996_v23 = vmul.f32 %v1937_v28, %v6680_v41  ;;  %v1963_v6 = vand.u32 2147483647, %v1742_v4 }
 0x482   :  { %v1966_v3 = vor.u32 1.1754944e-38, %v1965_v7  ;;  %v4476_v7 = vld [vmem:[%s7197_s8 + $0x48] sm:$0xff] }
 0x483   :  { %v1942_v34 = vmul.f32 %v4749_v37, %v1941_v25  ;;  %v6729_v30 = vmul.f32 1.6666666, %v1996_v23  ;;  %vm1964_vm5 = vcmp.eq.f32.partialorder %v1963_v6, 8.507059e+37 }
 0x485   :  { %v4751_v1 = vpop.eup %4750  ;;  %v1943_v61 = vadd.f32 %v4749_v37, %v1942_v34 }
 0x486   :  { %v4753_v51 = vpop.eup %4752  ;;  %v1743_v14 = vadd.f32 1.0, %v4751_v1  ;;  %v4477_v1 = vld [vmem:[%s7197_s8 + $0x50] sm:$0xff] }
 0x487   :  { %v1947_v18 = vsel %vm1946_vm12, %v4749_v37, %v1943_v61  ;;  %v1955_v8 = vmul.f32 %v4753_v51, %v1742_v4  ;;  %vm1960_vm1 = vweird.f32 %v4753_v51 }
 0x488   :  { %v1952_v54 = vsel %vm1949_vm3, %v1951_v0, %v1947_v18  ;;  %4754 = vrcp.f32 %v1743_v14  ;;  %vm1961_vm4 = vmor %vm1959_vm9, %vm1960_vm1  ;;  %v1980_v53 = vand.u32 2147483648, %v1743_v14  ;;  %v1978_v9 = vand.u32 2147483647, %v1743_v14 }
 0x489   :  { %v1997_v27 = vmul.f32 %v1952_v54, %v6689_v58  ;;  %v1956_v36 = vsub.f32 1.0, %v1955_v8  ;;  %vm1974_vm7 = vweird.f32 %v1743_v14 }
 0x48a   :  { %v1981_v26 = vor.u32 1.1754944e-38, %v1980_v53  ;;  %vm1979_vm15 = vcmp.eq.f32.partialorder %v1978_v9, 8.507059e+37 }
 0x48b   :  { %v6731_v2 = vmul.f32 1.6666666, %v1997_v27  ;;  %v1957_v55 = vmul.f32 %v4753_v51, %v1956_v36 }
 0x48d   :  { %v1958_v46 = vadd.f32 %v4753_v51, %v1957_v55  ;;  %v2055_v22 = vpack.c.bf16 %v6731_v2, %v6729_v30 }
 0x48e   :  { %v4755_v41 = vpop.eup %4754 }
 0x48f   :  { %v1970_v15 = vmul.f32 %v4755_v41, %v1743_v14  ;;  %2143 = vmatmul.bf16.gmra.mxu2 %v2055_v22  ;;  %v1962_v58 = vsel %vm1961_vm4, %v4753_v51, %v1958_v46  ;;  %vm1975_vm6 = vweird.f32 %v4755_v41 }
 0x490   :  { %v1967_v19 = vsel %vm1964_vm5, %v1966_v3, %v1962_v58  ;;  %vm1976_vm13 = vmor %vm1974_vm7, %vm1975_vm6 }
 0x491   :  { %v1971_v13 = vsub.f32 1.0, %v1970_v15  ;;  %v1998_v29 = vmul.f32 %v1967_v19, %v6697_v31  ;;  %v4478_v31 = vld [vmem:[%s7197_s8 + $0x58] sm:$0xff] }
 0x492   :  { %2550 = vmatpush.bf16.msra.mxu3 %v4478_v31 }
 0x493   :  { %v1972_v45 = vmul.f32 %v4755_v41, %v1971_v13  ;;  %v6737_v40 = vmul.f32 1.6666666, %v1998_v29 }
 0x495   :  { %v1973_v11 = vadd.f32 %v4755_v41, %v1972_v45 }
 0x496   :  { %2551 = vmatpush.bf16.msra.mxu3 %v4477_v1 }
 0x497   :  { %v1977_v52 = vsel %vm1976_vm13, %v4755_v41, %v1973_v11 }
 0x498   :  { %v1982_v5 = vsel %vm1979_vm15, %v1981_v26, %v1977_v52 }
 0x499   :  { %v1999_v56 = vmul.f32 %v1982_v5, %v6710_v43 }
 0x49a   :  { %2552 = vmatpush.bf16.msra.mxu3 %v4476_v7 }
 0x49b   :  { %v6739_v20 = vmul.f32 1.6666666, %v1999_v56 }
 0x49d   :  { %v2056_v39 = vpack.c.bf16 %v6739_v20, %v6737_v40 }
 0x49f   :  { %2148 = vmatmul.bf16.gmra.mxu2 %v2056_v39 }
 0x4b2   :  { %v2114_v37 = vpop.f32.mrf.mxu2 }
 0x4b3   :  { %v4235_v24 = vmul.f32 -1.442695, %v2114_v37 }
 0x4b5   :  { %4756 = vpow2.f32 %v4235_v24 }
 0x4ba   :  { %v2116_v4 = vpop.f32.mrf.mxu2 }
 0x4bb   :  { %v4757_v48 = vpop.eup %4756  ;;  %v4236_v16 = vmul.f32 -1.442695, %v2116_v4 }
 0x4bc   :  { %v2202_v59 = vadd.f32 1.0, %v4757_v48  ;;  %v4475_v48 = vld [vmem:[%s7197_s8 + $0x40] sm:$0xff] }
 0x4bd   :  { %4758 = vpow2.f32 %v4236_v16  ;;  %2553 = vmatpush.bf16.msra.mxu3 %v4475_v48 }
 0x4be   :  { %4760 = vrcp.f32 %v2202_v59  ;;  %v2229_v23 = vand.u32 2147483648, %v2202_v59  ;;  %vm2223_vm10 = vweird.f32 %v2202_v59  ;;  %v2227_v8 = vand.u32 2147483647, %v2202_v59 }
 0x4c0   :  { %v2230_v55 = vor.u32 1.1754944e-38, %v2229_v23  ;;  %vm2228_vm11 = vcmp.eq.f32.partialorder %v2227_v8, 8.507059e+37 }
 0x4c2   :  { %v6746_v43 = vpop.f32.mrf.mxu2 }
 0x4c3   :  { %v4759_v25 = vpop.eup %4758  ;;  %v4237_v17 = vmul.f32 -1.442695, %v6746_v43 }
 0x4c4   :  { %v4761_v60 = vpop.eup %4760  ;;  %v2203_v50 = vadd.f32 1.0, %v4759_v25 }
 0x4c5   :  { %v2219_v34 = vmul.f32 %v4761_v60, %v2202_v59  ;;  %4762 = vpow2.f32 %v4237_v17  ;;  %vm2224_vm2 = vweird.f32 %v4761_v60 }
 0x4c6   :  { %4764 = vrcp.f32 %v2203_v50  ;;  %vm2225_vm8 = vmor %vm2223_vm10, %vm2224_vm2  ;;  %v2242_v46 = vand.u32 2147483647, %v2203_v50  ;;  %v2244_v22 = vand.u32 2147483648, %v2203_v50  ;;  %vm2238_vm0 = vweird.f32 %v2203_v50 }
 0x4c7   :  { %v2220_v42 = vsub.f32 1.0, %v2219_v34 }
 0x4c8   :  { %vm2243_vm3 = vcmp.eq.f32.partialorder %v2242_v46, 8.507059e+37  ;;  %v2245_v45 = vor.u32 1.1754944e-38, %v2244_v22 }
 0x4c9   :  { %v2221_v28 = vmul.f32 %v4761_v60, %v2220_v42 }
 0x4ca   :  { %v6752_v61 = vpop.f32.mrf.mxu2 }
 0x4cb   :  { %v4763_v63 = vpop.eup %4762  ;;  %v2222_v51 = vadd.f32 %v4761_v60, %v2221_v28  ;;  %v4238_v0 = vmul.f32 -1.442695, %v6752_v61 }
 0x4cc   :  { %v4765_v14 = vpop.eup %4764  ;;  %v2204_v18 = vadd.f32 1.0, %v4763_v63 }
 0x4cd   :  { %v2234_v54 = vmul.f32 %v4765_v14, %v2203_v50  ;;  %4766 = vpow2.f32 %v4238_v0  ;;  %v2226_v27 = vsel %vm2225_vm8, %v4761_v60, %v2222_v51  ;;  %vm2239_vm14 = vweird.f32 %v4765_v14 }
 0x4ce   :  { %4768 = vrcp.f32 %v2204_v18  ;;  %v2231_v6 = vsel %vm2228_vm11, %v2230_v55, %v2226_v27  ;;  %vm2240_vm12 = vmor %vm2238_vm0, %vm2239_vm14  ;;  %v2259_v60 = vand.u32 2147483648, %v2204_v18  ;;  %vm2253_vm9 = vweird.f32 %v2204_v18 }
 0x4cf   :  { %v2235_v36 = vsub.f32 1.0, %v2234_v54  ;;  %v2458_v19 = vmul.f32 %v2231_v6, %v2114_v37  ;;  %v2257_v50 = vand.u32 2147483647, %v2204_v18 }
 0x4d0   :  { %v2260_v1 = vor.u32 1.1754944e-38, %v2259_v60 }
 0x4d1   :  { %v2236_v41 = vmul.f32 %v4765_v14, %v2235_v36  ;;  %v2474_v56 = vmul.f32 1.6666666, %v2458_v19  ;;  %vm2258_vm5 = vcmp.eq.f32.partialorder %v2257_v50, 8.507059e+37 }
 0x4d2   :  { %v6758_v15 = vpop.f32.mrf.mxu2 }
 0x4d3   :  { %v4767_v58 = vpop.eup %4766  ;;  %v2237_v13 = vadd.f32 %v4765_v14, %v2236_v41  ;;  %v4239_v3 = vmul.f32 -1.442695, %v6758_v15 }
 0x4d4   :  { %v4769_v53 = vpop.eup %4768  ;;  %v2205_v9 = vadd.f32 1.0, %v4767_v58 }
 0x4d5   :  { %v2241_v11 = vsel %vm2240_vm12, %v4765_v14, %v2237_v13  ;;  %v2249_v26 = vmul.f32 %v4769_v53, %v2204_v18  ;;  %4770 = vpow2.f32 %v4239_v3  ;;  %vm2254_vm1 = vweird.f32 %v4769_v53 }
 0x4d6   :  { %v2246_v29 = vsel %vm2243_vm3, %v2245_v45, %v2241_v11  ;;  %4772 = vrcp.f32 %v2205_v9  ;;  %vm2255_vm4 = vmor %vm2253_vm9, %vm2254_vm1  ;;  %v2272_v63 = vand.u32 2147483647, %v2205_v9  ;;  %v2274_v51 = vand.u32 2147483648, %v2205_v9 }
 0x4d7   :  { %v2459_v52 = vmul.f32 %v2246_v29, %v2116_v4  ;;  %v2250_v5 = vsub.f32 1.0, %v2249_v26  ;;  %vm2268_vm7 = vweird.f32 %v2205_v9 }
 0x4d8   :  { %vm2273_vm15 = vcmp.eq.f32.partialorder %v2272_v63, 8.507059e+37  ;;  %v2275_v36 = vor.u32 1.1754944e-38, %v2274_v51 }
 0x4d9   :  { %v2475_v39 = vmul.f32 1.6666666, %v2459_v52  ;;  %v2251_v24 = vmul.f32 %v4769_v53, %v2250_v5 }
 0x4da   :  { %v6764_v16 = vpop.f32.mrf.mxu2 }
 0x4db   :  { %v4771_v31 = vpop.eup %4770  ;;  %v2490_v59 = vpack.c.bf16 %v2475_v39, %v2474_v56  ;;  %v2252_v25 = vadd.f32 %v4769_v53, %v2251_v24  ;;  %v4240_v37 = vmul.f32 -1.442695, %v6764_v16 }
 0x4dc   :  { %v4773_v17 = vpop.eup %4772  ;;  %v2206_v4 = vadd.f32 1.0, %v4771_v31 }
 0x4dd   :  { %v2264_v34 = vmul.f32 %v4773_v17, %v2205_v9  ;;  %4774 = vpow2.f32 %v4240_v37  ;;  %2554 = vmatmul.bf16.vlgmr.msra.gmra.mxu3 %v2490_v59  ;;  %v2256_v42 = vsel %vm2255_vm4, %v4769_v53, %v2252_v25  ;;  %vm2269_vm6 = vweird.f32 %v4773_v17 }
 0x4de   :  { %4776 = vrcp.f32 %v2206_v4  ;;  %v2261_v14 = vsel %vm2258_vm5, %v2260_v1, %v2256_v42  ;;  %vm2270_vm13 = vmor %vm2268_vm7, %vm2269_vm6  ;;  %v2289_v29 = vand.u32 2147483648, %v2206_v4  ;;  %vm2283_vm10 = vweird.f32 %v2206_v4 }
 0x4df   :  { %v2265_v28 = vsub.f32 1.0, %v2264_v34  ;;  %v2460_v46 = vmul.f32 %v2261_v14, %v6746_v43  ;;  %v2287_v5 = vand.u32 2147483647, %v2206_v4 }
 0x4e0   :  { %v2290_v24 = vor.u32 1.1754944e-38, %v2289_v29 }
 0x4e1   :  { %v2266_v0 = vmul.f32 %v4773_v17, %v2265_v28  ;;  %v2476_v13 = vmul.f32 1.6666666, %v2460_v46  ;;  %vm2288_vm11 = vcmp.eq.f32.partialorder %v2287_v5, 8.507059e+37 }
 0x4e2   :  { %v6767_v23 = vpop.f32.mrf.mxu2 }
 0x4e3   :  { %v4775_v8 = vpop.eup %4774  ;;  %v2267_v54 = vadd.f32 %v4773_v17, %v2266_v0  ;;  %v4241_v18 = vmul.f32 -1.442695, %v6767_v23 }
 0x4e4   :  { %v4777_v27 = vpop.eup %4776  ;;  %v2207_v55 = vadd.f32 1.0, %v4775_v8 }
 0x4e5   :  { %v2271_v22 = vsel %vm2270_vm13, %v4773_v17, %v2267_v54  ;;  %v2279_v41 = vmul.f32 %v4777_v27, %v2206_v4  ;;  %4778 = vpow2.f32 %v4241_v18  ;;  %vm2284_vm2 = vweird.f32 %v4777_v27 }
 0x4e6   :  { %v2276_v7 = vsel %vm2273_vm15, %v2275_v36, %v2271_v22  ;;  %4780 = vrcp.f32 %v2207_v55  ;;  %vm2285_vm8 = vmor %vm2283_vm10, %vm2284_vm2  ;;  %v2302_v48 = vand.u32 2147483647, %v2207_v55  ;;  %v2304_v31 = vand.u32 2147483648, %v2207_v55 }
 0x4e7   :  { %v2461_v6 = vmul.f32 %v2276_v7, %v6752_v61  ;;  %v2280_v58 = vsub.f32 1.0, %v2279_v41  ;;  %vm2298_vm0 = vweird.f32 %v2207_v55 }
 0x4e8   :  { %vm2303_vm3 = vcmp.eq.f32.partialorder %v2302_v48, 8.507059e+37  ;;  %v2305_v34 = vor.u32 1.1754944e-38, %v2304_v31 }
 0x4e9   :  { %v2477_v3 = vmul.f32 1.6666666, %v2461_v6  ;;  %v2281_v53 = vmul.f32 %v4777_v27, %v2280_v58 }
 0x4ea   :  { %v6772_v45 = vpop.f32.mrf.mxu2 }
 0x4eb   :  { %v4779_v9 = vpop.eup %4778  ;;  %v2282_v19 = vadd.f32 %v4777_v27, %v2281_v53  ;;  %v4242_v11 = vmul.f32 -1.442695, %v6772_v45  ;;  %v2491_v26 = vpack.c.bf16 %v2477_v3, %v2476_v13 }
 0x4ec   :  { %v4781_v43 = vpop.eup %4780  ;;  %v2208_v52 = vadd.f32 1.0, %v4779_v9 }
 0x4ed   :  { %v2294_v56 = vmul.f32 %v4781_v43, %v2207_v55  ;;  %4782 = vpow2.f32 %v4242_v11  ;;  %2559 = vmatmul.bf16.gmra.mxu3 %v2491_v26  ;;  %v2286_v61 = vsel %vm2285_vm8, %v4777_v27, %v2282_v19  ;;  %vm2299_vm14 = vweird.f32 %v4781_v43 }
 0x4ee   :  { %4784 = vrcp.f32 %v2208_v52  ;;  %v2291_v25 = vsel %vm2288_vm11, %v2290_v24, %v2286_v61  ;;  %vm2300_vm12 = vmor %vm2298_vm0, %vm2299_vm14  ;;  %v2319_v41 = vand.u32 2147483648, %v2208_v52  ;;  %vm2313_vm9 = vweird.f32 %v2208_v52 }
 0x4ef   :  { %v2295_v39 = vsub.f32 1.0, %v2294_v56  ;;  %v2462_v28 = vmul.f32 %v2291_v25, %v6758_v15  ;;  %v2317_v6 = vand.u32 2147483647, %v2208_v52 }
 0x4f0   :  { %v2320_v3 = vor.u32 1.1754944e-38, %v2319_v41 }
 0x4f1   :  { %v2296_v59 = vmul.f32 %v4781_v43, %v2295_v39  ;;  %v2478_v8 = vmul.f32 1.6666666, %v2462_v28  ;;  %vm2318_vm5 = vcmp.eq.f32.partialorder %v2317_v6, 8.507059e+37 }
 0x4f2   :  { %v6775_v37 = vpop.f32.mrf.mxu2 }
 0x4f3   :  { %v4783_v17 = vpop.eup %4782  ;;  %v2297_v60 = vadd.f32 %v4781_v43, %v2296_v59  ;;  %v4243_v4 = vmul.f32 -1.442695, %v6775_v37 }
 0x4f4   :  { %v4785_v50 = vpop.eup %4784  ;;  %v2209_v42 = vadd.f32 1.0, %v4783_v17 }
 0x4f5   :  { %v2301_v1 = vsel %vm2300_vm12, %v4781_v43, %v2297_v60  ;;  %v2309_v63 = vmul.f32 %v4785_v50, %v2208_v52  ;;  %4786 = vpow2.f32 %v4243_v4  ;;  %vm2314_vm1 = vweird.f32 %v4785_v50 }
 0x4f6   :  { %v2306_v51 = vsel %vm2303_vm3, %v2305_v34, %v2301_v1  ;;  %4788 = vrcp.f32 %v2209_v42  ;;  %vm2315_vm4 = vmor %vm2313_vm9, %vm2314_vm1  ;;  %v2332_v53 = vand.u32 2147483647, %v2209_v42  ;;  %v2334_v9 = vand.u32 2147483648, %v2209_v42 }
 0x4f7   :  { %v2463_v0 = vmul.f32 %v2306_v51, %v6764_v16  ;;  %v2310_v14 = vsub.f32 1.0, %v2309_v63  ;;  %vm2328_vm7 = vweird.f32 %v2209_v42 }
 0x4f8   :  { %vm2333_vm15 = vcmp.eq.f32.partialorder %v2332_v53, 8.507059e+37  ;;  %v2335_v56 = vor.u32 1.1754944e-38, %v2334_v9 }
 0x4f9   :  { %v2479_v54 = vmul.f32 1.6666666, %v2463_v0  ;;  %v2311_v18 = vmul.f32 %v4785_v50, %v2310_v14 }
 0x4fa   :  { %v6780_v27 = vpop.f32.mrf.mxu2 }
 0x4fb   :  { %v4787_v36 = vpop.eup %4786  ;;  %v2312_v55 = vadd.f32 %v4785_v50, %v2311_v18  ;;  %v4244_v46 = vmul.f32 -1.442695, %v6780_v27  ;;  %v2492_v22 = vpack.c.bf16 %v2479_v54, %v2478_v8 }
 0x4fc   :  { %v4789_v15 = vpop.eup %4788  ;;  %v2210_v7 = vadd.f32 1.0, %v4787_v36 }
 0x4fd   :  { %v2324_v58 = vmul.f32 %v4789_v15, %v2209_v42  ;;  %4790 = vpow2.f32 %v4244_v46  ;;  %2564 = vmatmul.bf16.gmra.mxu3 %v2492_v22  ;;  %v2316_v16 = vsel %vm2315_vm4, %v4785_v50, %v2312_v55  ;;  %vm2329_vm6 = vweird.f32 %v4789_v15 }
 0x4fe   :  { %4792 = vrcp.f32 %v2210_v7  ;;  %v2321_v11 = vsel %vm2318_vm5, %v2320_v3, %v2316_v16  ;;  %vm2330_vm13 = vmor %vm2328_vm7, %vm2329_vm6  ;;  %v2349_v63 = vand.u32 2147483648, %v2210_v7  ;;  %vm2343_vm10 = vweird.f32 %v2210_v7 }
 0x4ff   :  { %v2325_v13 = vsub.f32 1.0, %v2324_v58  ;;  %v2464_v39 = vmul.f32 %v2321_v11, %v6767_v23  ;;  %v2347_v0 = vand.u32 2147483647, %v2210_v7 }
 0x500   :  { %v2350_v54 = vor.u32 1.1754944e-38, %v2349_v63 }
 0x501   :  { %v2326_v19 = vmul.f32 %v4789_v15, %v2325_v13  ;;  %v2480_v17 = vmul.f32 1.6666666, %v2464_v39  ;;  %vm2348_vm11 = vcmp.eq.f32.partialorder %v2347_v0, 8.507059e+37 }
 0x502   :  { %v6783_v26 = vpop.f32.mrf.mxu2 }
 0x503   :  { %v4791_v43 = vpop.eup %4790  ;;  %v2327_v29 = vadd.f32 %v4789_v15, %v2326_v19  ;;  %v4245_v52 = vmul.f32 -1.442695, %v6783_v26 }
 0x504   :  { %v4793_v5 = vpop.eup %4792  ;;  %v2211_v61 = vadd.f32 1.0, %v4791_v43 }
 0x505   :  { %v2331_v24 = vsel %vm2330_vm13, %v4789_v15, %v2327_v29  ;;  %v2339_v48 = vmul.f32 %v4793_v5, %v2210_v7  ;;  %4794 = vpow2.f32 %v4245_v52  ;;  %vm2344_vm2 = vweird.f32 %v4793_v5 }
 0x506   :  { %v2336_v31 = vsel %vm2333_vm15, %v2335_v56, %v2331_v24  ;;  %4796 = vrcp.f32 %v2211_v61  ;;  %vm2345_vm8 = vmor %vm2343_vm10, %vm2344_vm2  ;;  %v2362_v18 = vand.u32 2147483647, %v2211_v61  ;;  %v2364_v36 = vand.u32 2147483648, %v2211_v61 }
 0x507   :  { %v2465_v59 = vmul.f32 %v2336_v31, %v6772_v45  ;;  %v2340_v25 = vsub.f32 1.0, %v2339_v48  ;;  %vm2358_vm0 = vweird.f32 %v2211_v61 }
 0x508   :  { %vm2363_vm3 = vcmp.eq.f32.partialorder %v2362_v18, 8.507059e+37  ;;  %v2365_v58 = vor.u32 1.1754944e-38, %v2364_v36 }
 0x509   :  { %v2481_v60 = vmul.f32 1.6666666, %v2465_v59  ;;  %v2341_v4 = vmul.f32 %v4793_v5, %v2340_v25 }
 0x50a   :  { %v6788_v50 = vpop.f32.mrf.mxu2 }
 0x50b   :  { %v4795_v34 = vpop.eup %4794  ;;  %v2342_v42 = vadd.f32 %v4793_v5, %v2341_v4  ;;  %v4246_v28 = vmul.f32 -1.442695, %v6788_v50  ;;  %v2493_v1 = vpack.c.bf16 %v2481_v60, %v2480_v17 }
 0x50c   :  { %v4797_v23 = vpop.eup %4796  ;;  %v2212_v51 = vadd.f32 1.0, %v4795_v34 }
 0x50d   :  { %v2354_v14 = vmul.f32 %v4797_v23, %v2211_v61  ;;  %4798 = vpow2.f32 %v4246_v28  ;;  %2569 = vmatmul.bf16.gmra.mxu3 %v2493_v1  ;;  %v2346_v45 = vsel %vm2345_vm8, %v4793_v5, %v2342_v42  ;;  %vm2359_vm14 = vweird.f32 %v4797_v23 }
 0x50e   :  { %4800 = vrcp.f32 %v2212_v51  ;;  %v2351_v46 = vsel %vm2348_vm11, %v2350_v54, %v2346_v45  ;;  %vm2360_vm12 = vmor %vm2358_vm0, %vm2359_vm14  ;;  %v2379_v48 = vand.u32 2147483648, %v2212_v51  ;;  %vm2373_vm9 = vweird.f32 %v2212_v51 }
 0x50f   :  { %v2355_v8 = vsub.f32 1.0, %v2354_v14  ;;  %v2466_v13 = vmul.f32 %v2351_v46, %v6775_v37  ;;  %v2377_v59 = vand.u32 2147483647, %v2212_v51 }
 0x510   :  { %v2380_v60 = vor.u32 1.1754944e-38, %v2379_v48 }
 0x511   :  { %v2356_v55 = vmul.f32 %v4797_v23, %v2355_v8  ;;  %v2482_v43 = vmul.f32 1.6666666, %v2466_v13  ;;  %vm2378_vm5 = vcmp.eq.f32.partialorder %v2377_v59, 8.507059e+37 }
 0x512   :  { %v6791_v22 = vpop.f32.mrf.mxu2 }
 0x513   :  { %v4799_v15 = vpop.eup %4798  ;;  %v2357_v41 = vadd.f32 %v4797_v23, %v2356_v55  ;;  %v4247_v7 = vmul.f32 -1.442695, %v6791_v22 }
 0x514   :  { %v4801_v6 = vpop.eup %4800  ;;  %v2213_v16 = vadd.f32 1.0, %v4799_v15 }
 0x515   :  { %v2361_v3 = vsel %vm2360_vm12, %v4797_v23, %v2357_v41  ;;  %v2369_v53 = vmul.f32 %v4801_v6, %v2212_v51  ;;  %4802 = vpow2.f32 %v4247_v7  ;;  %vm2374_vm1 = vweird.f32 %v4801_v6 }
 0x516   :  { %v2366_v9 = vsel %vm2363_vm3, %v2365_v58, %v2361_v3  ;;  %4804 = vrcp.f32 %v2213_v16  ;;  %vm2375_vm4 = vmor %vm2373_vm9, %vm2374_vm1  ;;  %v2392_v4 = vand.u32 2147483647, %v2213_v16  ;;  %v2394_v34 = vand.u32 2147483648, %v2213_v16 }
 0x517   :  { %v2467_v19 = vmul.f32 %v2366_v9, %v6780_v27  ;;  %v2370_v11 = vsub.f32 1.0, %v2369_v53  ;;  %vm2388_vm7 = vweird.f32 %v2213_v16 }
 0x518   :  { %vm2393_vm15 = vcmp.eq.f32.partialorder %v2392_v4, 8.507059e+37  ;;  %v2395_v14 = vor.u32 1.1754944e-38, %v2394_v34 }
 0x519   :  { %v2483_v29 = vmul.f32 1.6666666, %v2467_v19  ;;  %v2371_v52 = vmul.f32 %v4801_v6, %v2370_v11 }
 0x51a   :  { %v6796_v5 = vpop.f32.mrf.mxu2 }
 0x51b   :  { %v4803_v56 = vpop.eup %4802  ;;  %v2372_v61 = vadd.f32 %v4801_v6, %v2371_v52  ;;  %v4248_v39 = vmul.f32 -1.442695, %v6796_v5  ;;  %v2494_v24 = vpack.c.bf16 %v2483_v29, %v2482_v43  ;;  %v4489_v43 = vld [vmem:[%s7197_s8 + $0xb0] sm:$0xff] }
 0x51c   :  { %v4805_v37 = vpop.eup %4804  ;;  %v2214_v31 = vadd.f32 1.0, %v4803_v56 }
 0x51d   :  { %v2384_v25 = vmul.f32 %v4805_v37, %v2213_v16  ;;  %4806 = vpow2.f32 %v4248_v39  ;;  %2574 = vmatmul.bf16.gmra.mxu3 %v2494_v24  ;;  %v2376_v27 = vsel %vm2375_vm4, %v4801_v6, %v2372_v61  ;;  %vm2389_vm6 = vweird.f32 %v4805_v37 }
 0x51e   :  { %4808 = vrcp.f32 %v2214_v31  ;;  %v2381_v28 = vsel %vm2378_vm5, %v2380_v60, %v2376_v27  ;;  %vm2390_vm13 = vmor %vm2388_vm7, %vm2389_vm6  ;;  %v2409_v9 = vand.u32 2147483648, %v2214_v31  ;;  %vm2403_vm10 = vweird.f32 %v2214_v31 }
 0x51f   :  { %v2385_v17 = vsub.f32 1.0, %v2384_v25  ;;  %v2468_v8 = vmul.f32 %v2381_v28, %v6783_v26  ;;  %v4490_v26 = vld [vmem:[%s7197_s8 + $0xb8] sm:$0xff] }
 0x520   :  { %3053 = vmatpush.bf16.msra.mxu0 %v4490_v26  ;;  %v2410_v56 = vor.u32 1.1754944e-38, %v2409_v9 }
 0x521   :  { %v2386_v42 = vmul.f32 %v4805_v37, %v2385_v17  ;;  %v2484_v15 = vmul.f32 1.6666666, %v2468_v8 }
 0x522   :  { %v6799_v1 = vpop.f32.mrf.mxu2 }
 0x523   :  { %v4807_v23 = vpop.eup %4806  ;;  %v2387_v63 = vadd.f32 %v4805_v37, %v2386_v42  ;;  %v4249_v51 = vmul.f32 -1.442695, %v6799_v1 }
 0x524   :  { %v4809_v0 = vpop.eup %4808  ;;  %v2215_v45 = vadd.f32 1.0, %v4807_v23  ;;  %3054 = vmatpush.bf16.msra.mxu0 %v4489_v43 }
 0x525   :  { %v2391_v54 = vsel %vm2390_vm13, %v4805_v37, %v2387_v63  ;;  %v2399_v18 = vmul.f32 %v4809_v0, %v2214_v31  ;;  %4810 = vpow2.f32 %v4249_v51  ;;  %vm2404_vm2 = vweird.f32 %v4809_v0  ;;  %v4488_v37 = vld [vmem:[%s7197_s8 + $0xa8] sm:$0xff] }
 0x526   :  { %v2396_v36 = vsel %vm2393_vm15, %v2395_v14, %v2391_v54  ;;  %4812 = vrcp.f32 %v2215_v45  ;;  %vm2405_vm8 = vmor %vm2403_vm10, %vm2404_vm2  ;;  %v2424_v61 = vand.u32 2147483648, %v2215_v45  ;;  %v2422_v24 = vand.u32 2147483647, %v2215_v45 }
 0x527   :  { %v2469_v55 = vmul.f32 %v2396_v36, %v6788_v50  ;;  %v2400_v46 = vsub.f32 1.0, %v2399_v18  ;;  %v2407_v50 = vand.u32 2147483647, %v2214_v31  ;;  %vm2418_vm0 = vweird.f32 %v2215_v45 }
 0x528   :  { %v2425_v27 = vor.u32 1.1754944e-38, %v2424_v61  ;;  %vm2423_vm3 = vcmp.eq.f32.partialorder %v2422_v24, 8.507059e+37  ;;  %3055 = vmatpush.bf16.msra.mxu0 %v4488_v37 }
 0x529   :  { %v2485_v41 = vmul.f32 1.6666666, %v2469_v55  ;;  %v2401_v7 = vmul.f32 %v4809_v0, %v2400_v46  ;;  %vm2408_vm11 = vcmp.eq.f32.partialorder %v2407_v50, 8.507059e+37 }
 0x52a   :  { %v6804_v6 = vpop.f32.mrf.mxu2 }
 0x52b   :  { %v4811_v58 = vpop.eup %4810  ;;  %v2402_v16 = vadd.f32 %v4809_v0, %v2401_v7  ;;  %v4250_v13 = vmul.f32 -1.442695, %v6804_v6  ;;  %v2495_v3 = vpack.c.bf16 %v2485_v41, %v2484_v15 }
 0x52c   :  { %v4813_v53 = vpop.eup %4812  ;;  %v2216_v19 = vadd.f32 1.0, %v4811_v58 }
 0x52d   :  { %v2414_v11 = vmul.f32 %v4813_v53, %v2215_v45  ;;  %4814 = vpow2.f32 %v4250_v13  ;;  %2579 = vmatmul.bf16.gmra.mxu3 %v2495_v3  ;;  %v2406_v29 = vsel %vm2405_vm8, %v4809_v0, %v2402_v16  ;;  %vm2419_vm14 = vweird.f32 %v4813_v53 }
 0x52e   :  { %4816 = vrcp.f32 %v2216_v19  ;;  %v2411_v48 = vsel %vm2408_vm11, %v2410_v56, %v2406_v29  ;;  %vm2420_vm12 = vmor %vm2418_vm0, %vm2419_vm14  ;;  %v2439_v54 = vand.u32 2147483648, %v2216_v19  ;;  %vm2433_vm9 = vweird.f32 %v2216_v19  ;;  %v4487_v29 = vld [vmem:[%s7197_s8 + $0xa0] sm:$0xff] }
 0x52f   :  { %v2415_v52 = vsub.f32 1.0, %v2414_v11  ;;  %v2470_v60 = vmul.f32 %v2411_v48, %v6791_v22  ;;  %v2437_v18 = vand.u32 2147483647, %v2216_v19  ;;  %3056 = vmatpush.bf16.msra.mxu0 %v4487_v29 }
 0x530   :  { %v2440_v46 = vor.u32 1.1754944e-38, %v2439_v54 }
 0x531   :  { %v2416_v39 = vmul.f32 %v4813_v53, %v2415_v52  ;;  %v2486_v63 = vmul.f32 1.6666666, %v2470_v60  ;;  %vm2438_vm5 = vcmp.eq.f32.partialorder %v2437_v18, 8.507059e+37 }
 0x533   :  { %v4815_v31 = vpop.eup %4814  ;;  %v2417_v59 = vadd.f32 %v4813_v53, %v2416_v39 }
 0x534   :  { %v4817_v25 = vpop.eup %4816  ;;  %v2217_v17 = vadd.f32 1.0, %v4815_v31 }
 0x535   :  { %v2421_v4 = vsel %vm2420_vm12, %v4813_v53, %v2417_v59  ;;  %v2429_v34 = vmul.f32 %v4817_v25, %v2216_v19  ;;  %vm2434_vm1 = vweird.f32 %v4817_v25  ;;  %v4486_v59 = vld [vmem:[%s7197_s8 + $0x98] sm:$0xff] }
 0x536   :  { %v2426_v42 = vsel %vm2423_vm3, %v2425_v27, %v2421_v4  ;;  %4818 = vrcp.f32 %v2217_v17  ;;  %vm2435_vm4 = vmor %vm2433_vm9, %vm2434_vm1  ;;  %v2454_v15 = vand.u32 2147483648, %v2217_v17  ;;  %v2452_v41 = vand.u32 2147483647, %v2217_v17  ;;  %3057 = vmatpush.bf16.msra.mxu0 %v4486_v59  ;;  %v4484_v59 = vld [vmem:[%s7197_s8 + $0x88] sm:$0xff] }
 0x537   :  { %v2471_v28 = vmul.f32 %v2426_v42, %v6796_v5  ;;  %v2430_v23 = vsub.f32 1.0, %v2429_v34  ;;  %vm2448_vm7 = vweird.f32 %v2217_v17 }
 0x538   :  { %v2455_v16 = vor.u32 1.1754944e-38, %v2454_v15  ;;  %vm2453_vm15 = vcmp.eq.f32.partialorder %v2452_v41, 8.507059e+37 }
 0x539   :  { %v2487_v51 = vmul.f32 1.6666666, %v2471_v28  ;;  %v2431_v0 = vmul.f32 %v4817_v25, %v2430_v23 }
 0x53b   :  { %v2432_v14 = vadd.f32 %v4817_v25, %v2431_v0  ;;  %v2496_v45 = vpack.c.bf16 %v2487_v51, %v2486_v63 }
 0x53c   :  { %v4819_v8 = vpop.eup %4818 }
 0x53d   :  { %v2444_v22 = vmul.f32 %v4819_v8, %v2217_v17  ;;  %2584 = vmatmul.bf16.gmra.mxu3 %v2496_v45  ;;  %v2436_v36 = vsel %vm2435_vm4, %v4817_v25, %v2432_v14  ;;  %vm2449_vm6 = vweird.f32 %v4819_v8 }
 0x53e   :  { %v2441_v7 = vsel %vm2438_vm5, %v2440_v46, %v2436_v36  ;;  %vm2450_vm13 = vmor %vm2448_vm7, %vm2449_vm6 }
 0x53f   :  { %v2445_v55 = vsub.f32 1.0, %v2444_v22  ;;  %v2472_v13 = vmul.f32 %v2441_v7, %v6799_v1 }
 0x541   :  { %v2446_v5 = vmul.f32 %v4819_v8, %v2445_v55  ;;  %v2488_v9 = vmul.f32 1.6666666, %v2472_v13 }
 0x543   :  { %v2447_v58 = vadd.f32 %v4819_v8, %v2446_v5 }
 0x545   :  { %v2451_v3 = vsel %vm2450_vm13, %v4819_v8, %v2447_v58 }
 0x546   :  { %v2456_v26 = vsel %vm2453_vm15, %v2455_v16, %v2451_v3 }
 0x547   :  { %v2473_v53 = vmul.f32 %v2456_v26, %v6804_v6 }
 0x549   :  { %v2489_v19 = vmul.f32 1.6666666, %v2473_v53 }
 0x54b   :  { %v2497_v50 = vpack.c.bf16 %v2489_v19, %v2488_v9  ;;  %v4485_v9 = vld [vmem:[%s7197_s8 + $0x90] sm:$0xff] }
 0x54c   :  { %3058 = vmatpush.bf16.msra.mxu0 %v4485_v9 }
 0x54d   :  { %2589 = vmatmul.bf16.gmra.mxu3 %v2497_v50 }
 0x550   :  { %3059 = vmatpush.bf16.msra.mxu0 %v4484_v59 }
 0x560   :  { %v2555_v11 = vpop.f32.mrf.mxu3 }
 0x561   :  { %v4283_v43 = vmul.f32 -1.442695, %v2555_v11 }
 0x563   :  { %4820 = vpow2.f32 %v4283_v43 }
 0x568   :  { %v2557_v52 = vpop.f32.mrf.mxu3 }
 0x569   :  { %v4821_v56 = vpop.eup %4820  ;;  %v4284_v1 = vmul.f32 -1.442695, %v2557_v52 }
 0x56a   :  { %v2643_v61 = vadd.f32 1.0, %v4821_v56 }
 0x56b   :  { %4822 = vpow2.f32 %v4284_v1 }
 0x56c   :  { %4824 = vrcp.f32 %v2643_v61  ;;  %v2670_v28 = vand.u32 2147483648, %v2643_v61  ;;  %vm2664_vm10 = vweird.f32 %v2643_v61  ;;  %v2668_v63 = vand.u32 2147483647, %v2643_v61 }
 0x56e   :  { %v2671_v45 = vor.u32 1.1754944e-38, %v2670_v28  ;;  %vm2669_vm11 = vcmp.eq.f32.partialorder %v2668_v63, 8.507059e+37 }
 0x570   :  { %v6823_v39 = vpop.f32.mrf.mxu3 }
 0x571   :  { %v4823_v6 = vpop.eup %4822  ;;  %v4285_v24 = vmul.f32 -1.442695, %v6823_v39 }
 0x572   :  { %v4825_v37 = vpop.eup %4824  ;;  %v2644_v48 = vadd.f32 1.0, %v4823_v6 }
 0x573   :  { %v2660_v31 = vmul.f32 %v4825_v37, %v2643_v61  ;;  %4826 = vpow2.f32 %v4285_v24  ;;  %vm2665_vm2 = vweird.f32 %v4825_v37 }
 0x574   :  { %4828 = vrcp.f32 %v2644_v48  ;;  %vm2666_vm8 = vmor %vm2664_vm10, %vm2665_vm2  ;;  %v2685_v8 = vand.u32 2147483648, %v2644_v48  ;;  %v2683_v18 = vand.u32 2147483647, %v2644_v48  ;;  %vm2679_vm0 = vweird.f32 %v2644_v48 }
 0x575   :  { %v2661_v25 = vsub.f32 1.0, %v2660_v31 }
 0x576   :  { %v2686_v41 = vor.u32 1.1754944e-38, %v2685_v8  ;;  %vm2684_vm3 = vcmp.eq.f32.partialorder %v2683_v18, 8.507059e+37 }
 0x577   :  { %v2662_v27 = vmul.f32 %v4825_v37, %v2661_v25 }
 0x578   :  { %v6829_v17 = vpop.f32.mrf.mxu3 }
 0x579   :  { %v4827_v60 = vpop.eup %4826  ;;  %v2663_v4 = vadd.f32 %v4825_v37, %v2662_v27  ;;  %v4286_v34 = vmul.f32 -1.442695, %v6829_v17 }
 0x57a   :  { %v4829_v42 = vpop.eup %4828  ;;  %v6832_v23 = vadd.f32 1.0, %v4827_v60 }
 0x57b   :  { %v2675_v51 = vmul.f32 %v4829_v42, %v2644_v48  ;;  %4830 = vpow2.f32 %v4286_v34  ;;  %v2667_v0 = vsel %vm2666_vm8, %v4825_v37, %v2663_v4  ;;  %vm2680_vm14 = vweird.f32 %v4829_v42 }
 0x57c   :  { %4832 = vrcp.f32 %v6832_v23  ;;  %v2672_v22 = vsel %vm2669_vm11, %v2671_v45, %v2667_v0  ;;  %vm2681_vm12 = vmor %vm2679_vm0, %vm2680_vm14  ;;  %vm2694_vm9 = vweird.f32 %v6832_v23  ;;  %v2698_v37 = vand.u32 2147483647, %v6832_v23 }
 0x57d   :  { %v2676_v14 = vsub.f32 1.0, %v2675_v51  ;;  %v2899_v58 = vmul.f32 %v2672_v22, %v2555_v11 }
 0x57e   :  { %vm2699_vm5 = vcmp.eq.f32.partialorder %v2698_v37, 8.507059e+37 }
 0x57f   :  { %v2677_v54 = vmul.f32 %v4829_v42, %v2676_v14  ;;  %v2915_v19 = vmul.f32 1.6666666, %v2899_v58 }
 0x580   :  { %v6835_v36 = vpop.f32.mrf.mxu3 }
 0x581   :  { %v4831_v55 = vpop.eup %4830  ;;  %v2678_v46 = vadd.f32 %v4829_v42, %v2677_v54  ;;  %v4287_v15 = vmul.f32 -1.442695, %v6835_v36  ;;  %v2931_v24 = vadd.f32 %v2915_v19, %v6626_v32 }
 0x582   :  { %v4833_v5 = vpop.eup %4832  ;;  %v2646_v7 = vadd.f32 1.0, %v4831_v55 }
 0x583   :  { %v2682_v16 = vsel %vm2681_vm12, %v4829_v42, %v2678_v46  ;;  %v2690_v13 = vmul.f32 %v4833_v5, %v6832_v23  ;;  %vm2695_vm1 = vweird.f32 %v4833_v5  ;;  %v4483_v42 = vld [vmem:[%s7197_s8 + $0x80] sm:$0xff]  ;;  %v6864_v28 = vmul.f32 0.70710677, %v2931_v24 }
 0x584   :  { %v2687_v3 = vsel %vm2684_vm3, %v2686_v41, %v2682_v16  ;;  %4834 = vrcp.f32 %v2646_v7  ;;  %vm6850_vm4 = vmor %vm2694_vm9, %vm2695_vm1  ;;  %v2713_v4 = vand.u32 2147483647, %v2646_v7  ;;  %v2715_v34 = vand.u32 2147483648, %v2646_v7  ;;  %3060 = vmatpush.bf16.msra.mxu0 %v4483_v42 }
 0x585   :  { %v2900_v26 = vmul.f32 %v2687_v3, %v2557_v52  ;;  %v2691_v53 = vsub.f32 1.0, %v2690_v13  ;;  %4836 = vpow2.f32 %v4287_v15  ;;  %v2700_v52 = vand.u32 2147483648, %v6832_v23 }
 0x586   :  { %vm2709_vm7 = vweird.f32 %v2646_v7  ;;  %vm2714_vm15 = vcmp.eq.f32.partialorder %v2713_v4, 8.507059e+37  ;;  %v2716_v54 = vor.u32 1.1754944e-38, %v2715_v34 }
 0x587   :  { %v2916_v50 = vmul.f32 1.6666666, %v2900_v26  ;;  %v2692_v43 = vmul.f32 %v4833_v5, %v2691_v53  ;;  %v2701_v60 = vor.u32 1.1754944e-38, %v2700_v52 }
 0x588   :  { %v6842_v29 = vpop.f32.mrf.mxu3 }
 0x589   :  { %v2932_v11 = vadd.f32 %v2916_v50, %v6628_v62  ;;  %v2693_v56 = vadd.f32 %v4833_v5, %v2692_v43  ;;  %v4288_v1 = vmul.f32 -1.442695, %v6842_v29 }
 0x58a   :  { %v4835_v61 = vpop.eup %4834 }
 0x58b   :  { %v4837_v6 = vpop.eup %4836  ;;  %v2705_v48 = vmul.f32 %v4835_v61, %v2646_v7  ;;  %4838 = vpow2.f32 %v4288_v1  ;;  %v6857_v25 = vmul.f32 0.70710677, %v2932_v11  ;;  %v2697_v32 = vsel %vm6850_vm4, %v4833_v5, %v2693_v56 }
 0x58c   :  { %v2647_v62 = vadd.f32 1.0, %v4837_v6  ;;  %vm2710_vm6 = vweird.f32 %v4835_v61  ;;  %v2702_v63 = vsel %vm2699_vm5, %v2701_v60, %v2697_v32 }
 0x58d   :  { %v2706_v27 = vsub.f32 1.0, %v2705_v48  ;;  %v2997_v0 = vpack.c.bf16 %v6857_v25, %v6864_v28  ;;  %vm2711_vm13 = vmor %vm2709_vm7, %vm2710_vm6  ;;  %v2901_v18 = vmul.f32 %v2702_v63, %v6823_v39 }
 0x58e   :  { %4840 = vrcp.f32 %v2647_v62  ;;  %vm2724_vm10 = vweird.f32 %v2647_v62  ;;  %v2730_v9 = vand.u32 2147483648, %v2647_v62  ;;  %v2728_v11 = vand.u32 2147483647, %v2647_v62 }
 0x58f   :  { %v2707_v23 = vmul.f32 %v4835_v61, %v2706_v27  ;;  %3061 = vmatmul.bf16.vlgmr.msra.gmra.mxu0 %v2997_v0  ;;  %v2917_v7 = vmul.f32 1.6666666, %v2901_v18 }
 0x590   :  { %v6866_v51 = vpop.f32.mrf.mxu3  ;;  %vm2729_vm11 = vcmp.eq.f32.partialorder %v2728_v11, 8.507059e+37 }
 0x591   :  { %v2708_v14 = vadd.f32 %v4835_v61, %v2707_v23  ;;  %v4289_v45 = vmul.f32 -1.442695, %v6866_v51  ;;  %v4839_v8 = vpop.eup %4838  ;;  %v2933_v50 = vadd.f32 %v2917_v7, %v6643_v10 }
 0x592   :  { %v2648_v55 = vadd.f32 1.0, %v4839_v8 }
 0x593   :  { %v2712_v22 = vsel %vm2711_vm13, %v4835_v61, %v2708_v14  ;;  %4842 = vpow2.f32 %v4289_v45  ;;  %v2731_v61 = vor.u32 1.1754944e-38, %v2730_v9  ;;  %v6883_v6 = vmul.f32 0.70710677, %v2933_v50 }
 0x594   :  { %v4841_v46 = vpop.eup %4840  ;;  %v2717_v15 = vsel %vm2714_vm15, %v2716_v54, %v2712_v22  ;;  %4844 = vrcp.f32 %v2648_v55  ;;  %v2745_v24 = vand.u32 2147483648, %v2648_v55  ;;  %v2743_v10 = vand.u32 2147483647, %v2648_v55 }
 0x595   :  { %v2902_v5 = vmul.f32 %v2717_v15, %v6829_v17  ;;  %v2720_v41 = vmul.f32 %v4841_v46, %v2647_v62  ;;  %vm2725_vm2 = vweird.f32 %v4841_v46  ;;  %vm2739_vm0 = vweird.f32 %v2648_v55 }
 0x596   :  { %vm2726_vm8 = vmor %vm2724_vm10, %vm2725_vm2  ;;  %v2746_v42 = vor.u32 1.1754944e-38, %v2745_v24  ;;  %vm2744_vm3 = vcmp.eq.f32.partialorder %v2743_v10, 8.507059e+37 }
 0x597   :  { %v2918_v58 = vmul.f32 1.6666666, %v2902_v5  ;;  %v2721_v16 = vsub.f32 1.0, %v2720_v41 }
 0x598   :  { %v6873_v13 = vpop.f32.mrf.mxu3 }
 0x599   :  { %v4843_v3 = vpop.eup %4842  ;;  %v2934_v26 = vadd.f32 %v2918_v58, %v6645_v49  ;;  %v2722_v53 = vmul.f32 %v4841_v46, %v2721_v16  ;;  %v4290_v39 = vmul.f32 -1.442695, %v6873_v13 }
 0x59a   :  { %v6877_v19 = vadd.f32 1.0, %v4843_v3  ;;  %v4845_v17 = vpop.eup %4844 }
 0x59b   :  { %v2723_v43 = vadd.f32 %v4841_v46, %v2722_v53  ;;  %4846 = vpow2.f32 %v4290_v39  ;;  %v2735_v56 = vmul.f32 %v4845_v17, %v2648_v55  ;;  %v6881_v1 = vmul.f32 0.70710677, %v2934_v26 }
 0x59c   :  { %4848 = vrcp.f32 %v6877_v19  ;;  %vm2740_vm14 = vweird.f32 %v4845_v17  ;;  %v2758_v41 = vand.u32 2147483647, %v6877_v19  ;;  %v2760_v7 = vand.u32 2147483648, %v6877_v19 }
 0x59d   :  { %v2727_v49 = vsel %vm2726_vm8, %v4841_v46, %v2723_v43  ;;  %v2736_v52 = vsub.f32 1.0, %v2735_v56  ;;  %v2998_v59 = vpack.c.bf16 %v6881_v1, %v6883_v6  ;;  %vm2741_vm12 = vmor %vm2739_vm0, %vm2740_vm14  ;;  %vm2754_vm9 = vweird.f32 %v6877_v19 }
 0x59e   :  { %v2732_v37 = vsel %vm2729_vm11, %v2731_v61, %v2727_v49  ;;  %vm2759_vm5 = vcmp.eq.f32.partialorder %v2758_v41, 8.507059e+37 }
 0x59f   :  { %v2737_v48 = vmul.f32 %v4845_v17, %v2736_v52  ;;  %v2903_v34 = vmul.f32 %v2732_v37, %v6835_v36  ;;  %3066 = vmatmul.bf16.gmra.mxu0 %v2998_v59 }
 0x5a0   :  { %v6885_v31 = vpop.f32.mrf.mxu3 }
 0x5a1   :  { %v4847_v62 = vpop.eup %4846  ;;  %v4291_v32 = vmul.f32 -1.442695, %v6885_v31  ;;  %v2738_v60 = vadd.f32 %v4845_v17, %v2737_v48  ;;  %v2919_v8 = vmul.f32 1.6666666, %v2903_v34 }
 0x5a2   :  { %v4849_v27 = vpop.eup %4848  ;;  %v2650_v4 = vadd.f32 1.0, %v4847_v62 }
 0x5a3   :  { %v2750_v23 = vmul.f32 %v4849_v27, %v6877_v19  ;;  %4850 = vpow2.f32 %v4291_v32  ;;  %v2742_v63 = vsel %vm2741_vm12, %v4845_v17, %v2738_v60  ;;  %vm2755_vm1 = vweird.f32 %v4849_v27 }
 0x5a4   :  { %4852 = vrcp.f32 %v2650_v4  ;;  %v2747_v0 = vsel %vm2744_vm3, %v2746_v42, %v2742_v63  ;;  %vm2756_vm4 = vmor %vm2754_vm9, %vm2755_vm1  ;;  %v2775_v39 = vand.u32 2147483648, %v2650_v4  ;;  %v2773_v50 = vand.u32 2147483647, %v2650_v4 }
 0x5a5   :  { %v2751_v14 = vsub.f32 1.0, %v2750_v23  ;;  %v2904_v45 = vmul.f32 %v2747_v0, %v6842_v29  ;;  %v2935_v29 = vadd.f32 %v2919_v8, %v6657_v57  ;;  %vm2769_vm7 = vweird.f32 %v2650_v4 }
 0x5a6   :  { %v2776_v52 = vor.u32 1.1754944e-38, %v2775_v39  ;;  %vm2774_vm15 = vcmp.eq.f32.partialorder %v2773_v50, 8.507059e+37 }
 0x5a7   :  { %v2752_v54 = vmul.f32 %v4849_v27, %v2751_v14  ;;  %v2920_v18 = vmul.f32 1.6666666, %v2904_v45  ;;  %v6906_v9 = vmul.f32 0.70710677, %v2935_v29 }
 0x5a8   :  { %v6893_v22 = vpop.f32.mrf.mxu3 }
 0x5a9   :  { %v4851_v55 = vpop.eup %4850  ;;  %v2753_v36 = vadd.f32 %v4849_v27, %v2752_v54  ;;  %v4292_v46 = vmul.f32 -1.442695, %v6893_v22  ;;  %v2936_v5 = vadd.f32 %v2920_v18, %v6659_v47  ;;  %v2761_v47 = vor.u32 1.1754944e-38, %v2760_v7 }
 0x5aa   :  { %v4853_v15 = vpop.eup %4852  ;;  %v6899_v58 = vadd.f32 1.0, %v4851_v55 }
 0x5ab   :  { %v2765_v16 = vmul.f32 %v4853_v15, %v2650_v4  ;;  %4854 = vpow2.f32 %v4292_v46  ;;  %v6904_v3 = vmul.f32 0.70710677, %v2936_v5  ;;  %v2757_v26 = vsel %vm2756_vm4, %v4849_v27, %v2753_v36 }
 0x5ac   :  { %4856 = vrcp.f32 %v6899_v58  ;;  %vm2770_vm6 = vweird.f32 %v4853_v15  ;;  %v2762_v57 = vsel %vm2759_vm5, %v2761_v47, %v2757_v26  ;;  %v2790_v0 = vand.u32 2147483648, %v6899_v58 }
 0x5ad   :  { %v2766_v53 = vsub.f32 1.0, %v2765_v16  ;;  %v2999_v56 = vpack.c.bf16 %v6904_v3, %v6906_v9  ;;  %vm2771_vm13 = vmor %vm2769_vm7, %vm2770_vm6  ;;  %v2905_v37 = vmul.f32 %v2762_v57, %v6866_v51  ;;  %vm2784_vm10 = vweird.f32 %v6899_v58 }
 0x5ae   :  { %v2788_v45 = vand.u32 2147483647, %v6899_v58  ;;  %v2791_v36 = vor.u32 1.1754944e-38, %v2790_v0 }
 0x5af   :  { %v2767_v17 = vmul.f32 %v4853_v15, %v2766_v53  ;;  %3071 = vmatmul.bf16.gmra.mxu0 %v2999_v56  ;;  %v2921_v27 = vmul.f32 1.6666666, %v2905_v37 }
 0x5b0   :  { %v6908_v43 = vpop.f32.mrf.mxu3  ;;  %vm2789_vm11 = vcmp.eq.f32.partialorder %v2788_v45, 8.507059e+37 }
 0x5b1   :  { %v4855_v19 = vpop.eup %4854  ;;  %v2768_v11 = vadd.f32 %v4853_v15, %v2767_v17  ;;  %v4293_v49 = vmul.f32 -1.442695, %v6908_v43 }
 0x5b2   :  { %v4857_v61 = vpop.eup %4856  ;;  %v2652_v24 = vadd.f32 1.0, %v4855_v19 }
 0x5b3   :  { %v2772_v48 = vsel %vm2771_vm13, %v4853_v15, %v2768_v11  ;;  %v2780_v10 = vmul.f32 %v4857_v61, %v6899_v58  ;;  %vm2785_vm2 = vweird.f32 %v4857_v61 }
 0x5b4   :  { %v2777_v62 = vsel %vm2774_vm15, %v2776_v52, %v2772_v48  ;;  %4858 = vrcp.f32 %v2652_v24  ;;  %vm2786_vm8 = vmor %vm2784_vm10, %vm2785_vm2  ;;  %v2803_v46 = vand.u32 2147483647, %v2652_v24  ;;  %v2805_v15 = vand.u32 2147483648, %v2652_v24 }
 0x5b5   :  { %v2906_v59 = vmul.f32 %v2777_v62, %v6873_v13  ;;  %v2781_v32 = vsub.f32 1.0, %v2780_v10  ;;  %4860 = vpow2.f32 %v4293_v49  ;;  %v2937_v13 = vadd.f32 %v2921_v27, %v6671_v44 }
 0x5b6   :  { %vm2799_vm0 = vweird.f32 %v2652_v24  ;;  %vm2804_vm3 = vcmp.eq.f32.partialorder %v2803_v46, 8.507059e+37  ;;  %v2806_v53 = vor.u32 1.1754944e-38, %v2805_v15 }
 0x5b7   :  { %v2922_v60 = vmul.f32 1.6666666, %v2906_v59  ;;  %v2782_v4 = vmul.f32 %v4857_v61, %v2781_v32  ;;  %v6926_v5 = vmul.f32 0.70710677, %v2937_v13 }
 0x5b8   :  { %v6916_v34 = vpop.f32.mrf.mxu3 }
 0x5b9   :  { %v2938_v42 = vadd.f32 %v2922_v60, %v6673_v21  ;;  %v2783_v23 = vadd.f32 %v4857_v61, %v2782_v4  ;;  %v4294_v51 = vmul.f32 -1.442695, %v6916_v34 }
 0x5ba   :  { %v4859_v63 = vpop.eup %4858 }
 0x5bb   :  { %v4861_v14 = vpop.eup %4860  ;;  %v2795_v8 = vmul.f32 %v4859_v63, %v2652_v24  ;;  %4862 = vpow2.f32 %v4294_v51  ;;  %v6924_v18 = vmul.f32 0.70710677, %v2938_v42  ;;  %v2787_v21 = vsel %vm2786_vm8, %v4857_v61, %v2783_v23 }
 0x5bc   :  { %v2653_v54 = vadd.f32 1.0, %v4861_v14  ;;  %vm2800_vm14 = vweird.f32 %v4859_v63  ;;  %v2792_v41 = vsel %vm2789_vm11, %v2791_v36, %v2787_v21 }
 0x5bd   :  { %v2796_v55 = vsub.f32 1.0, %v2795_v8  ;;  %v3000_v29 = vpack.c.bf16 %v6924_v18, %v6926_v5  ;;  %vm2801_vm12 = vmor %vm2799_vm0, %vm2800_vm14  ;;  %v2907_v47 = vmul.f32 %v2792_v41, %v6885_v31 }
 0x5be   :  { %4864 = vrcp.f32 %v2653_v54  ;;  %vm2814_vm9 = vweird.f32 %v2653_v54  ;;  %v2820_v10 = vand.u32 2147483648, %v2653_v54  ;;  %v2818_v27 = vand.u32 2147483647, %v2653_v54 }
 0x5bf   :  { %v2797_v44 = vmul.f32 %v4859_v63, %v2796_v55  ;;  %3076 = vmatmul.bf16.gmra.mxu0 %v3000_v29  ;;  %v2923_v56 = vmul.f32 1.6666666, %v2907_v47 }
 0x5c0   :  { %v6928_v7 = vpop.f32.mrf.mxu3  ;;  %v2821_v42 = vor.u32 1.1754944e-38, %v2820_v10  ;;  %vm2819_vm5 = vcmp.eq.f32.partialorder %v2818_v27, 8.507059e+37 }
 0x5c1   :  { %v2798_v58 = vadd.f32 %v4859_v63, %v2797_v44  ;;  %v4295_v16 = vmul.f32 -1.442695, %v6928_v7  ;;  %v4863_v26 = vpop.eup %4862  ;;  %v2939_v59 = vadd.f32 %v2923_v56, %v6685_v33 }
 0x5c2   :  { %v2654_v17 = vadd.f32 1.0, %v4863_v26 }
 0x5c3   :  { %v2802_v39 = vsel %vm2801_vm12, %v4859_v63, %v2798_v58  ;;  %4866 = vpow2.f32 %v4295_v16  ;;  %v6945_v51 = vmul.f32 0.70710677, %v2939_v59 }
 0x5c4   :  { %v4865_v50 = vpop.eup %4864  ;;  %v2807_v57 = vsel %vm2804_vm3, %v2806_v53, %v2802_v39  ;;  %4868 = vrcp.f32 %v2654_v17  ;;  %v2835_v63 = vand.u32 2147483648, %v2654_v17  ;;  %v2833_v33 = vand.u32 2147483647, %v2654_v17 }
 0x5c5   :  { %v2908_v19 = vmul.f32 %v2807_v57, %v6893_v22  ;;  %v2810_v11 = vmul.f32 %v4865_v50, %v2653_v54  ;;  %vm2815_vm1 = vweird.f32 %v4865_v50  ;;  %vm2829_vm7 = vweird.f32 %v2654_v17 }
 0x5c6   :  { %vm2816_vm4 = vmor %vm2814_vm9, %vm2815_vm1  ;;  %v2836_v15 = vor.u32 1.1754944e-38, %v2835_v63  ;;  %vm2834_vm15 = vcmp.eq.f32.partialorder %v2833_v33, 8.507059e+37 }
 0x5c7   :  { %v2924_v49 = vmul.f32 1.6666666, %v2908_v19  ;;  %v2811_v61 = vsub.f32 1.0, %v2810_v11 }
 0x5c8   :  { %v6935_v52 = vpop.f32.mrf.mxu3 }
 0x5c9   :  { %v4867_v24 = vpop.eup %4866  ;;  %v2940_v37 = vadd.f32 %v2924_v49, %v6687_v12  ;;  %v2812_v48 = vmul.f32 %v4865_v50, %v2811_v61  ;;  %v4296_v31 = vmul.f32 -1.442695, %v6935_v52 }
 0x5ca   :  { %v6939_v62 = vadd.f32 1.0, %v4867_v24  ;;  %v4869_v22 = vpop.eup %4868  ;;  %v4498_v24 = vld [vmem:[%s7197_s8 + $0xf8] sm:$0xff] }
 0x5cb   :  { %v2813_v32 = vadd.f32 %v4865_v50, %v2812_v48  ;;  %4870 = vpow2.f32 %v4296_v31  ;;  %v2825_v60 = vmul.f32 %v4869_v22, %v2654_v17  ;;  %v6943_v4 = vmul.f32 0.70710677, %v2940_v37  ;;  %3494 = vmatpush.bf16.msra.mxu1 %v4498_v24  ;;  %v4497_v31 = vld [vmem:[%s7197_s8 + $0xf0] sm:$0xff] }
 0x5cc   :  { %4872 = vrcp.f32 %v6939_v62  ;;  %vm2830_vm6 = vweird.f32 %v4869_v22  ;;  %v2848_v11 = vand.u32 2147483647, %v6939_v62  ;;  %v2850_v56 = vand.u32 2147483648, %v6939_v62 }
 0x5cd   :  { %v2817_v12 = vsel %vm2816_vm4, %v4865_v50, %v2813_v32  ;;  %v2826_v23 = vsub.f32 1.0, %v2825_v60  ;;  %v3001_v8 = vpack.c.bf16 %v6943_v4, %v6945_v51  ;;  %vm2831_vm13 = vmor %vm2829_vm7, %vm2830_vm6  ;;  %vm2844_vm10 = vweird.f32 %v6939_v62 }
 0x5ce   :  { %v2822_v0 = vsel %vm2819_vm5, %v2821_v42, %v2817_v12  ;;  %vm2849_vm11 = vcmp.eq.f32.partialorder %v2848_v11, 8.507059e+37  ;;  %v4496_v42 = vld [vmem:[%s7197_s8 + $0xe8] sm:$0xff] }
 0x5cf   :  { %v2827_v14 = vmul.f32 %v4869_v22, %v2826_v23  ;;  %v2909_v46 = vmul.f32 %v2822_v0, %v6908_v43  ;;  %3081 = vmatmul.bf16.gmra.mxu0 %v3001_v8  ;;  %3495 = vmatpush.bf16.msra.mxu1 %v4497_v31 }
 0x5d0   :  { %v6947_v13 = vpop.f32.mrf.mxu3 }
 0x5d1   :  { %v4871_v45 = vpop.eup %4870  ;;  %v4297_v54 = vmul.f32 -1.442695, %v6947_v13  ;;  %v2828_v55 = vadd.f32 %v4869_v22, %v2827_v14  ;;  %v2925_v26 = vmul.f32 1.6666666, %v2909_v46 }
 0x5d2   :  { %v4873_v21 = vpop.eup %4872  ;;  %v2656_v36 = vadd.f32 1.0, %v4871_v45 }
 0x5d3   :  { %v2840_v44 = vmul.f32 %v4873_v21, %v6939_v62  ;;  %4874 = vpow2.f32 %v4297_v54  ;;  %v2832_v41 = vsel %vm2831_vm13, %v4869_v22, %v2828_v55  ;;  %vm2845_vm2 = vweird.f32 %v4873_v21  ;;  %3496 = vmatpush.bf16.msra.mxu1 %v4496_v42  ;;  %v4495_v55 = vld [vmem:[%s7197_s8 + $0xe0] sm:$0xff] }
 0x5d4   :  { %4876 = vrcp.f32 %v2656_v36  ;;  %v2837_v58 = vsel %vm2834_vm15, %v2836_v15, %v2832_v41  ;;  %vm2846_vm8 = vmor %vm2844_vm10, %vm2845_vm2  ;;  %v2865_v10 = vand.u32 2147483648, %v2656_v36  ;;  %v2863_v59 = vand.u32 2147483647, %v2656_v36 }
 0x5d5   :  { %v2841_v29 = vsub.f32 1.0, %v2840_v44  ;;  %v2910_v16 = vmul.f32 %v2837_v58, %v6916_v34  ;;  %v2941_v34 = vadd.f32 %v2925_v26, %v6703_v35  ;;  %v2851_v35 = vor.u32 1.1754944e-38, %v2850_v56 }
 0x5d6   :  { %vm2859_vm0 = vweird.f32 %v2656_v36  ;;  %v2866_v63 = vor.u32 1.1754944e-38, %v2865_v10  ;;  %vm2864_vm3 = vcmp.eq.f32.partialorder %v2863_v59, 8.507059e+37 }
 0x5d7   :  { %v2842_v53 = vmul.f32 %v4873_v21, %v2841_v29  ;;  %v2926_v47 = vmul.f32 1.6666666, %v2910_v16  ;;  %v6971_v62 = vmul.f32 0.70710677, %v2941_v34  ;;  %3497 = vmatpush.bf16.msra.mxu1 %v4495_v55 }
 0x5d8   :  { %v6955_v39 = vpop.f32.mrf.mxu3 }
 0x5d9   :  { %v4875_v17 = vpop.eup %4874  ;;  %v2843_v43 = vadd.f32 %v4873_v21, %v2842_v53  ;;  %v4298_v50 = vmul.f32 -1.442695, %v6955_v39  ;;  %v2942_v19 = vadd.f32 %v2926_v47, %v6705_v38 }
 0x5da   :  { %v4877_v57 = vpop.eup %4876  ;;  %v2657_v49 = vadd.f32 1.0, %v4875_v17 }
 0x5db   :  { %v2855_v61 = vmul.f32 %v4877_v57, %v2656_v36  ;;  %4878 = vpow2.f32 %v4298_v50  ;;  %v6966_v37 = vmul.f32 0.70710677, %v2942_v19  ;;  %v2847_v38 = vsel %vm2846_vm8, %v4873_v21, %v2843_v43 }
 0x5dc   :  { %4880 = vrcp.f32 %v2657_v49  ;;  %vm2860_vm14 = vweird.f32 %v4877_v57  ;;  %v2852_v32 = vsel %vm2849_vm11, %v2851_v35, %v2847_v38  ;;  %v2878_v58 = vand.u32 2147483647, %v2657_v49 }
 0x5dd   :  { %v2856_v48 = vsub.f32 1.0, %v2855_v61  ;;  %v3002_v12 = vpack.c.bf16 %v6966_v37, %v6971_v62  ;;  %vm2861_vm12 = vmor %vm2859_vm0, %vm2860_vm14  ;;  %v2911_v14 = vmul.f32 %v2852_v32, %v6928_v7  ;;  %v2880_v29 = vand.u32 2147483648, %v2657_v49 }
 0x5de   :  { %vm2874_vm9 = vweird.f32 %v2657_v49  ;;  %vm2879_vm5 = vcmp.eq.f32.partialorder %v2878_v58, 8.507059e+37 }
 0x5df   :  { %v2857_v22 = vmul.f32 %v4877_v57, %v2856_v48  ;;  %3086 = vmatmul.bf16.gmra.mxu0 %v3002_v12  ;;  %v2927_v36 = vmul.f32 1.6666666, %v2911_v14  ;;  %v2881_v17 = vor.u32 1.1754944e-38, %v2880_v29 }
 0x5e1   :  { %v4879_v27 = vpop.eup %4878  ;;  %v2858_v60 = vadd.f32 %v4877_v57, %v2857_v22 }
 0x5e2   :  { %v4881_v23 = vpop.eup %4880  ;;  %v2658_v0 = vadd.f32 1.0, %v4879_v27 }
 0x5e3   :  { %v2862_v33 = vsel %vm2861_vm12, %v4877_v57, %v2858_v60  ;;  %v2870_v45 = vmul.f32 %v4881_v23, %v2657_v49  ;;  %vm2875_vm1 = vweird.f32 %v4881_v23 }
 0x5e4   :  { %v2867_v8 = vsel %vm2864_vm3, %v2866_v63, %v2862_v33  ;;  %4882 = vrcp.f32 %v2658_v0  ;;  %vm2876_vm4 = vmor %vm2874_vm9, %vm2875_vm1  ;;  %v2895_v43 = vand.u32 2147483648, %v2658_v0  ;;  %v2893_v57 = vand.u32 2147483647, %v2658_v0 }
 0x5e5   :  { %v2912_v54 = vmul.f32 %v2867_v8, %v6935_v52  ;;  %v2871_v21 = vsub.f32 1.0, %v2870_v45  ;;  %v2943_v52 = vadd.f32 %v2927_v36, %v6729_v30  ;;  %vm2889_vm7 = vweird.f32 %v2658_v0  ;;  %v4493_v8 = vld [vmem:[%s7197_s8 + $0xd0] sm:$0xff] }
 0x5e6   :  { %v2896_v56 = vor.u32 1.1754944e-38, %v2895_v43  ;;  %vm2894_vm15 = vcmp.eq.f32.partialorder %v2893_v57, 8.507059e+37 }
 0x5e7   :  { %v2928_v46 = vmul.f32 1.6666666, %v2912_v54  ;;  %v2872_v15 = vmul.f32 %v4881_v23, %v2871_v21  ;;  %v6987_v50 = vmul.f32 0.70710677, %v2943_v52 }
 0x5e9   :  { %v2944_v44 = vadd.f32 %v2928_v46, %v6731_v2  ;;  %v2873_v7 = vadd.f32 %v4881_v23, %v2872_v15 }
 0x5ea   :  { %v4883_v41 = vpop.eup %4882 }
 0x5eb   :  { %v2885_v16 = vmul.f32 %v4883_v41, %v2658_v0  ;;  %v6985_v26 = vmul.f32 0.70710677, %v2944_v44  ;;  %v2877_v53 = vsel %vm2876_vm4, %v4881_v23, %v2873_v7  ;;  %vm2890_vm6 = vweird.f32 %v4883_v41 }
 0x5ec   :  { %v2882_v19 = vsel %vm2879_vm5, %v2881_v17, %v2877_v53  ;;  %vm2891_vm13 = vmor %vm2889_vm7, %vm2890_vm6  ;;  %v4492_v17 = vld [vmem:[%s7197_s8 + $0xc8] sm:$0xff] }
 0x5ed   :  { %v2886_v47 = vsub.f32 1.0, %v2885_v16  ;;  %v3003_v30 = vpack.c.bf16 %v6985_v26, %v6987_v50  ;;  %v2913_v49 = vmul.f32 %v2882_v19, %v6947_v13 }
 0x5ef   :  { %v2887_v2 = vmul.f32 %v4883_v41, %v2886_v47  ;;  %3091 = vmatmul.bf16.gmra.mxu0 %v3003_v30  ;;  %v2929_v38 = vmul.f32 1.6666666, %v2913_v49 }
 0x5f1   :  { %v2888_v11 = vadd.f32 %v4883_v41, %v2887_v2  ;;  %v2945_v35 = vadd.f32 %v2929_v38, %v6737_v40 }
 0x5f3   :  { %v2892_v34 = vsel %vm2891_vm13, %v4883_v41, %v2888_v11  ;;  %v6997_v22 = vmul.f32 0.70710677, %v2945_v35 }
 0x5f4   :  { %v2897_v61 = vsel %vm2894_vm15, %v2896_v56, %v2892_v34 }
 0x5f5   :  { %v2914_v24 = vmul.f32 %v2897_v61, %v6955_v39 }
 0x5f7   :  { %v2930_v48 = vmul.f32 1.6666666, %v2914_v24 }
 0x5f9   :  { %v2946_v31 = vadd.f32 %v2930_v48, %v6739_v20  ;;  %v4494_v20 = vld [vmem:[%s7197_s8 + $0xd8] sm:$0xff] }
 0x5fa   :  { %3498 = vmatpush.bf16.msra.mxu1 %v4494_v20 }
 0x5fb   :  { %v6995_v10 = vmul.f32 0.70710677, %v2946_v31 }
 0x5fd   :  { %v3004_v59 = vpack.c.bf16 %v6995_v10, %v6997_v22 }
 0x5fe   :  { %3499 = vmatpush.bf16.msra.mxu1 %v4493_v8 }
 0x5ff   :  { %3096 = vmatmul.bf16.gmra.mxu0 %v3004_v59 }
 0x602   :  { %3500 = vmatpush.bf16.msra.mxu1 %v4492_v17 }
 0x60c   :  { %v3062_v13 = vpop.f32.mrf.mxu0 }
 0x60d   :  { %v4363_v32 = vmul.f32 -1.442695, %v3062_v13 }
 0x60f   :  { %4884 = vpow2.f32 %v4363_v32 }
 0x614   :  { %v3064_v27 = vpop.f32.mrf.mxu0 }
 0x615   :  { %v4885_v39 = vpop.eup %4884  ;;  %v4364_v60 = vmul.f32 -1.442695, %v3064_v27 }
 0x616   :  { %v3150_v12 = vadd.f32 1.0, %v4885_v39  ;;  %v4491_v39 = vld [vmem:[%s7197_s8 + $0xc0] sm:$0xff] }
 0x617   :  { %4886 = vpow2.f32 %v4364_v60  ;;  %3501 = vmatpush.bf16.msra.mxu1 %v4491_v39 }
 0x618   :  { %4888 = vrcp.f32 %v3150_v12  ;;  %v3177_v15 = vand.u32 2147483648, %v3150_v12  ;;  %vm3171_vm10 = vweird.f32 %v3150_v12  ;;  %v3175_v7 = vand.u32 2147483647, %v3150_v12 }
 0x61a   :  { %v3178_v52 = vor.u32 1.1754944e-38, %v3177_v15  ;;  %vm3176_vm11 = vcmp.eq.f32.partialorder %v3175_v7, 8.507059e+37 }
 0x61c   :  { %v7004_v40 = vpop.f32.mrf.mxu0 }
 0x61d   :  { %v4887_v42 = vpop.eup %4886  ;;  %v4365_v23 = vmul.f32 -1.442695, %v7004_v40 }
 0x61e   :  { %v4889_v63 = vpop.eup %4888  ;;  %v3151_v0 = vadd.f32 1.0, %v4887_v42 }
 0x61f   :  { %v3167_v14 = vmul.f32 %v4889_v63, %v3150_v12  ;;  %4890 = vpow2.f32 %v4365_v23  ;;  %vm3172_vm2 = vweird.f32 %v4889_v63 }
 0x620   :  { %4892 = vrcp.f32 %v3151_v0  ;;  %vm3173_vm8 = vmor %vm3171_vm10, %vm3172_vm2  ;;  %v3190_v16 = vand.u32 2147483647, %v3151_v0  ;;  %v3192_v53 = vand.u32 2147483648, %v3151_v0  ;;  %vm3186_vm0 = vweird.f32 %v3151_v0 }
 0x621   :  { %v3168_v33 = vsub.f32 1.0, %v3167_v14 }
 0x622   :  { %vm3191_vm3 = vcmp.eq.f32.partialorder %v3190_v16, 8.507059e+37  ;;  %v3193_v56 = vor.u32 1.1754944e-38, %v3192_v53 }
 0x623   :  { %v3169_v45 = vmul.f32 %v4889_v63, %v3168_v33 }
 0x624   :  { %v7010_v54 = vpop.f32.mrf.mxu0 }
 0x625   :  { %v4891_v21 = vpop.eup %4890  ;;  %v3170_v55 = vadd.f32 %v4889_v63, %v3169_v45  ;;  %v4366_v36 = vmul.f32 -1.442695, %v7010_v54 }
 0x626   :  { %v4893_v46 = vpop.eup %4892  ;;  %v3152_v44 = vadd.f32 1.0, %v4891_v21 }
 0x627   :  { %v3182_v41 = vmul.f32 %v4893_v46, %v3151_v0  ;;  %4894 = vpow2.f32 %v4366_v36  ;;  %v3174_v58 = vsel %vm3173_vm8, %v4889_v63, %v3170_v55  ;;  %vm3187_vm14 = vweird.f32 %v4893_v46 }
 0x628   :  { %4896 = vrcp.f32 %v3152_v44  ;;  %v3179_v43 = vsel %vm3176_vm11, %v3178_v52, %v3174_v58  ;;  %vm3188_vm12 = vmor %vm3186_vm0, %vm3187_vm14  ;;  %v3207_v63 = vand.u32 2147483648, %v3152_v44  ;;  %vm3201_vm9 = vweird.f32 %v3152_v44 }
 0x629   :  { %v3183_v29 = vsub.f32 1.0, %v3182_v41  ;;  %v3406_v34 = vmul.f32 %v3179_v43, %v3062_v13  ;;  %v3205_v0 = vand.u32 2147483647, %v3152_v44 }
 0x62a   :  { %v3208_v8 = vor.u32 1.1754944e-38, %v3207_v63 }
 0x62b   :  { %v3184_v47 = vmul.f32 %v4893_v46, %v3183_v29  ;;  %v3422_v35 = vmul.f32 1.6666666, %v3406_v34  ;;  %vm3206_vm5 = vcmp.eq.f32.partialorder %v3205_v0, 8.507059e+37 }
 0x62c   :  { %v7016_v2 = vpop.f32.mrf.mxu0 }
 0x62d   :  { %v4895_v57 = vpop.eup %4894  ;;  %v3185_v19 = vadd.f32 %v4893_v46, %v3184_v47  ;;  %v4367_v11 = vmul.f32 -1.442695, %v7016_v2 }
 0x62e   :  { %v4897_v30 = vpop.eup %4896  ;;  %v3153_v49 = vadd.f32 1.0, %v4895_v57 }
 0x62f   :  { %v3189_v61 = vsel %vm3188_vm12, %v4893_v46, %v3185_v19  ;;  %v3197_v24 = vmul.f32 %v4897_v30, %v3152_v44  ;;  %4898 = vpow2.f32 %v4367_v11  ;;  %vm3202_vm1 = vweird.f32 %v4897_v30 }
 0x630   :  { %v3194_v38 = vsel %vm3191_vm3, %v3193_v56, %v3189_v61  ;;  %4900 = vrcp.f32 %v3153_v49  ;;  %vm3203_vm4 = vmor %vm3201_vm9, %vm3202_vm1  ;;  %v3220_v21 = vand.u32 2147483647, %v3153_v49  ;;  %v3222_v55 = vand.u32 2147483648, %v3153_v49 }
 0x631   :  { %v3407_v48 = vmul.f32 %v3194_v38, %v3064_v27  ;;  %v3198_v31 = vsub.f32 1.0, %v3197_v24  ;;  %vm3216_vm7 = vweird.f32 %v3153_v49 }
 0x632   :  { %vm3221_vm15 = vcmp.eq.f32.partialorder %v3220_v21, 8.507059e+37  ;;  %v3223_v29 = vor.u32 1.1754944e-38, %v3222_v55 }
 0x633   :  { %v3423_v59 = vmul.f32 1.6666666, %v3407_v48  ;;  %v3199_v32 = vmul.f32 %v4897_v30, %v3198_v31 }
 0x634   :  { %v7022_v60 = vpop.f32.mrf.mxu0 }
 0x635   :  { %v4899_v20 = vpop.eup %4898  ;;  %v3438_v12 = vpack.c.bf16 %v3423_v59, %v3422_v35  ;;  %v3200_v42 = vadd.f32 %v4897_v30, %v3199_v32  ;;  %v4368_v13 = vmul.f32 -1.442695, %v7022_v60 }
 0x636   :  { %v4901_v23 = vpop.eup %4900  ;;  %v3154_v27 = vadd.f32 1.0, %v4899_v20 }
 0x637   :  { %v3212_v14 = vmul.f32 %v4901_v23, %v3153_v49  ;;  %4902 = vpow2.f32 %v4368_v13  ;;  %3502 = vmatmul.bf16.vlgmr.msra.gmra.mxu1 %v3438_v12  ;;  %v3204_v33 = vsel %vm3203_vm4, %v4897_v30, %v3200_v42  ;;  %vm3217_vm6 = vweird.f32 %v4901_v23 }
 0x638   :  { %4904 = vrcp.f32 %v3154_v27  ;;  %v3209_v46 = vsel %vm3206_vm5, %v3208_v8, %v3204_v33  ;;  %vm3218_vm13 = vmor %vm3216_vm7, %vm3217_vm6  ;;  %v3237_v38 = vand.u32 2147483648, %v3154_v27  ;;  %vm3231_vm10 = vweird.f32 %v3154_v27 }
 0x639   :  { %v3213_v45 = vsub.f32 1.0, %v3212_v14  ;;  %v3408_v16 = vmul.f32 %v3209_v46, %v7004_v40  ;;  %v3235_v31 = vand.u32 2147483647, %v3154_v27 }
 0x63a   :  { %v3238_v32 = vor.u32 1.1754944e-38, %v3237_v38 }
 0x63b   :  { %v3214_v36 = vmul.f32 %v4901_v23, %v3213_v45  ;;  %v3424_v19 = vmul.f32 1.6666666, %v3408_v16  ;;  %vm3236_vm11 = vcmp.eq.f32.partialorder %v3235_v31, 8.507059e+37 }
 0x63c   :  { %v7025_v15 = vpop.f32.mrf.mxu0 }
 0x63d   :  { %v4903_v7 = vpop.eup %4902  ;;  %v3215_v41 = vadd.f32 %v4901_v23, %v3214_v36  ;;  %v4369_v44 = vmul.f32 -1.442695, %v7025_v15 }
 0x63e   :  { %v4905_v58 = vpop.eup %4904  ;;  %v3155_v52 = vadd.f32 1.0, %v4903_v7 }
 0x63f   :  { %v3219_v53 = vsel %vm3218_vm13, %v4901_v23, %v3215_v41  ;;  %v3227_v47 = vmul.f32 %v4905_v58, %v3154_v27  ;;  %4906 = vpow2.f32 %v4369_v44  ;;  %vm3232_vm2 = vweird.f32 %v4905_v58 }
 0x640   :  { %v3224_v17 = vsel %vm3221_vm15, %v3223_v29, %v3219_v53  ;;  %4908 = vrcp.f32 %v3155_v52  ;;  %vm3233_vm8 = vmor %vm3231_vm10, %vm3232_vm2  ;;  %v3250_v39 = vand.u32 2147483647, %v3155_v52  ;;  %v3252_v20 = vand.u32 2147483648, %v3155_v52 }
 0x641   :  { %v3409_v43 = vmul.f32 %v3224_v17, %v7010_v54  ;;  %v3228_v57 = vsub.f32 1.0, %v3227_v47  ;;  %vm3246_vm0 = vweird.f32 %v3155_v52 }
 0x642   :  { %vm3251_vm3 = vcmp.eq.f32.partialorder %v3250_v39, 8.507059e+37  ;;  %v3253_v14 = vor.u32 1.1754944e-38, %v3252_v20 }
 0x643   :  { %v3425_v11 = vmul.f32 1.6666666, %v3409_v43  ;;  %v3229_v30 = vmul.f32 %v4905_v58, %v3228_v57 }
 0x644   :  { %v7030_v56 = vpop.f32.mrf.mxu0 }
 0x645   :  { %v4907_v49 = vpop.eup %4906  ;;  %v3230_v34 = vadd.f32 %v4905_v58, %v3229_v30  ;;  %v4370_v61 = vmul.f32 -1.442695, %v7030_v56  ;;  %v3439_v24 = vpack.c.bf16 %v3425_v11, %v3424_v19 }
 0x646   :  { %v4909_v40 = vpop.eup %4908  ;;  %v3156_v48 = vadd.f32 1.0, %v4907_v49 }
 0x647   :  { %v3242_v35 = vmul.f32 %v4909_v40, %v3155_v52  ;;  %4910 = vpow2.f32 %v4370_v61  ;;  %3507 = vmatmul.bf16.gmra.mxu1 %v3439_v24  ;;  %v3234_v54 = vsel %vm3233_vm8, %v4905_v58, %v3230_v34  ;;  %vm3247_vm14 = vweird.f32 %v4909_v40 }
 0x648   :  { %4912 = vrcp.f32 %v3156_v48  ;;  %v3239_v42 = vsel %vm3236_vm11, %v3238_v32, %v3234_v54  ;;  %vm3248_vm12 = vmor %vm3246_vm0, %vm3247_vm14  ;;  %v3267_v47 = vand.u32 2147483648, %v3156_v48  ;;  %vm3261_vm9 = vweird.f32 %v3156_v48 }
 0x649   :  { %v3243_v59 = vsub.f32 1.0, %v3242_v35  ;;  %v3410_v45 = vmul.f32 %v3239_v42, %v7016_v2  ;;  %v3265_v43 = vand.u32 2147483647, %v3156_v48 }
 0x64a   :  { %v3268_v11 = vor.u32 1.1754944e-38, %v3267_v47 }
 0x64b   :  { %v3244_v12 = vmul.f32 %v4909_v40, %v3243_v59  ;;  %v3426_v7 = vmul.f32 1.6666666, %v3410_v45  ;;  %vm3266_vm5 = vcmp.eq.f32.partialorder %v3265_v43, 8.507059e+37 }
 0x64c   :  { %v7033_v13 = vpop.f32.mrf.mxu0 }
 0x64d   :  { %v4911_v23 = vpop.eup %4910  ;;  %v3245_v63 = vadd.f32 %v4909_v40, %v3244_v12  ;;  %v4371_v27 = vmul.f32 -1.442695, %v7033_v13 }
 0x64e   :  { %v4913_v0 = vpop.eup %4912  ;;  %v3157_v33 = vadd.f32 1.0, %v4911_v23 }
 0x64f   :  { %v3249_v8 = vsel %vm3248_vm12, %v4909_v40, %v3245_v63  ;;  %v3257_v21 = vmul.f32 %v4913_v0, %v3156_v48  ;;  %4914 = vpow2.f32 %v4371_v27  ;;  %vm3262_vm1 = vweird.f32 %v4913_v0 }
 0x650   :  { %v3254_v55 = vsel %vm3251_vm3, %v3253_v14, %v3249_v8  ;;  %4916 = vrcp.f32 %v3157_v33  ;;  %vm3263_vm4 = vmor %vm3261_vm9, %vm3262_vm1  ;;  %v3280_v30 = vand.u32 2147483647, %v3157_v33  ;;  %v3282_v49 = vand.u32 2147483648, %v3157_v33 }
 0x651   :  { %v3411_v36 = vmul.f32 %v3254_v55, %v7022_v60  ;;  %v3258_v46 = vsub.f32 1.0, %v3257_v21  ;;  %vm3276_vm7 = vweird.f32 %v3157_v33 }
 0x652   :  { %vm3281_vm15 = vcmp.eq.f32.partialorder %v3280_v30, 8.507059e+37  ;;  %v3283_v35 = vor.u32 1.1754944e-38, %v3282_v49 }
 0x653   :  { %v3427_v41 = vmul.f32 1.6666666, %v3411_v36  ;;  %v3259_v44 = vmul.f32 %v4913_v0, %v3258_v46 }
 0x654   :  { %v7038_v58 = vpop.f32.mrf.mxu0 }
 0x655   :  { %v4915_v29 = vpop.eup %4914  ;;  %v3260_v52 = vadd.f32 %v4913_v0, %v3259_v44  ;;  %v4372_v16 = vmul.f32 -1.442695, %v7038_v58  ;;  %v3440_v53 = vpack.c.bf16 %v3427_v41, %v3426_v7 }
 0x656   :  { %v4917_v2 = vpop.eup %4916  ;;  %v3158_v17 = vadd.f32 1.0, %v4915_v29 }
 0x657   :  { %v3272_v57 = vmul.f32 %v4917_v2, %v3157_v33  ;;  %4918 = vpow2.f32 %v4372_v16  ;;  %3512 = vmatmul.bf16.gmra.mxu1 %v3440_v53  ;;  %v3264_v60 = vsel %vm3263_vm4, %v4913_v0, %v3260_v52  ;;  %vm3277_vm6 = vweird.f32 %v4917_v2 }
 0x658   :  { %4920 = vrcp.f32 %v3158_v17  ;;  %v3269_v61 = vsel %vm3266_vm5, %v3268_v11, %v3264_v60  ;;  %vm3278_vm13 = vmor %vm3276_vm7, %vm3277_vm6  ;;  %v3297_v21 = vand.u32 2147483648, %v3158_v17  ;;  %vm3291_vm10 = vweird.f32 %v3158_v17 }
 0x659   :  { %v3273_v19 = vsub.f32 1.0, %v3272_v57  ;;  %v3412_v59 = vmul.f32 %v3269_v61, %v7025_v15  ;;  %v3295_v36 = vand.u32 2147483647, %v3158_v17 }
 0x65a   :  { %v3298_v41 = vor.u32 1.1754944e-38, %v3297_v21 }
 0x65b   :  { %v3274_v34 = vmul.f32 %v4917_v2, %v3273_v19  ;;  %v3428_v23 = vmul.f32 1.6666666, %v3412_v59  ;;  %vm3296_vm11 = vcmp.eq.f32.partialorder %v3295_v36, 8.507059e+37 }
 0x65c   :  { %v7041_v24 = vpop.f32.mrf.mxu0 }
 0x65d   :  { %v4919_v40 = vpop.eup %4918  ;;  %v3275_v38 = vadd.f32 %v4917_v2, %v3274_v34  ;;  %v4373_v48 = vmul.f32 -1.442695, %v7041_v24 }
 0x65e   :  { %v4921_v31 = vpop.eup %4920  ;;  %v3159_v54 = vadd.f32 1.0, %v4919_v40 }
 0x65f   :  { %v3279_v32 = vsel %vm3278_vm13, %v4917_v2, %v3275_v38  ;;  %v3287_v39 = vmul.f32 %v4921_v31, %v3158_v17  ;;  %4922 = vpow2.f32 %v4373_v48  ;;  %vm3292_vm2 = vweird.f32 %v4921_v31 }
 0x660   :  { %v3284_v20 = vsel %vm3281_vm15, %v3283_v35, %v3279_v32  ;;  %4924 = vrcp.f32 %v3159_v54  ;;  %vm3293_vm8 = vmor %vm3291_vm10, %vm3292_vm2  ;;  %v3310_v44 = vand.u32 2147483647, %v3159_v54  ;;  %v3312_v29 = vand.u32 2147483648, %v3159_v54 }
 0x661   :  { %v3413_v12 = vmul.f32 %v3284_v20, %v7030_v56  ;;  %v3288_v42 = vsub.f32 1.0, %v3287_v39  ;;  %vm3306_vm0 = vweird.f32 %v3159_v54 }
 0x662   :  { %vm3311_vm3 = vcmp.eq.f32.partialorder %v3310_v44, 8.507059e+37  ;;  %v3313_v57 = vor.u32 1.1754944e-38, %v3312_v29 }
 0x663   :  { %v3429_v63 = vmul.f32 1.6666666, %v3413_v12  ;;  %v3289_v27 = vmul.f32 %v4921_v31, %v3288_v42 }
 0x664   :  { %v7046_v0 = vpop.f32.mrf.mxu0 }
 0x665   :  { %v4923_v14 = vpop.eup %4922  ;;  %v3290_v33 = vadd.f32 %v4921_v31, %v3289_v27  ;;  %v4374_v45 = vmul.f32 -1.442695, %v7046_v0  ;;  %v3441_v8 = vpack.c.bf16 %v3429_v63, %v3428_v23 }
 0x666   :  { %v4925_v15 = vpop.eup %4924  ;;  %v3160_v55 = vadd.f32 1.0, %v4923_v14 }
 0x667   :  { %v3302_v46 = vmul.f32 %v4925_v15, %v3159_v54  ;;  %4926 = vpow2.f32 %v4374_v45  ;;  %3517 = vmatmul.bf16.gmra.mxu1 %v3441_v8  ;;  %v3294_v56 = vsel %vm3293_vm8, %v4921_v31, %v3290_v33  ;;  %vm3307_vm14 = vweird.f32 %v4925_v15 }
 0x668   :  { %4928 = vrcp.f32 %v3160_v55  ;;  %v3299_v16 = vsel %vm3296_vm11, %v3298_v41, %v3294_v56  ;;  %vm3308_vm12 = vmor %vm3306_vm0, %vm3307_vm14  ;;  %v3327_v39 = vand.u32 2147483648, %v3160_v55  ;;  %vm3321_vm9 = vweird.f32 %v3160_v55 }
 0x669   :  { %v3303_v7 = vsub.f32 1.0, %v3302_v46  ;;  %v3414_v19 = vmul.f32 %v3299_v16, %v7033_v13  ;;  %v3325_v12 = vand.u32 2147483647, %v3160_v55 }
 0x66a   :  { %v3328_v63 = vor.u32 1.1754944e-38, %v3327_v39 }
 0x66b   :  { %v3304_v52 = vmul.f32 %v4925_v15, %v3303_v7  ;;  %v3430_v40 = vmul.f32 1.6666666, %v3414_v19  ;;  %vm3326_vm5 = vcmp.eq.f32.partialorder %v3325_v12, 8.507059e+37 }
 0x66c   :  { %v7049_v53 = vpop.f32.mrf.mxu0 }
 0x66d   :  { %v4927_v2 = vpop.eup %4926  ;;  %v3305_v47 = vadd.f32 %v4925_v15, %v3304_v52  ;;  %v4375_v17 = vmul.f32 -1.442695, %v7049_v53 }
 0x66e   :  { %v4929_v43 = vpop.eup %4928  ;;  %v3161_v60 = vadd.f32 1.0, %v4927_v2 }
 0x66f   :  { %v3309_v11 = vsel %vm3308_vm12, %v4925_v15, %v3305_v47  ;;  %v3317_v30 = vmul.f32 %v4929_v43, %v3160_v55  ;;  %4930 = vpow2.f32 %v4375_v17  ;;  %vm3322_vm1 = vweird.f32 %v4929_v43 }
 0x670   :  { %v3314_v49 = vsel %vm3311_vm3, %v3313_v57, %v3309_v11  ;;  %4932 = vrcp.f32 %v3161_v60  ;;  %vm3323_vm4 = vmor %vm3321_vm9, %vm3322_vm1  ;;  %v3340_v27 = vand.u32 2147483647, %v3161_v60  ;;  %v3342_v14 = vand.u32 2147483648, %v3161_v60 }
 0x671   :  { %v3415_v34 = vmul.f32 %v3314_v49, %v7038_v58  ;;  %v3318_v61 = vsub.f32 1.0, %v3317_v30  ;;  %vm3336_vm7 = vweird.f32 %v3161_v60 }
 0x672   :  { %vm3341_vm15 = vcmp.eq.f32.partialorder %v3340_v27, 8.507059e+37  ;;  %v3343_v46 = vor.u32 1.1754944e-38, %v3342_v14 }
 0x673   :  { %v3431_v38 = vmul.f32 1.6666666, %v3415_v34  ;;  %v3319_v48 = vmul.f32 %v4929_v43, %v3318_v61 }
 0x674   :  { %v7054_v31 = vpop.f32.mrf.mxu0 }
 0x675   :  { %v4931_v35 = vpop.eup %4930  ;;  %v3320_v54 = vadd.f32 %v4929_v43, %v3319_v48  ;;  %v4376_v59 = vmul.f32 -1.442695, %v7054_v31  ;;  %v3442_v32 = vpack.c.bf16 %v3431_v38, %v3430_v40 }
 0x676   :  { %v4933_v13 = vpop.eup %4932  ;;  %v3162_v20 = vadd.f32 1.0, %v4931_v35 }
 0x677   :  { %v3332_v42 = vmul.f32 %v4933_v13, %v3161_v60  ;;  %4934 = vpow2.f32 %v4376_v59  ;;  %3522 = vmatmul.bf16.gmra.mxu1 %v3442_v32  ;;  %v3324_v58 = vsel %vm3323_vm4, %v4929_v43, %v3320_v54  ;;  %vm3337_vm6 = vweird.f32 %v4933_v13 }
 0x678   :  { %4936 = vrcp.f32 %v3162_v20  ;;  %v3329_v45 = vsel %vm3326_vm5, %v3328_v63, %v3324_v58  ;;  %vm3338_vm13 = vmor %vm3336_vm7, %vm3337_vm6  ;;  %v3357_v30 = vand.u32 2147483648, %v3162_v20  ;;  %vm3351_vm10 = vweird.f32 %v3162_v20 }
 0x679   :  { %v3333_v23 = vsub.f32 1.0, %v3332_v42  ;;  %v3416_v7 = vmul.f32 %v3329_v45, %v7041_v24  ;;  %v3355_v34 = vand.u32 2147483647, %v3162_v20 }
 0x67a   :  { %v3358_v38 = vor.u32 1.1754944e-38, %v3357_v30 }
 0x67b   :  { %v3334_v33 = vmul.f32 %v4933_v13, %v3333_v23  ;;  %v3432_v2 = vmul.f32 1.6666666, %v3416_v7  ;;  %vm3356_vm11 = vcmp.eq.f32.partialorder %v3355_v34, 8.507059e+37 }
 0x67c   :  { %v7057_v8 = vpop.f32.mrf.mxu0 }
 0x67d   :  { %v4935_v15 = vpop.eup %4934  ;;  %v3335_v21 = vadd.f32 %v4933_v13, %v3334_v33  ;;  %v4377_v55 = vmul.f32 -1.442695, %v7057_v8 }
 0x67e   :  { %v4937_v36 = vpop.eup %4936  ;;  %v3163_v56 = vadd.f32 1.0, %v4935_v15 }
 0x67f   :  { %v3339_v41 = vsel %vm3338_vm13, %v4933_v13, %v3335_v21  ;;  %v3347_v44 = vmul.f32 %v4937_v36, %v3162_v20  ;;  %4938 = vpow2.f32 %v4377_v55  ;;  %vm3352_vm2 = vweird.f32 %v4937_v36 }
 0x680   :  { %v3344_v29 = vsel %vm3341_vm15, %v3343_v46, %v3339_v41  ;;  %4940 = vrcp.f32 %v3163_v56  ;;  %vm3353_vm8 = vmor %vm3351_vm10, %vm3352_vm2  ;;  %v3372_v48 = vand.u32 2147483648, %v3163_v56  ;;  %v3370_v54 = vand.u32 2147483647, %v3163_v56 }
 0x681   :  { %v3417_v52 = vmul.f32 %v3344_v29, %v7046_v0  ;;  %v3348_v16 = vsub.f32 1.0, %v3347_v44  ;;  %vm3366_vm0 = vweird.f32 %v3163_v56 }
 0x682   :  { %v3373_v20 = vor.u32 1.1754944e-38, %v3372_v48  ;;  %vm3371_vm3 = vcmp.eq.f32.partialorder %v3370_v54, 8.507059e+37 }
 0x683   :  { %v3433_v47 = vmul.f32 1.6666666, %v3417_v52  ;;  %v3349_v17 = vmul.f32 %v4937_v36, %v3348_v16 }
 0x684   :  { %v7062_v43 = vpop.f32.mrf.mxu0 }
 0x685   :  { %v4939_v57 = vpop.eup %4938  ;;  %v3350_v60 = vadd.f32 %v4937_v36, %v3349_v17  ;;  %v4378_v19 = vmul.f32 -1.442695, %v7062_v43  ;;  %v3443_v11 = vpack.c.bf16 %v3433_v47, %v3432_v2 }
 0x686   :  { %v4941_v24 = vpop.eup %4940  ;;  %v3164_v49 = vadd.f32 1.0, %v4939_v57 }
 0x687   :  { %v3362_v61 = vmul.f32 %v4941_v24, %v3163_v56  ;;  %4942 = vpow2.f32 %v4378_v19  ;;  %3527 = vmatmul.bf16.gmra.mxu1 %v3443_v11  ;;  %v3354_v0 = vsel %vm3353_vm8, %v4937_v36, %v3350_v60  ;;  %vm3367_vm14 = vweird.f32 %v4941_v24 }
 0x688   :  { %4944 = vrcp.f32 %v3164_v49  ;;  %v3359_v59 = vsel %vm3356_vm11, %v3358_v38, %v3354_v0  ;;  %vm3368_vm12 = vmor %vm3366_vm0, %vm3367_vm14  ;;  %v3387_v46 = vand.u32 2147483648, %v3164_v49  ;;  %vm3381_vm9 = vweird.f32 %v3164_v49 }
 0x689   :  { %v3363_v40 = vsub.f32 1.0, %v3362_v61  ;;  %v3418_v42 = vmul.f32 %v3359_v59, %v7049_v53  ;;  %v3385_v56 = vand.u32 2147483647, %v3164_v49 }
 0x68a   :  { %v3388_v44 = vor.u32 1.1754944e-38, %v3387_v46 }
 0x68b   :  { %v3364_v35 = vmul.f32 %v4941_v24, %v3363_v40  ;;  %v3434_v33 = vmul.f32 1.6666666, %v3418_v42  ;;  %vm3386_vm5 = vcmp.eq.f32.partialorder %v3385_v56, 8.507059e+37 }
 0x68d   :  { %v4943_v32 = vpop.eup %4942  ;;  %v3365_v13 = vadd.f32 %v4941_v24, %v3364_v35 }
 0x68e   :  { %v4945_v39 = vpop.eup %4944  ;;  %v3165_v12 = vadd.f32 1.0, %v4943_v32 }
 0x68f   :  { %v3369_v58 = vsel %vm3368_vm12, %v4941_v24, %v3365_v13  ;;  %v3377_v23 = vmul.f32 %v4945_v39, %v3164_v49  ;;  %vm3382_vm1 = vweird.f32 %v4945_v39 }
 0x690   :  { %v3374_v63 = vsel %vm3371_vm3, %v3373_v20, %v3369_v58  ;;  %4946 = vrcp.f32 %v3165_v12  ;;  %vm3383_vm4 = vmor %vm3381_vm9, %vm3382_vm1  ;;  %v3402_v29 = vand.u32 2147483648, %v3165_v12  ;;  %v3400_v52 = vand.u32 2147483647, %v3165_v12 }
 0x691   :  { %v3419_v27 = vmul.f32 %v3374_v63, %v7054_v31  ;;  %v3378_v14 = vsub.f32 1.0, %v3377_v23  ;;  %vm3396_vm7 = vweird.f32 %v3165_v12 }
 0x692   :  { %v3403_v47 = vor.u32 1.1754944e-38, %v3402_v29  ;;  %vm3401_vm15 = vcmp.eq.f32.partialorder %v3400_v52, 8.507059e+37 }
 0x693   :  { %v3435_v45 = vmul.f32 1.6666666, %v3419_v27  ;;  %v3379_v15 = vmul.f32 %v4945_v39, %v3378_v14 }
 0x695   :  { %v3380_v21 = vadd.f32 %v4945_v39, %v3379_v15  ;;  %v3444_v55 = vpack.c.bf16 %v3435_v45, %v3434_v33 }
 0x696   :  { %v4947_v36 = vpop.eup %4946 }
 0x697   :  { %v3392_v7 = vmul.f32 %v4947_v36, %v3165_v12  ;;  %3532 = vmatmul.bf16.gmra.mxu1 %v3444_v55  ;;  %v3384_v53 = vsel %vm3383_vm4, %v4945_v39, %v3380_v21  ;;  %vm3397_vm6 = vweird.f32 %v4947_v36 }
 0x698   :  { %v3389_v16 = vsel %vm3386_vm5, %v3388_v44, %v3384_v53  ;;  %vm3398_vm13 = vmor %vm3396_vm7, %vm3397_vm6 }
 0x699   :  { %v3393_v41 = vsub.f32 1.0, %v3392_v7  ;;  %v3420_v17 = vmul.f32 %v3389_v16, %v7057_v8 }
 0x69b   :  { %v3394_v31 = vmul.f32 %v4947_v36, %v3393_v41  ;;  %v3436_v11 = vmul.f32 1.6666666, %v3420_v17 }
 0x69d   :  { %v3395_v2 = vadd.f32 %v4947_v36, %v3394_v31 }
 0x69f   :  { %v3399_v57 = vsel %vm3398_vm13, %v4947_v36, %v3395_v2 }
 0x6a0   :  { %v3404_v60 = vsel %vm3401_vm15, %v3403_v47, %v3399_v57 }
 0x6a1   :  { %v3421_v19 = vmul.f32 %v3404_v60, %v7062_v43 }
 0x6a3   :  { %v3437_v24 = vmul.f32 1.6666666, %v3421_v19 }
 0x6a5   :  { %v3445_v30 = vpack.c.bf16 %v3437_v24, %v3436_v11 }
 0x6a7   :  { %3537 = vmatmul.bf16.gmra.mxu1 %v3445_v30 }
 0x6b4   :  { %v3503_v49 = vpop.f32.mrf.mxu1 }
 0x6b5   :  { %v4411_v34 = vmul.f32 -1.442695, %v3503_v49 }
 0x6b7   :  { %4948 = vpow2.f32 %v4411_v34 }
 0x6bc   :  { %v3505_v61 = vpop.f32.mrf.mxu1 }
 0x6bd   :  { %v4949_v0 = vpop.eup %4948  ;;  %v4412_v40 = vmul.f32 -1.442695, %v3505_v61 }
 0x6be   :  { %v3591_v38 = vadd.f32 1.0, %v4949_v0 }
 0x6bf   :  { %4950 = vpow2.f32 %v4412_v40 }
 0x6c0   :  { %4952 = vrcp.f32 %v3591_v38  ;;  %v3618_v13 = vand.u32 2147483648, %v3591_v38  ;;  %v3616_v20 = vand.u32 2147483647, %v3591_v38  ;;  %vm3612_vm10 = vweird.f32 %v3591_v38 }
 0x6c2   :  { %v3619_v27 = vor.u32 1.1754944e-38, %v3618_v13  ;;  %vm3617_vm11 = vcmp.eq.f32.partialorder %v3616_v20, 8.507059e+37 }
 0x6c4   :  { %v7069_v48 = vpop.f32.mrf.mxu1 }
 0x6c5   :  { %v4951_v8 = vpop.eup %4950  ;;  %v4413_v35 = vmul.f32 -1.442695, %v7069_v48 }
 0x6c6   :  { %v4953_v54 = vpop.eup %4952  ;;  %v3592_v43 = vadd.f32 1.0, %v4951_v8 }
 0x6c7   :  { %v3608_v59 = vmul.f32 %v4953_v54, %v3591_v38  ;;  %4954 = vpow2.f32 %v4413_v35  ;;  %vm3613_vm2 = vweird.f32 %v4953_v54 }
 0x6c8   :  { %4956 = vrcp.f32 %v3592_v43  ;;  %vm3614_vm8 = vmor %vm3612_vm10, %vm3613_vm2  ;;  %v3633_v36 = vand.u32 2147483648, %v3592_v43  ;;  %v3631_v7 = vand.u32 2147483647, %v3592_v43  ;;  %vm3627_vm0 = vweird.f32 %v3592_v43 }
 0x6c9   :  { %v3609_v32 = vsub.f32 1.0, %v3608_v59 }
 0x6ca   :  { %v3634_v16 = vor.u32 1.1754944e-38, %v3633_v36  ;;  %vm3632_vm3 = vcmp.eq.f32.partialorder %v3631_v7, 8.507059e+37 }
 0x6cb   :  { %v3610_v39 = vmul.f32 %v4953_v54, %v3609_v32 }
 0x6cc   :  { %v7072_v12 = vpop.f32.mrf.mxu1 }
 0x6cd   :  { %v4955_v42 = vpop.eup %4954  ;;  %v3611_v58 = vadd.f32 %v4953_v54, %v3610_v39  ;;  %v4414_v23 = vmul.f32 -1.442695, %v7072_v12 }
 0x6ce   :  { %v4957_v63 = vpop.eup %4956  ;;  %v3593_v14 = vadd.f32 1.0, %v4955_v42 }
 0x6cf   :  { %v3615_v33 = vsel %vm3614_vm8, %v4953_v54, %v3611_v58  ;;  %v3623_v45 = vmul.f32 %v4957_v63, %v3592_v43  ;;  %4958 = vpow2.f32 %v4414_v23  ;;  %vm3628_vm14 = vweird.f32 %v4957_v63 }
 0x6d0   :  { %v3620_v15 = vsel %vm3617_vm11, %v3619_v27, %v3615_v33  ;;  %4960 = vrcp.f32 %v3593_v14  ;;  %vm3629_vm12 = vmor %vm3627_vm0, %vm3628_vm14  ;;  %v3648_v11 = vand.u32 2147483648, %v3593_v14  ;;  %vm3642_vm9 = vweird.f32 %v3593_v14 }
 0x6d1   :  { %v3847_v21 = vmul.f32 %v3620_v15, %v3503_v49  ;;  %v3624_v55 = vsub.f32 1.0, %v3623_v45  ;;  %v3646_v49 = vand.u32 2147483647, %v3593_v14 }
 0x6d2   :  { %v3649_v35 = vor.u32 1.1754944e-38, %v3648_v11 }
 0x6d3   :  { %v3863_v46 = vmul.f32 1.6666666, %v3847_v21  ;;  %v3625_v56 = vmul.f32 %v4957_v63, %v3624_v55  ;;  %vm3647_vm5 = vcmp.eq.f32.partialorder %v3646_v49, 8.507059e+37 }
 0x6d4   :  { %v7075_v53 = vpop.f32.mrf.mxu1 }
 0x6d5   :  { %v4959_v41 = vpop.eup %4958  ;;  %v3879_v44 = vadd.f32 %v3863_v46, %v6864_v28  ;;  %v3626_v29 = vadd.f32 %v4957_v63, %v3625_v56  ;;  %v4415_v31 = vmul.f32 -1.442695, %v7075_v53 }
 0x6d6   :  { %v4961_v52 = vpop.eup %4960  ;;  %v3594_v2 = vadd.f32 1.0, %v4959_v41 }
 0x6d7   :  { %v3895_v47 = vmul.f32 0.70710677, %v3879_v44  ;;  %v3630_v17 = vsel %vm3629_vm12, %v4957_v63, %v3626_v29  ;;  %v3638_v57 = vmul.f32 %v4961_v52, %v3593_v14  ;;  %vm3643_vm1 = vweird.f32 %v4961_v52 }
 0x6d8   :  { %v3635_v60 = vsel %vm3632_vm3, %v3634_v16, %v3630_v17  ;;  %4962 = vrcp.f32 %v3594_v2  ;;  %vm3644_vm4 = vmor %vm3642_vm9, %vm3643_vm1  ;;  %v3661_v20 = vand.u32 2147483647, %v3594_v2  ;;  %v3663_v42 = vand.u32 2147483648, %v3594_v2 }
 0x6d9   :  { %3911 = vst [vmem:[%s7198_s9] sm:$0xff] %v3895_v47  ;;  %v3848_v19 = vmul.f32 %v3635_v60, %v3505_v61  ;;  %v3639_v28 = vsub.f32 1.0, %v3638_v57  ;;  %4964 = vpow2.f32 %v4415_v31  ;;  %vm3657_vm7 = vweird.f32 %v3594_v2 }
 0x6da   :  { %vm3662_vm15 = vcmp.eq.f32.partialorder %v3661_v20, 8.507059e+37  ;;  %v3664_v15 = vor.u32 1.1754944e-38, %v3663_v42 }
 0x6db   :  { %v3864_v24 = vmul.f32 1.6666666, %v3848_v19  ;;  %v3640_v30 = vmul.f32 %v4961_v52, %v3639_v28 }
 0x6dc   :  { %v7082_v34 = vpop.f32.mrf.mxu1 }
 0x6dd   :  { %v3880_v0 = vadd.f32 %v3864_v24, %v6857_v25  ;;  %v3641_v40 = vadd.f32 %v4961_v52, %v3640_v30  ;;  %v4416_v38 = vmul.f32 -1.442695, %v7082_v34 }
 0x6de   :  { %v4963_v8 = vpop.eup %4962 }
 0x6df   :  { %v4965_v54 = vpop.eup %4964  ;;  %v3896_v61 = vmul.f32 0.70710677, %v3880_v0  ;;  %v3645_v43 = vsel %vm3644_vm4, %v4961_v52, %v3641_v40  ;;  %v3653_v59 = vmul.f32 %v4963_v8, %v3594_v2  ;;  %4966 = vpow2.f32 %v4416_v38 }
 0x6e0   :  { %v3650_v32 = vsel %vm3647_vm5, %v3649_v35, %v3645_v43  ;;  %v3595_v13 = vadd.f32 1.0, %v4965_v54  ;;  %vm3658_vm6 = vweird.f32 %v4963_v8 }
 0x6e1   :  { %3912 = vst [vmem:[%s7198_s9 + $0x8] sm:$0xff] %v3896_v61  ;;  %v3849_v25 = vmul.f32 %v3650_v32, %v7069_v48  ;;  %v3654_v39 = vsub.f32 1.0, %v3653_v59  ;;  %vm3659_vm13 = vmor %vm3657_vm7, %vm3658_vm6 }
 0x6e2   :  { %4968 = vrcp.f32 %v3595_v13  ;;  %v3676_v44 = vand.u32 2147483647, %v3595_v13  ;;  %v3678_v29 = vand.u32 2147483648, %v3595_v13  ;;  %vm3672_vm10 = vweird.f32 %v3595_v13 }
 0x6e3   :  { %v3865_v58 = vmul.f32 1.6666666, %v3849_v25  ;;  %v3655_v23 = vmul.f32 %v4963_v8, %v3654_v39 }
 0x6e4   :  { %v7090_v63 = vpop.f32.mrf.mxu1  ;;  %vm3677_vm11 = vcmp.eq.f32.partialorder %v3676_v44, 8.507059e+37 }
 0x6e5   :  { %v3881_v27 = vadd.f32 %v3865_v58, %v6883_v6  ;;  %v3656_v14 = vadd.f32 %v4963_v8, %v3655_v23  ;;  %v4417_v33 = vmul.f32 -1.442695, %v7090_v63  ;;  %v4967_v45 = vpop.eup %4966 }
 0x6e6   :  { %v3596_v55 = vadd.f32 1.0, %v4967_v45 }
 0x6e7   :  { %v3897_v48 = vmul.f32 0.70710677, %v3881_v27  ;;  %v3660_v21 = vsel %vm3659_vm13, %v4963_v8, %v3656_v14  ;;  %4970 = vpow2.f32 %v4417_v33 }
 0x6e8   :  { %v4969_v36 = vpop.eup %4968  ;;  %v3665_v46 = vsel %vm3662_vm15, %v3664_v15, %v3660_v21  ;;  %4972 = vrcp.f32 %v3596_v55  ;;  %v3693_v49 = vand.u32 2147483648, %v3596_v55  ;;  %v3691_v40 = vand.u32 2147483647, %v3596_v55 }
 0x6e9   :  { %3913 = vst [vmem:[%s7198_s9 + $0x10] sm:$0xff] %v3897_v48  ;;  %v3850_v6 = vmul.f32 %v3665_v46, %v7072_v12  ;;  %v3668_v56 = vmul.f32 %v4969_v36, %v3595_v13  ;;  %vm3673_vm2 = vweird.f32 %v4969_v36  ;;  %v3679_v12 = vor.u32 1.1754944e-38, %v3678_v29 }
 0x6ea   :  { %vm3674_vm8 = vmor %vm3672_vm10, %vm3673_vm2  ;;  %vm3687_vm0 = vweird.f32 %v3596_v55  ;;  %v3694_v13 = vor.u32 1.1754944e-38, %v3693_v49  ;;  %vm3692_vm3 = vcmp.eq.f32.partialorder %v3691_v40, 8.507059e+37 }
 0x6eb   :  { %v3866_v7 = vmul.f32 1.6666666, %v3850_v6  ;;  %v3669_v41 = vsub.f32 1.0, %v3668_v56 }
 0x6ec   :  { %v7098_v31 = vpop.f32.mrf.mxu1 }
 0x6ed   :  { %v4971_v52 = vpop.eup %4970  ;;  %v3882_v16 = vadd.f32 %v3866_v7, %v6881_v1  ;;  %v3670_v2 = vmul.f32 %v4969_v36, %v3669_v41  ;;  %v4418_v47 = vmul.f32 -1.442695, %v7098_v31 }
 0x6ee   :  { %v3597_v17 = vadd.f32 1.0, %v4971_v52  ;;  %v4973_v57 = vpop.eup %4972 }
 0x6ef   :  { %v3898_v60 = vmul.f32 0.70710677, %v3882_v16  ;;  %v3671_v19 = vadd.f32 %v4969_v36, %v3670_v2  ;;  %4974 = vpow2.f32 %v4418_v47  ;;  %v3683_v28 = vmul.f32 %v4973_v57, %v3596_v55 }
 0x6f0   :  { %4976 = vrcp.f32 %v3597_v17  ;;  %vm3688_vm14 = vweird.f32 %v4973_v57  ;;  %v3708_v23 = vand.u32 2147483648, %v3597_v17  ;;  %vm3702_vm9 = vweird.f32 %v3597_v17 }
 0x6f1   :  { %3914 = vst [vmem:[%s7198_s9 + $0x18] sm:$0xff] %v3898_v60  ;;  %v3675_v11 = vsel %vm3674_vm8, %v4969_v36, %v3671_v19  ;;  %v3684_v24 = vsub.f32 1.0, %v3683_v28  ;;  %vm3689_vm12 = vmor %vm3687_vm0, %vm3688_vm14 }
 0x6f2   :  { %v3680_v1 = vsel %vm3677_vm11, %v3679_v12, %v3675_v11 }
 0x6f3   :  { %v3851_v30 = vmul.f32 %v3680_v1, %v7075_v53  ;;  %v3685_v0 = vmul.f32 %v4973_v57, %v3684_v24 }
 0x6f4   :  { %v7106_v38 = vpop.f32.mrf.mxu1 }
 0x6f5   :  { %v4975_v8 = vpop.eup %4974  ;;  %v3867_v35 = vmul.f32 1.6666666, %v3851_v30  ;;  %v4419_v54 = vmul.f32 -1.442695, %v7106_v38  ;;  %v3686_v43 = vadd.f32 %v4973_v57, %v3685_v0 }
 0x6f6   :  { %v4977_v61 = vpop.eup %4976  ;;  %v3598_v59 = vadd.f32 1.0, %v4975_v8 }
 0x6f7   :  { %v3883_v32 = vadd.f32 %v3867_v35, %v6906_v9  ;;  %v3698_v25 = vmul.f32 %v4977_v61, %v3597_v17  ;;  %4978 = vpow2.f32 %v4419_v54  ;;  %v3690_v53 = vsel %vm3689_vm12, %v4973_v57, %v3686_v43 }
 0x6f8   :  { %4980 = vrcp.f32 %v3598_v59  ;;  %v3695_v20 = vsel %vm3692_vm3, %v3694_v13, %v3690_v53  ;;  %vm3703_vm1 = vweird.f32 %v4977_v61  ;;  %v3706_v9 = vand.u32 2147483647, %v3597_v17 }
 0x6f9   :  { %v3899_v39 = vmul.f32 0.70710677, %v3883_v32  ;;  %v3699_v42 = vsub.f32 1.0, %v3698_v25  ;;  %v3852_v58 = vmul.f32 %v3695_v20, %v7082_v34  ;;  %vm3704_vm4 = vmor %vm3702_vm9, %vm3703_vm1  ;;  %v3709_v34 = vor.u32 1.1754944e-38, %v3708_v23 }
 0x6fa   :  { %vm3707_vm5 = vcmp.eq.f32.partialorder %v3706_v9, 8.507059e+37  ;;  %v3723_v29 = vand.u32 2147483648, %v3598_v59  ;;  %v3721_v16 = vand.u32 2147483647, %v3598_v59  ;;  %vm3717_vm7 = vweird.f32 %v3598_v59 }
 0x6fb   :  { %3915 = vst [vmem:[%s7198_s9 + $0x20] sm:$0xff] %v3899_v39  ;;  %v3700_v27 = vmul.f32 %v4977_v61, %v3699_v42  ;;  %v3868_v14 = vmul.f32 1.6666666, %v3852_v58 }
 0x6fc   :  { %v7114_v33 = vpop.f32.mrf.mxu1  ;;  %v3724_v19 = vor.u32 1.1754944e-38, %v3723_v29  ;;  %vm3722_vm15 = vcmp.eq.f32.partialorder %v3721_v16, 8.507059e+37 }
 0x6fd   :  { %v4979_v45 = vpop.eup %4978  ;;  %v3701_v15 = vadd.f32 %v4977_v61, %v3700_v27  ;;  %v4420_v48 = vmul.f32 -1.442695, %v7114_v33  ;;  %v3884_v55 = vadd.f32 %v3868_v14, %v6904_v3 }
 0x6fe   :  { %v4981_v21 = vpop.eup %4980  ;;  %v3599_v36 = vadd.f32 1.0, %v4979_v45 }
 0x6ff   :  { %v3705_v46 = vsel %vm3704_vm4, %v4977_v61, %v3701_v15  ;;  %v3713_v6 = vmul.f32 %v4981_v21, %v3598_v59  ;;  %4982 = vpow2.f32 %v4420_v48  ;;  %v3900_v56 = vmul.f32 0.70710677, %v3884_v55 }
 0x700   :  { %v3710_v7 = vsel %vm3707_vm5, %v3709_v34, %v3705_v46  ;;  %4984 = vrcp.f32 %v3599_v36  ;;  %vm3718_vm6 = vweird.f32 %v4981_v21  ;;  %v3738_v49 = vand.u32 2147483648, %v3599_v36 }
 0x701   :  { %v3853_v41 = vmul.f32 %v3710_v7, %v7090_v63  ;;  %v3714_v44 = vsub.f32 1.0, %v3713_v6  ;;  %3916 = vst [vmem:[%s7198_s9 + $0x28] sm:$0xff] %v3900_v56  ;;  %vm3719_vm13 = vmor %vm3717_vm7, %vm3718_vm6  ;;  %v3736_v8 = vand.u32 2147483647, %v3599_v36  ;;  %vm3732_vm10 = vweird.f32 %v3599_v36 }
 0x702   :  { %v3739_v32 = vor.u32 1.1754944e-38, %v3738_v49 }
 0x703   :  { %v3869_v52 = vmul.f32 1.6666666, %v3853_v41  ;;  %v3715_v3 = vmul.f32 %v4981_v21, %v3714_v44  ;;  %vm3737_vm11 = vcmp.eq.f32.partialorder %v3736_v8, 8.507059e+37 }
 0x704   :  { %v7122_v2 = vpop.f32.mrf.mxu1 }
 0x705   :  { %v4983_v47 = vpop.eup %4982  ;;  %v3885_v17 = vadd.f32 %v3869_v52, %v6926_v5  ;;  %v3716_v57 = vadd.f32 %v4981_v21, %v3715_v3  ;;  %v4421_v60 = vmul.f32 -1.442695, %v7122_v2 }
 0x706   :  { %v4985_v63 = vpop.eup %4984  ;;  %v3600_v12 = vadd.f32 1.0, %v4983_v47 }
 0x707   :  { %v3901_v28 = vmul.f32 0.70710677, %v3885_v17  ;;  %v3720_v11 = vsel %vm3719_vm13, %v4981_v21, %v3716_v57  ;;  %v3728_v1 = vmul.f32 %v4985_v63, %v3599_v36  ;;  %vm3733_vm2 = vweird.f32 %v4985_v63 }
 0x708   :  { %v3725_v24 = vsel %vm3722_vm15, %v3724_v19, %v3720_v11  ;;  %4986 = vrcp.f32 %v3600_v12  ;;  %vm3734_vm8 = vmor %vm3732_vm10, %vm3733_vm2  ;;  %v3751_v58 = vand.u32 2147483647, %v3600_v12  ;;  %v3753_v23 = vand.u32 2147483648, %v3600_v12 }
 0x709   :  { %3917 = vst [vmem:[%s7198_s9 + $0x30] sm:$0xff] %v3901_v28  ;;  %v3854_v5 = vmul.f32 %v3725_v24, %v7098_v31  ;;  %v3729_v30 = vsub.f32 1.0, %v3728_v1  ;;  %4988 = vpow2.f32 %v4421_v60  ;;  %vm3747_vm0 = vweird.f32 %v3600_v12 }
 0x70a   :  { %vm3752_vm3 = vcmp.eq.f32.partialorder %v3751_v58, 8.507059e+37  ;;  %v3754_v55 = vor.u32 1.1754944e-38, %v3753_v23 }
 0x70b   :  { %v3870_v0 = vmul.f32 1.6666666, %v3854_v5  ;;  %v3730_v40 = vmul.f32 %v4985_v63, %v3729_v30 }
 0x70c   :  { %v7130_v35 = vpop.f32.mrf.mxu1 }
 0x70d   :  { %v3886_v54 = vadd.f32 %v3870_v0, %v6924_v18  ;;  %v3731_v61 = vadd.f32 %v4985_v63, %v3730_v40  ;;  %v4422_v43 = vmul.f32 -1.442695, %v7130_v35 }
 0x70e   :  { %v4987_v59 = vpop.eup %4986 }
 0x70f   :  { %v4989_v13 = vpop.eup %4988  ;;  %v3902_v31 = vmul.f32 0.70710677, %v3886_v54  ;;  %v3735_v25 = vsel %vm3734_vm8, %v4985_v63, %v3731_v61  ;;  %v3743_v53 = vmul.f32 %v4987_v59, %v3600_v12  ;;  %4990 = vpow2.f32 %v4422_v43 }
 0x710   :  { %v3740_v39 = vsel %vm3737_vm11, %v3739_v32, %v3735_v25  ;;  %v3601_v20 = vadd.f32 1.0, %v4989_v13  ;;  %vm3748_vm14 = vweird.f32 %v4987_v59 }
 0x711   :  { %3918 = vst [vmem:[%s7198_s9 + $0x38] sm:$0xff] %v3902_v31  ;;  %v3855_v18 = vmul.f32 %v3740_v39, %v7106_v38  ;;  %v3744_v42 = vsub.f32 1.0, %v3743_v53  ;;  %vm3749_vm12 = vmor %vm3747_vm0, %vm3748_vm14 }
 0x712   :  { %4992 = vrcp.f32 %v3601_v20  ;;  %v3766_v44 = vand.u32 2147483647, %v3601_v20  ;;  %v3768_v29 = vand.u32 2147483648, %v3601_v20  ;;  %vm3762_vm9 = vweird.f32 %v3601_v20 }
 0x713   :  { %v3871_v27 = vmul.f32 1.6666666, %v3855_v18  ;;  %v3745_v9 = vmul.f32 %v4987_v59, %v3744_v42 }
 0x714   :  { %v7138_v14 = vpop.f32.mrf.mxu1  ;;  %vm3767_vm5 = vcmp.eq.f32.partialorder %v3766_v44, 8.507059e+37 }
 0x715   :  { %v3887_v45 = vadd.f32 %v3871_v27, %v6945_v51  ;;  %v3746_v15 = vadd.f32 %v4987_v59, %v3745_v9  ;;  %v4423_v48 = vmul.f32 -1.442695, %v7138_v14  ;;  %v4991_v21 = vpop.eup %4990 }
 0x716   :  { %v3602_v36 = vadd.f32 1.0, %v4991_v21 }
 0x717   :  { %v3903_v38 = vmul.f32 0.70710677, %v3887_v45  ;;  %v3750_v34 = vsel %vm3749_vm12, %v4987_v59, %v3746_v15  ;;  %4994 = vpow2.f32 %v4423_v48 }
 0x718   :  { %v4993_v46 = vpop.eup %4992  ;;  %v3755_v6 = vsel %vm3752_vm3, %v3754_v55, %v3750_v34  ;;  %4996 = vrcp.f32 %v3602_v36  ;;  %v3783_v24 = vand.u32 2147483648, %v3602_v36  ;;  %v3781_v30 = vand.u32 2147483647, %v3602_v36 }
 0x719   :  { %3919 = vst [vmem:[%s7198_s9 + $0x40] sm:$0xff] %v3903_v38  ;;  %v3856_v51 = vmul.f32 %v3755_v6, %v7114_v33  ;;  %v3758_v56 = vmul.f32 %v4993_v46, %v3601_v20  ;;  %vm3763_vm1 = vweird.f32 %v4993_v46  ;;  %v3769_v33 = vor.u32 1.1754944e-38, %v3768_v29 }
 0x71a   :  { %vm3764_vm4 = vmor %vm3762_vm9, %vm3763_vm1  ;;  %vm3777_vm7 = vweird.f32 %v3602_v36  ;;  %v3784_v32 = vor.u32 1.1754944e-38, %v3783_v24  ;;  %vm3782_vm15 = vcmp.eq.f32.partialorder %v3781_v30, 8.507059e+37 }
 0x71b   :  { %v3872_v7 = vmul.f32 1.6666666, %v3856_v51  ;;  %v3759_v41 = vsub.f32 1.0, %v3758_v56 }
 0x71c   :  { %v7146_v52 = vpop.f32.mrf.mxu1 }
 0x71d   :  { %v4995_v3 = vpop.eup %4994  ;;  %v3888_v16 = vadd.f32 %v3872_v7, %v6943_v4  ;;  %v3760_v47 = vmul.f32 %v4993_v46, %v3759_v41  ;;  %v4424_v17 = vmul.f32 -1.442695, %v7146_v52 }
 0x71e   :  { %v3603_v57 = vadd.f32 1.0, %v4995_v3  ;;  %v4997_v60 = vpop.eup %4996 }
 0x71f   :  { %v3904_v63 = vmul.f32 0.70710677, %v3888_v16  ;;  %v3761_v19 = vadd.f32 %v4993_v46, %v3760_v47  ;;  %4998 = vpow2.f32 %v4424_v17  ;;  %v3773_v12 = vmul.f32 %v4997_v60, %v3602_v36 }
 0x720   :  { %5000 = vrcp.f32 %v3603_v57  ;;  %vm3778_vm6 = vweird.f32 %v4997_v60  ;;  %v3798_v20 = vand.u32 2147483648, %v3603_v57  ;;  %vm3792_vm10 = vweird.f32 %v3603_v57 }
 0x721   :  { %3920 = vst [vmem:[%s7198_s9 + $0x48] sm:$0xff] %v3904_v63  ;;  %v3765_v28 = vsel %vm3764_vm4, %v4993_v46, %v3761_v19  ;;  %v3774_v11 = vsub.f32 1.0, %v3773_v12  ;;  %vm3779_vm13 = vmor %vm3777_vm7, %vm3778_vm6 }
 0x722   :  { %v3770_v4 = vsel %vm3767_vm5, %v3769_v33, %v3765_v28 }
 0x723   :  { %v3857_v1 = vmul.f32 %v3770_v4, %v7122_v2  ;;  %v3775_v5 = vmul.f32 %v4997_v60, %v3774_v11 }
 0x724   :  { %v7154_v49 = vpop.f32.mrf.mxu1 }
 0x725   :  { %v4999_v0 = vpop.eup %4998  ;;  %v3873_v40 = vmul.f32 1.6666666, %v3857_v1  ;;  %v4425_v8 = vmul.f32 -1.442695, %v7154_v49  ;;  %v3776_v61 = vadd.f32 %v4997_v60, %v3775_v5 }
 0x726   :  { %v5001_v54 = vpop.eup %5000  ;;  %v3604_v43 = vadd.f32 1.0, %v4999_v0 }
 0x727   :  { %v3889_v59 = vadd.f32 %v3873_v40, %v6971_v62  ;;  %v3788_v13 = vmul.f32 %v5001_v54, %v3603_v57  ;;  %5002 = vpow2.f32 %v4425_v8  ;;  %v3780_v2 = vsel %vm3779_vm13, %v4997_v60, %v3776_v61 }
 0x728   :  { %5004 = vrcp.f32 %v3604_v43  ;;  %v3785_v25 = vsel %vm3782_vm15, %v3784_v32, %v3780_v2  ;;  %vm3793_vm2 = vweird.f32 %v5001_v54  ;;  %v3796_v62 = vand.u32 2147483647, %v3603_v57 }
 0x729   :  { %v3905_v31 = vmul.f32 0.70710677, %v3889_v59  ;;  %v3789_v53 = vsub.f32 1.0, %v3788_v13  ;;  %v3858_v39 = vmul.f32 %v3785_v25, %v7130_v35  ;;  %vm3794_vm8 = vmor %vm3792_vm10, %vm3793_vm2  ;;  %v3799_v35 = vor.u32 1.1754944e-38, %v3798_v20 }
 0x72a   :  { %vm3797_vm11 = vcmp.eq.f32.partialorder %v3796_v62, 8.507059e+37  ;;  %v3813_v6 = vand.u32 2147483648, %v3604_v43  ;;  %v3811_v56 = vand.u32 2147483647, %v3604_v43  ;;  %vm3807_vm0 = vweird.f32 %v3604_v43 }
 0x72b   :  { %3921 = vst [vmem:[%s7198_s9 + $0x50] sm:$0xff] %v3905_v31  ;;  %v3790_v18 = vmul.f32 %v5001_v54, %v3789_v53  ;;  %v3874_v42 = vmul.f32 1.6666666, %v3858_v39 }
 0x72c   :  { %v7162_v58 = vpop.f32.mrf.mxu1  ;;  %v3814_v3 = vor.u32 1.1754944e-38, %v3813_v6  ;;  %vm3812_vm3 = vcmp.eq.f32.partialorder %v3811_v56, 8.507059e+37 }
 0x72d   :  { %v5003_v23 = vpop.eup %5002  ;;  %v3791_v27 = vadd.f32 %v5001_v54, %v3790_v18  ;;  %v4426_v9 = vmul.f32 -1.442695, %v7162_v58  ;;  %v3890_v15 = vadd.f32 %v3874_v42, %v6966_v37 }
 0x72e   :  { %v5005_v45 = vpop.eup %5004  ;;  %v3605_v48 = vadd.f32 1.0, %v5003_v23 }
 0x72f   :  { %v3795_v21 = vsel %vm3794_vm8, %v5001_v54, %v3791_v27  ;;  %v3803_v55 = vmul.f32 %v5005_v45, %v3604_v43  ;;  %5006 = vpow2.f32 %v4426_v9  ;;  %v3906_v38 = vmul.f32 0.70710677, %v3890_v15 }
 0x730   :  { %v3800_v34 = vsel %vm3797_vm11, %v3799_v35, %v3795_v21  ;;  %5008 = vrcp.f32 %v3605_v48  ;;  %vm3808_vm14 = vweird.f32 %v5005_v45  ;;  %v3826_v12 = vand.u32 2147483647, %v3605_v48 }
 0x731   :  { %v3859_v36 = vmul.f32 %v3800_v34, %v7138_v14  ;;  %v3804_v46 = vsub.f32 1.0, %v3803_v55  ;;  %3922 = vst [vmem:[%s7198_s9 + $0x58] sm:$0xff] %v3906_v38  ;;  %vm3809_vm12 = vmor %vm3807_vm0, %vm3808_vm14  ;;  %vm3822_vm9 = vweird.f32 %v3605_v48 }
 0x732   :  { %vm3827_vm5 = vcmp.eq.f32.partialorder %v3826_v12, 8.507059e+37 }
 0x733   :  { %v3875_v51 = vmul.f32 1.6666666, %v3859_v36  ;;  %v3805_v37 = vmul.f32 %v5005_v45, %v3804_v46 }
 0x735   :  { %v5007_v7 = vpop.eup %5006  ;;  %v3891_v41 = vadd.f32 %v3875_v51, %v6987_v50  ;;  %v3806_v44 = vadd.f32 %v5005_v45, %v3805_v37  ;;  %v3828_v50 = vand.u32 2147483648, %v3605_v48 }
 0x736   :  { %v5009_v29 = vpop.eup %5008  ;;  %v3606_v16 = vadd.f32 1.0, %v5007_v7 }
 0x737   :  { %v3907_v14 = vmul.f32 0.70710677, %v3891_v41  ;;  %v3810_v47 = vsel %vm3809_vm12, %v5005_v45, %v3806_v44  ;;  %v3818_v17 = vmul.f32 %v5009_v29, %v3605_v48  ;;  %vm3823_vm1 = vweird.f32 %v5009_v29 }
 0x738   :  { %v3815_v57 = vsel %vm3812_vm3, %v3814_v3, %v3810_v47  ;;  %5010 = vrcp.f32 %v3606_v16  ;;  %vm3824_vm4 = vmor %vm3822_vm9, %vm3823_vm1  ;;  %v3829_v1 = vor.u32 1.1754944e-38, %v3828_v50  ;;  %v3843_v8 = vand.u32 2147483648, %v3606_v16 }
 0x739   :  { %3923 = vst [vmem:[%s7198_s9 + $0x60] sm:$0xff] %v3907_v14  ;;  %v3860_v60 = vmul.f32 %v3815_v57, %v7146_v52  ;;  %v3819_v63 = vsub.f32 1.0, %v3818_v17  ;;  %v3841_v61 = vand.u32 2147483647, %v3606_v16  ;;  %vm3837_vm7 = vweird.f32 %v3606_v16 }
 0x73a   :  { %v3844_v32 = vor.u32 1.1754944e-38, %v3843_v8 }
 0x73b   :  { %v3876_v19 = vmul.f32 1.6666666, %v3860_v60  ;;  %v3820_v33 = vmul.f32 %v5009_v29, %v3819_v63  ;;  %vm3842_vm15 = vcmp.eq.f32.partialorder %v3841_v61, 8.507059e+37 }
 0x73d   :  { %v3892_v28 = vadd.f32 %v3876_v19, %v6985_v26  ;;  %v3821_v4 = vadd.f32 %v5009_v29, %v3820_v33 }
 0x73e   :  { %v5011_v11 = vpop.eup %5010 }
 0x73f   :  { %v3908_v24 = vmul.f32 0.70710677, %v3892_v28  ;;  %v3825_v5 = vsel %vm3824_vm4, %v5009_v29, %v3821_v4  ;;  %v3833_v30 = vmul.f32 %v5011_v11, %v3606_v16  ;;  %vm3838_vm6 = vweird.f32 %v5011_v11 }
 0x740   :  { %v3830_v0 = vsel %vm3827_vm5, %v3829_v1, %v3825_v5  ;;  %vm3839_vm13 = vmor %vm3837_vm7, %vm3838_vm6 }
 0x741   :  { %3924 = vst [vmem:[%s7198_s9 + $0x68] sm:$0xff] %v3908_v24  ;;  %v3861_v52 = vmul.f32 %v3830_v0, %v7154_v49  ;;  %v3834_v40 = vsub.f32 1.0, %v3833_v30 }
 0x743   :  { %v3877_v54 = vmul.f32 1.6666666, %v3861_v52  ;;  %v3835_v26 = vmul.f32 %v5011_v11, %v3834_v40 }
 0x745   :  { %v3893_v43 = vadd.f32 %v3877_v54, %v6997_v22  ;;  %v3836_v59 = vadd.f32 %v5011_v11, %v3835_v26 }
 0x747   :  { %v3909_v13 = vmul.f32 0.70710677, %v3893_v43  ;;  %v3840_v2 = vsel %vm3839_vm13, %v5011_v11, %v3836_v59 }
 0x748   :  { %v3845_v31 = vsel %vm3842_vm15, %v3844_v32, %v3840_v2 }
 0x749   :  { %3925 = vst [vmem:[%s7198_s9 + $0x70] sm:$0xff] %v3909_v13  ;;  %v3862_v49 = vmul.f32 %v3845_v31, %v7162_v58 }
 0x74b   :  { %v3878_v25 = vmul.f32 1.6666666, %v3862_v49 }
 0x74d   :  { %v3894_v53 = vadd.f32 %v3878_v25, %v6995_v10 }
 0x74f   :  { %v3910_v39 = vmul.f32 0.70710677, %v3894_v53 }
 0x751   :  { %3926 = vst [vmem:[%s7198_s9 + $0x78] sm:$0xff] %v3910_v39 }

</bundles_post_ra>
